<compile_context>
chip_gen: v7x
topology: tpu7x:2x2x1
jax: 0.10.0
libtpu: 0.0.40
codegen_flags: <defaults>
</compile_context>

<pallas_src>
import functools

import jax
import jax.numpy as jnp
import numpy as np
from jax import lax
from jax.experimental import pallas as pl
from jax.experimental.pallas import tpu as pltpu

LANE = 128   # lane width (last-dim tiling)
MSUB = 16    # second-minor rounding for bf16 sublane packing
EPS = 1e-5


def _round_up(x, m):
    return ((x + m - 1) // m) * m


def _physical_vmem_bytes():
    try:
        return int(pltpu.get_tpu_info().vmem_capacity_bytes)
    except Exception:
        return 64 << 20            # conservative (v7x per-TensorCore)


_PHYS_VMEM = _physical_vmem_bytes()


def _vmem_limit(est_bytes):
    cap = int(_PHYS_VMEM * 9 // 10)
    return max(min(int(2 * est_bytes), cap), min(32 << 20, cap))


def _channel_tile(op):
    return 256 if op % 256 == 0 else 128


# ------------------- fused 1x1 conv + InstanceNorm kernel -------------------

def _pointwise_kernel(inv_m, relu, has_residual):
    def kernel(x_ref, w_ref, g_ref, b_ref, *rest):
        if has_residual:
            res_ref, o_ref = rest
        else:
            (o_ref,) = rest
        x = x_ref[0]                                    # (Mp, Kp) bf16
        acc = jnp.dot(x, w_ref[...], preferred_element_type=jnp.float32)
        # One-pass IN stats: zero-padded rows/channels contribute exactly 0
        # (inputs zero padded, no conv bias), so no masking is needed.
        s1 = jnp.sum(acc, axis=0, keepdims=True)
        s2 = jnp.sum(acc * acc, axis=0, keepdims=True)
        mean = s1 * inv_m
        var = s2 * inv_m - mean * mean
        scale = lax.rsqrt(var + EPS) * g_ref[...]       # EUP rsqrt
        shift = b_ref[...] - mean * scale
        y = acc * scale + shift
        if has_residual:
            y = y + res_ref[0].astype(jnp.float32)
        if relu:
            y = jnp.maximum(y, 0.0)
        o_ref[0] = y.astype(o_ref.dtype)
    return kernel


def fused_conv1x1_in(x_p, w_ko, gamma, beta, *, m_real, relu,
                     residual_p=None, out_dtype=jnp.bfloat16):
    """1x1 conv + InstanceNorm + affine [+ residual] [+ ReLU].

    x_p: (N, Mp, Kp) bf16 channels-last, zero-padded rows/channels.
    w_ko: (K, O) unpadded weight.  Returns (N, Mp, Op) padded output."""
    N, Mp, Kp = x_p.shape
    K, O = w_ko.shape
    Op = _round_up(O, LANE)
    TO = _channel_tile(Op)

    w_p = jnp.pad(w_ko.astype(jnp.float32),
                  ((0, Kp - K), (0, Op - O))).astype(jnp.bfloat16)
    g_p = jnp.pad(gamma.reshape(1, O).astype(jnp.float32), ((0, 0), (0, Op - O)))
    b_p = jnp.pad(beta.reshape(1, O).astype(jnp.float32), ((0, 0), (0, Op - O)))

    inputs = [x_p, w_p, g_p, b_p]
    in_specs = [
        pl.BlockSpec((1, Mp, Kp), lambda n, j: (n, 0, 0)),
        pl.BlockSpec((Kp, TO), lambda n, j: (0, j)),
        pl.BlockSpec((1, TO), lambda n, j: (0, j)),
        pl.BlockSpec((1, TO), lambda n, j: (0, j)),
    ]
    if residual_p is not None:
        assert residual_p.shape == (N, Mp, Op), (residual_p.shape, (N, Mp, Op))
        inputs.append(residual_p)
        in_specs.append(pl.BlockSpec((1, Mp, TO), lambda n, j: (n, 0, j)))

    out_b = jnp.dtype(out_dtype).itemsize
    res_b = (2 * Mp * TO * residual_p.dtype.itemsize) if residual_p is not None else 0
    est = (2 * Mp * Kp * 2 + 2 * Kp * TO * 2 + 2 * Mp * TO * out_b
           + res_b + 2 * Mp * TO * 4 + 8 * TO * 4)

    return pl.pallas_call(
        _pointwise_kernel(1.0 / float(m_real), relu, residual_p is not None),
        out_shape=jax.ShapeDtypeStruct((N, Mp, Op), out_dtype),
        grid_spec=pltpu.PrefetchScalarGridSpec(
            num_scalar_prefetch=0,
            grid=(N, Op // TO),
            in_specs=in_specs,
            out_specs=pl.BlockSpec((1, Mp, TO), lambda n, j: (n, 0, j)),
        ),
        compiler_params=pltpu.CompilerParams(
            dimension_semantics=("parallel", "parallel"),
            vmem_limit_bytes=_vmem_limit(est)),
    )(*inputs)


# -------- fused 3x3 conv (taps in-kernel) + InstanceNorm + ReLU kernel ------

def _conv3x3_kernel(tap_offsets, cp, m_in, inv_m):
    def kernel(x_ref, w_ref, mask_ref, g_ref, b_ref, o_ref):
        xf = x_ref[0]                                   # (Mp_in, Cp) bf16 halo tile
        # Per-tap MXU matmuls on the full (aligned) halo tile; the tap's row
        # shift on the flattened padded grid is applied to the f32 result with
        # an XLU roll -> no unaligned / packed-bf16 slicing anywhere.
        acc = jnp.dot(xf, w_ref[0:cp, :], preferred_element_type=jnp.float32)
        for t in range(1, 9):
            off = tap_offsets[t]
            p = jnp.dot(xf, w_ref[t * cp:(t + 1) * cp, :],
                        preferred_element_type=jnp.float32)
            acc = acc + pltpu.roll(p, m_in - off, 0)
        acc = acc * mask_ref[...]      # zero halo-garbage / non-strided / pad rows
        s1 = jnp.sum(acc, axis=0, keepdims=True)
        s2 = jnp.sum(acc * acc, axis=0, keepdims=True)
        mean = s1 * inv_m
        var = s2 * inv_m - mean * mean
        scale = lax.rsqrt(var + EPS) * g_ref[...]
        shift = b_ref[...] - mean * scale
        o_ref[0] = jnp.maximum(acc * scale + shift, 0.0).astype(o_ref.dtype)
    return kernel


def fused_conv3x3_in(y_p, w_oihw, gamma, beta, *, H, W, stride):
    """3x3 conv (pad=1, given stride) + InstanceNorm + affine + ReLU.

    y_p: (N, Mp, Cp) bf16 channels-last flat activations (valid rows [0, H*W)).
    Returns (y_dense, Wpad): dense stride-1 output on the (H, W+2) padded grid,
    shape (N, Mp_in, Op) bf16; caller gathers rows h*stride / cols w*stride."""
    N, _, Cp = y_p.shape
    O, C = w_oihw.shape[0], w_oihw.shape[1]
    Op = _round_up(O, LANE)
    TO = _channel_tile(Op)

    Wpad = W + 2
    Hpad = H + 2
    m_dense = H * Wpad                 # dense output rows (incl. 2 garbage cols/row)
    Mp_in = _round_up(_round_up(m_dense, MSUB) + 2 * Wpad + 2, MSUB)

    # halo layout: 1-pixel spatial zero pad, flattened, zero padded to Mp_in rows
    y_hw = y_p[:, :H * W, :].reshape(N, H, W, Cp)
    x_halo = jnp.pad(y_hw, ((0, 0), (1, 1), (1, 1), (0, 0)))
    x_flat = x_halo.reshape(N, Hpad * Wpad, Cp)
    x_flat = jnp.pad(x_flat, ((0, 0), (0, Mp_in - Hpad * Wpad), (0, 0)))
    x_flat = x_flat.astype(jnp.bfloat16)

    # per-tap weights stacked along K: rows [t*Cp, (t+1)*Cp) = w[:, :, kh, kw].T
    w_taps = jnp.transpose(w_oihw.astype(jnp.float32), (2, 3, 1, 0)).reshape(9, C, O)
    w_p = jnp.pad(w_taps, ((0, 0), (0, Cp - C), (0, Op - O)))
    w_p = w_p.reshape(9 * Cp, Op).astype(jnp.bfloat16)

    g_p = jnp.pad(gamma.reshape(1, O).astype(jnp.float32), ((0, 0), (0, Op - O)))
    b_p = jnp.pad(beta.reshape(1, O).astype(jnp.float32), ((0, 0), (0, Op - O)))

    # validity mask over the dense grid: drop the 2 right-halo columns per row,
    # rows beyond H*Wpad and (for stride>1) the non-strided positions, so the
    # IN statistics exactly match the strided conv output.
    q = np.arange(Mp_in)
    hh, ww = q // Wpad, q % Wpad
    valid = (q < m_dense) & (ww < W) & (hh % stride == 0) & (ww % stride == 0)
    mask = jnp.asarray(valid.astype(np.float32).reshape(Mp_in, 1))

    oH = (H - 1) // stride + 1
    oW = (W - 1) // stride + 1
    tap_offsets = tuple(kh * Wpad + kw for kh in range(3) for kw in range(3))

    est = (2 * Mp_in * Cp * 2 + 2 * 9 * Cp * TO * 2 + 2 * Mp_in * TO * 2
           + 3 * Mp_in * TO * 4 + 2 * Mp_in * 4 + 8 * TO * 4)

    y = pl.pallas_call(
        _conv3x3_kernel(tap_offsets, Cp, Mp_in, 1.0 / float(oH * oW)),
        out_shape=jax.ShapeDtypeStruct((N, Mp_in, Op), jnp.bfloat16),
        grid_spec=pltpu.PrefetchScalarGridSpec(
            num_scalar_prefetch=0,
            grid=(N, Op // TO),
            in_specs=[
                pl.BlockSpec((1, Mp_in, Cp), lambda n, j: (n, 0, 0)),
                pl.BlockSpec((9 * Cp, TO), lambda n, j: (0, j)),
                pl.BlockSpec((Mp_in, 1), lambda n, j: (0, 0)),
                pl.BlockSpec((1, TO), lambda n, j: (0, j)),
                pl.BlockSpec((1, TO), lambda n, j: (0, j)),
            ],
            out_specs=pl.BlockSpec((1, Mp_in, TO), lambda n, j: (n, 0, j)),
        ),
        compiler_params=pltpu.CompilerParams(
            dimension_semantics=("parallel", "parallel"),
            vmem_limit_bytes=_vmem_limit(est)),
    )(x_flat, w_p, mask, g_p, b_p)
    return y, Wpad


# ----------------------------- forward pass --------------------------------

@functools.partial(jax.jit, static_argnames=("stride",))
def res_bottleneck_forward(x, params, stride):
    N, in_C, H, W = x.shape
    mid = params["w1"].shape[0]
    out_C = params["w3"].shape[0]

    oH = (H - 1) // stride + 1
    oW = (W - 1) // stride + 1

    Cin_p = _round_up(in_C, LANE)
    M1, M1p = H * W, _round_up(H * W, MSUB)
    M3, M3p = oH * oW, _round_up(oH * oW, MSUB)

    # channels-last padded bf16 input (reused as the identity-shortcut residual)
    x_cl = jnp.transpose(x, (0, 2, 3, 1)).reshape(N, M1, in_C)
    x_p = jnp.pad(x_cl, ((0, 0), (0, M1p - M1), (0, Cin_p - in_C))).astype(jnp.bfloat16)

    # conv1 (1x1) + IN + ReLU
    w1 = params["w1"].reshape(mid, in_C).T
    y1 = fused_conv1x1_in(x_p, w1, params["g1"], params["be1"],
                          m_real=M1, relu=True, out_dtype=jnp.bfloat16)

    # conv2 (3x3, stride, pad=1) + IN + ReLU — taps fused in-kernel, no im2col
    y2_dense, Wpad = fused_conv3x3_in(y1, params["w2"], params["g2"],
                                      params["be2"], H=H, W=W, stride=stride)
    Cmid_p = y2_dense.shape[-1]
    y2 = y2_dense[:, :H * Wpad, :].reshape(N, H, Wpad, Cmid_p)
    y2 = y2[:, 0:H:stride, 0:W:stride, :].reshape(N, M3, Cmid_p)
    y2 = jnp.pad(y2, ((0, 0), (0, M3p - M3), (0, 0)))

    # shortcut (bf16, kept in the padded layout so it feeds conv3 directly)
    if stride != 1 or in_C != out_C:
        xs = x_cl.reshape(N, H, W, in_C)[:, 0:H:stride, 0:W:stride, :]
        xs = xs.reshape(N, M3, in_C)
        xs_p = jnp.pad(xs, ((0, 0), (0, M3p - M3),
                            (0, Cin_p - in_C))).astype(jnp.bfloat16)
        wsc = params["wsc"].reshape(out_C, in_C).T
        sc = fused_conv1x1_in(xs_p, wsc, params["gsc"], params["besc"],
                              m_real=M3, relu=False, out_dtype=jnp.bfloat16)
    else:
        sc = x_p                      # identity: already padded bf16, same layout

    # conv3 (1x1) + IN + residual add + ReLU (single fused kernel)
    w3 = params["w3"].reshape(out_C, mid).T
    y3 = fused_conv1x1_in(y2, w3, params["g3"], params["be3"],
                          m_real=M3, relu=True, residual_p=sc,
                          out_dtype=jnp.float32)
    y3 = y3[:, :M3, :out_C].reshape(N, oH, oW, out_C)
    return jnp.transpose(y3, (0, 3, 1, 2))


# ------------------------------ reference -----------------------------------

def _instance_norm_ref(x, gamma, beta):
    mean = x.mean(axis=(2, 3), keepdims=True)
    var = ((x - mean) ** 2).mean(axis=(2, 3), keepdims=True)
    xn = (x - mean) * lax.rsqrt(var + EPS)
    return xn * gamma.reshape(1, -1, 1, 1) + beta.reshape(1, -1, 1, 1)


def _conv2d_ref(x, w, b, stride=1, padding=0):
    # bf16 operands + f32 accumulation to match the kernel's MXU precision
    out = lax.conv_general_dilated(
        x.astype(jnp.bfloat16), w.astype(jnp.bfloat16),
        window_strides=(stride, stride),
        padding=[(padding, padding)] * 2,
        dimension_numbers=("NCHW", "OIHW", "NCHW"),
        preferred_element_type=jnp.float32)
    return out + b.reshape(1, -1, 1, 1)


def ref_res_bottleneck(x, params, stride):
    in_C = x.shape[1]
    out_C = params["w3"].shape[0]
    out = _conv2d_ref(x, params["w1"], params["b1"])
    out = jax.nn.relu(_instance_norm_ref(out, params["g1"], params["be1"]))
    out = _conv2d_ref(out, params["w2"], params["b2"], stride=stride, padding=1)
    out = jax.nn.relu(_instance_norm_ref(out, params["g2"], params["be2"]))
    out = _conv2d_ref(out, params["w3"], params["b3"])
    out = _instance_norm_ref(out, params["g3"], params["be3"])
    if stride != 1 or in_C != out_C:
        sc = _conv2d_ref(x, params["wsc"], params["bsc"], stride=stride)
        sc = _instance_norm_ref(sc, params["gsc"], params["besc"])
        out = out + sc
    else:
        out = out + x
    return jax.nn.relu(out)


def init_params(key, in_C, out_C, need_proj):
    mid = out_C // 4
    ks = jax.random.split(key, 16)
    p = {
        "w1": 0.3 * jax.random.normal(ks[0], (mid, in_C, 1, 1), jnp.float32),
        "b1": 0.1 * jax.random.normal(ks[1], (mid,), jnp.float32),
        "g1": 1.0 + 0.1 * jax.random.normal(ks[2], (mid,), jnp.float32),
        "be1": 0.1 * jax.random.normal(ks[3], (mid,), jnp.float32),
        "w2": 0.3 * jax.random.normal(ks[4], (mid, mid, 3, 3), jnp.float32),
        "b2": 0.1 * jax.random.normal(ks[5], (mid,), jnp.float32),
        "g2": 1.0 + 0.1 * jax.random.normal(ks[6], (mid,), jnp.float32),
        "be2": 0.1 * jax.random.normal(ks[7], (mid,), jnp.float32),
        "w3": 0.3 * jax.random.normal(ks[8], (out_C, mid, 1, 1), jnp.float32),
        "b3": 0.1 * jax.random.normal(ks[9], (out_C,), jnp.float32),
        "g3": 1.0 + 0.1 * jax.random.normal(ks[10], (out_C,), jnp.float32),
        "be3": 0.1 * jax.random.normal(ks[11], (out_C,), jnp.float32),
    }
    if need_proj:
        p.update({
            "wsc": 0.3 * jax.random.normal(ks[12], (out_C, in_C, 1, 1), jnp.float32),
            "bsc": 0.1 * jax.random.normal(ks[13], (out_C,), jnp.float32),
            "gsc": 1.0 + 0.1 * jax.random.normal(ks[14], (out_C,), jnp.float32),
            "besc": 0.1 * jax.random.normal(ks[15], (out_C,), jnp.float32),
        })
    return p


if __name__ == "__main__":
    key = jax.random.PRNGKey(0)
    configs = [
        # (N, in_C, out_C, H, W, stride)
        (2, 8, 8, 16, 16, 1),    # identity shortcut
        (2, 4, 16, 16, 16, 2),   # projection shortcut (stride 2, channel change)
    ]
    for (N, in_C, out_C, H, W, stride) in configs:
        kx, kp, key = jax.random.split(key, 3)
        x = jax.random.normal(kx, (N, in_C, H, W), jnp.float32)
        need_proj = (stride != 1) or (in_C != out_C)
        params = init_params(kp, in_C, out_C, need_proj)

        out = jax.block_until_ready(res_bottleneck_forward(x, params, stride=stride))
        ref = jax.block_until_ready(ref_res_bottleneck(x, params, stride))

        assert out.shape == ref.shape, (out.shape, ref.shape)
        # conv bias is dropped in the kernels (InstanceNorm cancels it) but kept
        # in the reference: results must still agree.
        np.testing.assert_allclose(np.asarray(out), np.asarray(ref),
                                   rtol=3e-2, atol=3e-2)
    print("KERNEL_OK")
</pallas_src>

<mosaic_0001>
module attributes {stable_mosaic.version = 11 : i64} {
  func.func @kernel(%arg0: i32, %arg1: i32, %arg2: memref<1x256x128xbf16, #tpu.memory_space<vmem>>, %arg3: memref<128x128xbf16, #tpu.memory_space<vmem>>, %arg4: memref<1x128xf32, #tpu.memory_space<vmem>>, %arg5: memref<1x128xf32, #tpu.memory_space<vmem>>, %arg6: memref<1x256x128xbf16, #tpu.memory_space<vmem>>) attributes {dimension_semantics = [#tpu.dimension_semantics<parallel>, #tpu.dimension_semantics<parallel>], iteration_bounds = array<i64: 2, 1>, scalar_prefetch = 0 : i64, scratch_operands = 0 : i64, tpu.core_type = #tpu.core_type<tc>, window_params = [{transform_indices = @transform_0, window_bounds = array<i64: 1, 256, 128>}, {transform_indices = @transform_1, window_bounds = array<i64: 128, 128>}, {transform_indices = @transform_2, window_bounds = array<i64: 1, 128>}, {transform_indices = @transform_3, window_bounds = array<i64: 1, 128>}, {transform_indices = @transform_4, window_bounds = array<i64: 1, 256, 128>}]} {
    %c0 = arith.constant 0 : index
    %c0_0 = arith.constant 0 : index
    %c0_1 = arith.constant 0 : index
    %0 = vector.load %arg2[%c0, %c0_0, %c0_1] : memref<1x256x128xbf16, #tpu.memory_space<vmem>>, vector<1x256x128xbf16>
    %1 = vector.shape_cast %0 : vector<1x256x128xbf16> to vector<256x128xbf16>
    %c0_2 = arith.constant 0 : index
    %c0_3 = arith.constant 0 : index
    %2 = vector.load %arg3[%c0_2, %c0_3] : memref<128x128xbf16, #tpu.memory_space<vmem>>, vector<128x128xbf16>
    %cst = arith.constant dense<0.000000e+00> : vector<256x128xf32>
    %3 = tpu.matmul %1, %2, %cst {dimension_numbers = #tpu.dot_dimension_numbers<[1], [0], [0], [1], [0, 0, 1, 1], [], []>} : vector<256x128xbf16>, vector<128x128xbf16>, vector<256x128xf32> -> vector<256x128xf32>
    %cst_4 = arith.constant dense<0.000000e+00> : vector<128xf32>
    %4 = vector.multi_reduction <add>, %3, %cst_4 [0] : vector<256x128xf32> to vector<128xf32>
    %5 = vector.shape_cast %4 : vector<128xf32> to vector<1x128xf32>
    %6 = arith.mulf %3, %3 : vector<256x128xf32>
    %cst_5 = arith.constant dense<0.000000e+00> : vector<128xf32>
    %7 = vector.multi_reduction <add>, %6, %cst_5 [0] : vector<256x128xf32> to vector<128xf32>
    %8 = vector.shape_cast %7 : vector<128xf32> to vector<1x128xf32>
    %cst_6 = arith.constant 3.906250e-03 : f32
    %9 = vector.broadcast %cst_6 : f32 to vector<1x128xf32>
    %10 = arith.mulf %5, %9 : vector<1x128xf32>
    %cst_7 = arith.constant 3.906250e-03 : f32
    %11 = vector.broadcast %cst_7 : f32 to vector<1x128xf32>
    %12 = arith.mulf %8, %11 : vector<1x128xf32>
    %13 = arith.mulf %10, %10 : vector<1x128xf32>
    %14 = arith.subf %12, %13 : vector<1x128xf32>
    %cst_8 = arith.constant 9.99999974E-6 : f32
    %15 = vector.broadcast %cst_8 : f32 to vector<1x128xf32>
    %16 = arith.addf %14, %15 : vector<1x128xf32>
    %17 = math.rsqrt %16 : vector<1x128xf32>
    %c0_9 = arith.constant 0 : index
    %c0_10 = arith.constant 0 : index
    %18 = vector.load %arg4[%c0_9, %c0_10] : memref<1x128xf32, #tpu.memory_space<vmem>>, vector<1x128xf32>
    %19 = arith.mulf %17, %18 : vector<1x128xf32>
    %c0_11 = arith.constant 0 : index
    %c0_12 = arith.constant 0 : index
    %20 = vector.load %arg5[%c0_11, %c0_12] : memref<1x128xf32, #tpu.memory_space<vmem>>, vector<1x128xf32>
    %21 = arith.mulf %10, %19 : vector<1x128xf32>
    %22 = arith.subf %20, %21 : vector<1x128xf32>
    %23 = vector.broadcast %19 : vector<1x128xf32> to vector<256x128xf32>
    %24 = arith.mulf %3, %23 : vector<256x128xf32>
    %25 = vector.broadcast %22 : vector<1x128xf32> to vector<256x128xf32>
    %26 = arith.addf %24, %25 : vector<256x128xf32>
    %cst_13 = arith.constant 0.000000e+00 : f32
    %27 = vector.broadcast %cst_13 : f32 to vector<256x128xf32>
    %28 = arith.maximumf %26, %27 : vector<256x128xf32>
    %29 = arith.truncf %28 : vector<256x128xf32> to vector<256x128xbf16>
    %c0_14 = arith.constant 0 : index
    %c0_15 = arith.constant 0 : index
    %c0_16 = arith.constant 0 : index
    %30 = vector.load %arg6[%c0_14, %c0_15, %c0_16] : memref<1x256x128xbf16, #tpu.memory_space<vmem>>, vector<1x256x128xbf16>
    %31 = vector.shape_cast %30 : vector<1x256x128xbf16> to vector<256x128xbf16>
    %32 = vector.shape_cast %29 : vector<256x128xbf16> to vector<1x256x128xbf16>
    tpu.vector_store %arg6[%c0_14, %c0_15, %c0_16], %32 {strides = array<i32>} : memref<1x256x128xbf16, #tpu.memory_space<vmem>>, vector<1x256x128xbf16>,
    return
  }
  func.func @transform_0(%arg0: i32, %arg1: i32) -> (i32, i32, i32) {
    %c0_i32 = arith.constant 0 : i32
    %c0_i32_0 = arith.constant 0 : i32
    %c0_i32_1 = arith.constant 0 : i32
    return %arg0, %c0_i32, %c0_i32_0 : i32, i32, i32
  }
  func.func @transform_1(%arg0: i32, %arg1: i32) -> (i32, i32) {
    %c0_i32 = arith.constant 0 : i32
    %c0_i32_0 = arith.constant 0 : i32
    return %c0_i32, %arg1 : i32, i32
  }
  func.func @transform_2(%arg0: i32, %arg1: i32) -> (i32, i32) {
    %c0_i32 = arith.constant 0 : i32
    %c0_i32_0 = arith.constant 0 : i32
    return %c0_i32, %arg1 : i32, i32
  }
  func.func @transform_3(%arg0: i32, %arg1: i32) -> (i32, i32) {
    %c0_i32 = arith.constant 0 : i32
    %c0_i32_0 = arith.constant 0 : i32
    return %c0_i32, %arg1 : i32, i32
  }
  func.func @transform_4(%arg0: i32, %arg1: i32) -> (i32, i32, i32) {
    %c0_i32 = arith.constant 0 : i32
    %c0_i32_0 = arith.constant 0 : i32
    return %arg0, %c0_i32, %arg1 : i32, i32, i32
  }
}

module attributes {stable_mosaic.version = 11 : i64} {
  func.func @kernel(%arg0: i32, %arg1: i32, %arg2: memref<1x336x128xbf16, #tpu.memory_space<vmem>>, %arg3: memref<1152x128xbf16, #tpu.memory_space<vmem>>, %arg4: memref<336x1xf32, #tpu.memory_space<vmem>>, %arg5: memref<1x128xf32, #tpu.memory_space<vmem>>, %arg6: memref<1x128xf32, #tpu.memory_space<vmem>>, %arg7: memref<1x336x128xbf16, #tpu.memory_space<vmem>>) attributes {dimension_semantics = [#tpu.dimension_semantics<parallel>, #tpu.dimension_semantics<parallel>], iteration_bounds = array<i64: 2, 1>, scalar_prefetch = 0 : i64, scratch_operands = 0 : i64, tpu.core_type = #tpu.core_type<tc>, window_params = [{transform_indices = @transform_0, window_bounds = array<i64: 1, 336, 128>}, {transform_indices = @transform_1, window_bounds = array<i64: 1152, 128>}, {pipeline_mode = #tpu.pipeline_mode<synchronous>, transform_indices = @transform_2, window_bounds = array<i64: 336, 1>}, {transform_indices = @transform_3, window_bounds = array<i64: 1, 128>}, {transform_indices = @transform_4, window_bounds = array<i64: 1, 128>}, {transform_indices = @transform_5, window_bounds = array<i64: 1, 336, 128>}]} {
    %c0 = arith.constant 0 : index
    %c0_0 = arith.constant 0 : index
    %c0_1 = arith.constant 0 : index
    %0 = vector.load %arg2[%c0, %c0_0, %c0_1] : memref<1x336x128xbf16, #tpu.memory_space<vmem>>, vector<1x336x128xbf16>
    %1 = vector.shape_cast %0 : vector<1x336x128xbf16> to vector<336x128xbf16>
    %c0_2 = arith.constant 0 : index
    %c0_3 = arith.constant 0 : index
    %2 = vector.load %arg3[%c0_2, %c0_3] : memref<1152x128xbf16, #tpu.memory_space<vmem>>, vector<128x128xbf16>
    %cst = arith.constant dense<0.000000e+00> : vector<336x128xf32>
    %3 = tpu.matmul %1, %2, %cst {dimension_numbers = #tpu.dot_dimension_numbers<[1], [0], [0], [1], [0, 0, 1, 1], [], []>} : vector<336x128xbf16>, vector<128x128xbf16>, vector<336x128xf32> -> vector<336x128xf32>
    %c128 = arith.constant 128 : index
    %c0_4 = arith.constant 0 : index
    %4 = vector.load %arg3[%c128, %c0_4] : memref<1152x128xbf16, #tpu.memory_space<vmem>>, vector<128x128xbf16>
    %cst_5 = arith.constant dense<0.000000e+00> : vector<336x128xf32>
    %5 = tpu.matmul %1, %4, %cst_5 {dimension_numbers = #tpu.dot_dimension_numbers<[1], [0], [0], [1], [0, 0, 1, 1], [], []>} : vector<336x128xbf16>, vector<128x128xbf16>, vector<336x128xf32> -> vector<336x128xf32>
    %c335_i32 = arith.constant 335 : i32
    %6 = tpu.dynamic_rotate %5 by %c335_i32 dim 0 : vector<336x128xf32>, i32 -> vector<336x128xf32>
    %7 = arith.addf %3, %6 : vector<336x128xf32>
    %c256 = arith.constant 256 : index
    %c0_6 = arith.constant 0 : index
    %8 = vector.load %arg3[%c256, %c0_6] : memref<1152x128xbf16, #tpu.memory_space<vmem>>, vector<128x128xbf16>
    %cst_7 = arith.constant dense<0.000000e+00> : vector<336x128xf32>
    %9 = tpu.matmul %1, %8, %cst_7 {dimension_numbers = #tpu.dot_dimension_numbers<[1], [0], [0], [1], [0, 0, 1, 1], [], []>} : vector<336x128xbf16>, vector<128x128xbf16>, vector<336x128xf32> -> vector<336x128xf32>
    %c334_i32 = arith.constant 334 : i32
    %10 = tpu.dynamic_rotate %9 by %c334_i32 dim 0 : vector<336x128xf32>, i32 -> vector<336x128xf32>
    %11 = arith.addf %7, %10 : vector<336x128xf32>
    %c384 = arith.constant 384 : index
    %c0_8 = arith.constant 0 : index
    %12 = vector.load %arg3[%c384, %c0_8] : memref<1152x128xbf16, #tpu.memory_space<vmem>>, vector<128x128xbf16>
    %cst_9 = arith.constant dense<0.000000e+00> : vector<336x128xf32>
    %13 = tpu.matmul %1, %12, %cst_9 {dimension_numbers = #tpu.dot_dimension_numbers<[1], [0], [0], [1], [0, 0, 1, 1], [], []>} : vector<336x128xbf16>, vector<128x128xbf16>, vector<336x128xf32> -> vector<336x128xf32>
    %c318_i32 = arith.constant 318 : i32
    %14 = tpu.dynamic_rotate %13 by %c318_i32 dim 0 : vector<336x128xf32>, i32 -> vector<336x128xf32>
    %15 = arith.addf %11, %14 : vector<336x128xf32>
    %c512 = arith.constant 512 : index
    %c0_10 = arith.constant 0 : index
    %16 = vector.load %arg3[%c512, %c0_10] : memref<1152x128xbf16, #tpu.memory_space<vmem>>, vector<128x128xbf16>
    %cst_11 = arith.constant dense<0.000000e+00> : vector<336x128xf32>
    %17 = tpu.matmul %1, %16, %cst_11 {dimension_numbers = #tpu.dot_dimension_numbers<[1], [0], [0], [1], [0, 0, 1, 1], [], []>} : vector<336x128xbf16>, vector<128x128xbf16>, vector<336x128xf32> -> vector<336x128xf32>
    %c317_i32 = arith.constant 317 : i32
    %18 = tpu.dynamic_rotate %17 by %c317_i32 dim 0 : vector<336x128xf32>, i32 -> vector<336x128xf32>
    %19 = arith.addf %15, %18 : vector<336x128xf32>
    %c640 = arith.constant 640 : index
    %c0_12 = arith.constant 0 : index
    %20 = vector.load %arg3[%c640, %c0_12] : memref<1152x128xbf16, #tpu.memory_space<vmem>>, vector<128x128xbf16>
    %cst_13 = arith.constant dense<0.000000e+00> : vector<336x128xf32>
    %21 = tpu.matmul %1, %20, %cst_13 {dimension_numbers = #tpu.dot_dimension_numbers<[1], [0], [0], [1], [0, 0, 1, 1], [], []>} : vector<336x128xbf16>, vector<128x128xbf16>, vector<336x128xf32> -> vector<336x128xf32>
    %c316_i32 = arith.constant 316 : i32
    %22 = tpu.dynamic_rotate %21 by %c316_i32 dim 0 : vector<336x128xf32>, i32 -> vector<336x128xf32>
    %23 = arith.addf %19, %22 : vector<336x128xf32>
    %c768 = arith.constant 768 : index
    %c0_14 = arith.constant 0 : index
    %24 = vector.load %arg3[%c768, %c0_14] : memref<1152x128xbf16, #tpu.memory_space<vmem>>, vector<128x128xbf16>
    %cst_15 = arith.constant dense<0.000000e+00> : vector<336x128xf32>
    %25 = tpu.matmul %1, %24, %cst_15 {dimension_numbers = #tpu.dot_dimension_numbers<[1], [0], [0], [1], [0, 0, 1, 1], [], []>} : vector<336x128xbf16>, vector<128x128xbf16>, vector<336x128xf32> -> vector<336x128xf32>
    %c300_i32 = arith.constant 300 : i32
    %26 = tpu.dynamic_rotate %25 by %c300_i32 dim 0 : vector<336x128xf32>, i32 -> vector<336x128xf32>
    %27 = arith.addf %23, %26 : vector<336x128xf32>
    %c896 = arith.constant 896 : index
    %c0_16 = arith.constant 0 : index
    %28 = vector.load %arg3[%c896, %c0_16] : memref<1152x128xbf16, #tpu.memory_space<vmem>>, vector<128x128xbf16>
    %cst_17 = arith.constant dense<0.000000e+00> : vector<336x128xf32>
    %29 = tpu.matmul %1, %28, %cst_17 {dimension_numbers = #tpu.dot_dimension_numbers<[1], [0], [0], [1], [0, 0, 1, 1], [], []>} : vector<336x128xbf16>, vector<128x128xbf16>, vector<336x128xf32> -> vector<336x128xf32>
    %c299_i32 = arith.constant 299 : i32
    %30 = tpu.dynamic_rotate %29 by %c299_i32 dim 0 : vector<336x128xf32>, i32 -> vector<336x128xf32>
    %31 = arith.addf %27, %30 : vector<336x128xf32>
    %c1024 = arith.constant 1024 : index
    %c0_18 = arith.constant 0 : index
    %32 = vector.load %arg3[%c1024, %c0_18] : memref<1152x128xbf16, #tpu.memory_space<vmem>>, vector<128x128xbf16>
    %cst_19 = arith.constant dense<0.000000e+00> : vector<336x128xf32>
    %33 = tpu.matmul %1, %32, %cst_19 {dimension_numbers = #tpu.dot_dimension_numbers<[1], [0], [0], [1], [0, 0, 1, 1], [], []>} : vector<336x128xbf16>, vector<128x128xbf16>, vector<336x128xf32> -> vector<336x128xf32>
    %c298_i32 = arith.constant 298 : i32
    %34 = tpu.dynamic_rotate %33 by %c298_i32 dim 0 : vector<336x128xf32>, i32 -> vector<336x128xf32>
    %35 = arith.addf %31, %34 : vector<336x128xf32>
    %c0_20 = arith.constant 0 : index
    %c0_21 = arith.constant 0 : index
    %36 = vector.load %arg4[%c0_20, %c0_21] : memref<336x1xf32, #tpu.memory_space<vmem>>, vector<336x1xf32>
    %37 = vector.broadcast %36 : vector<336x1xf32> to vector<336x128xf32>
    %38 = arith.mulf %35, %37 : vector<336x128xf32>
    %cst_22 = arith.constant dense<0.000000e+00> : vector<128xf32>
    %39 = vector.multi_reduction <add>, %38, %cst_22 [0] : vector<336x128xf32> to vector<128xf32>
    %40 = vector.shape_cast %39 : vector<128xf32> to vector<1x128xf32>
    %41 = arith.mulf %38, %38 : vector<336x128xf32>
    %cst_23 = arith.constant dense<0.000000e+00> : vector<128xf32>
    %42 = vector.multi_reduction <add>, %41, %cst_23 [0] : vector<336x128xf32> to vector<128xf32>
    %43 = vector.shape_cast %42 : vector<128xf32> to vector<1x128xf32>
    %cst_24 = arith.constant 3.906250e-03 : f32
    %44 = vector.broadcast %cst_24 : f32 to vector<1x128xf32>
    %45 = arith.mulf %40, %44 : vector<1x128xf32>
    %cst_25 = arith.constant 3.906250e-03 : f32
    %46 = vector.broadcast %cst_25 : f32 to vector<1x128xf32>
    %47 = arith.mulf %43, %46 : vector<1x128xf32>
    %48 = arith.mulf %45, %45 : vector<1x128xf32>
    %49 = arith.subf %47, %48 : vector<1x128xf32>
    %cst_26 = arith.constant 9.99999974E-6 : f32
    %50 = vector.broadcast %cst_26 : f32 to vector<1x128xf32>
    %51 = arith.addf %49, %50 : vector<1x128xf32>
    %52 = math.rsqrt %51 : vector<1x128xf32>
    %c0_27 = arith.constant 0 : index
    %c0_28 = arith.constant 0 : index
    %53 = vector.load %arg5[%c0_27, %c0_28] : memref<1x128xf32, #tpu.memory_space<vmem>>, vector<1x128xf32>
    %54 = arith.mulf %52, %53 : vector<1x128xf32>
    %c0_29 = arith.constant 0 : index
    %c0_30 = arith.constant 0 : index
    %55 = vector.load %arg6[%c0_29, %c0_30] : memref<1x128xf32, #tpu.memory_space<vmem>>, vector<1x128xf32>
    %56 = arith.mulf %45, %54 : vector<1x128xf32>
    %57 = arith.subf %55, %56 : vector<1x128xf32>
    %58 = vector.broadcast %54 : vector<1x128xf32> to vector<336x128xf32>
    %59 = arith.mulf %38, %58 : vector<336x128xf32>
    %60 = vector.broadcast %57 : vector<1x128xf32> to vector<336x128xf32>
    %61 = arith.addf %59, %60 : vector<336x128xf32>
    %cst_31 = arith.constant 0.000000e+00 : f32
    %62 = vector.broadcast %cst_31 : f32 to vector<336x128xf32>
    %63 = arith.maximumf %61, %62 : vector<336x128xf32>
    %64 = arith.truncf %63 : vector<336x128xf32> to vector<336x128xbf16>
    %c0_32 = arith.constant 0 : index
    %c0_33 = arith.constant 0 : index
    %c0_34 = arith.constant 0 : index
    %65 = vector.load %arg7[%c0_32, %c0_33, %c0_34] : memref<1x336x128xbf16, #tpu.memory_space<vmem>>, vector<1x336x128xbf16>
    %66 = vector.shape_cast %65 : vector<1x336x128xbf16> to vector<336x128xbf16>
    %67 = vector.shape_cast %64 : vector<336x128xbf16> to vector<1x336x128xbf16>
    tpu.vector_store %arg7[%c0_32, %c0_33, %c0_34], %67 {strides = array<i32>} : memref<1x336x128xbf16, #tpu.memory_space<vmem>>, vector<1x336x128xbf16>,
    return
  }
  func.func @transform_0(%arg0: i32, %arg1: i32) -> (i32, i32, i32) {
    %c0_i32 = arith.constant 0 : i32
    %c0_i32_0 = arith.constant 0 : i32
    %c0_i32_1 = arith.constant 0 : i32
    return %arg0, %c0_i32, %c0_i32_0 : i32, i32, i32
  }
  func.func @transform_1(%arg0: i32, %arg1: i32) -> (i32, i32) {
    %c0_i32 = arith.constant 0 : i32
    %c0_i32_0 = arith.constant 0 : i32
    return %c0_i32, %arg1 : i32, i32
  }
  func.func @transform_2(%arg0: i32, %arg1: i32) -> (i32, i32) {
    %c0_i32 = arith.constant 0 : i32
    %c0_i32_0 = arith.constant 0 : i32
    %c0_i32_1 = arith.constant 0 : i32
    return %c0_i32, %c0_i32_0 : i32, i32
  }
  func.func @transform_3(%arg0: i32, %arg1: i32) -> (i32, i32) {
    %c0_i32 = arith.constant 0 : i32
    %c0_i32_0 = arith.constant 0 : i32
    return %c0_i32, %arg1 : i32, i32
  }
  func.func @transform_4(%arg0: i32, %arg1: i32) -> (i32, i32) {
    %c0_i32 = arith.constant 0 : i32
    %c0_i32_0 = arith.constant 0 : i32
    return %c0_i32, %arg1 : i32, i32
  }
  func.func @transform_5(%arg0: i32, %arg1: i32) -> (i32, i32, i32) {
    %c0_i32 = arith.constant 0 : i32
    %c0_i32_0 = arith.constant 0 : i32
    return %arg0, %c0_i32, %arg1 : i32, i32, i32
  }
}

module attributes {stable_mosaic.version = 11 : i64} {
  func.func @kernel(%arg0: i32, %arg1: i32, %arg2: memref<1x256x128xbf16, #tpu.memory_space<vmem>>, %arg3: memref<128x128xbf16, #tpu.memory_space<vmem>>, %arg4: memref<1x128xf32, #tpu.memory_space<vmem>>, %arg5: memref<1x128xf32, #tpu.memory_space<vmem>>, %arg6: memref<1x256x128xbf16, #tpu.memory_space<vmem>>, %arg7: memref<1x256x128xf32, #tpu.memory_space<vmem>>) attributes {dimension_semantics = [#tpu.dimension_semantics<parallel>, #tpu.dimension_semantics<parallel>], iteration_bounds = array<i64: 2, 1>, scalar_prefetch = 0 : i64, scratch_operands = 0 : i64, tpu.core_type = #tpu.core_type<tc>, window_params = [{transform_indices = @transform_0, window_bounds = array<i64: 1, 256, 128>}, {transform_indices = @transform_1, window_bounds = array<i64: 128, 128>}, {transform_indices = @transform_2, window_bounds = array<i64: 1, 128>}, {transform_indices = @transform_3, window_bounds = array<i64: 1, 128>}, {transform_indices = @transform_4, window_bounds = array<i64: 1, 256, 128>}, {transform_indices = @transform_5, window_bounds = array<i64: 1, 256, 128>}]} {
    %c0 = arith.constant 0 : index
    %c0_0 = arith.constant 0 : index
    %c0_1 = arith.constant 0 : index
    %0 = vector.load %arg2[%c0, %c0_0, %c0_1] : memref<1x256x128xbf16, #tpu.memory_space<vmem>>, vector<1x256x128xbf16>
    %1 = vector.shape_cast %0 : vector<1x256x128xbf16> to vector<256x128xbf16>
    %c0_2 = arith.constant 0 : index
    %c0_3 = arith.constant 0 : index
    %2 = vector.load %arg3[%c0_2, %c0_3] : memref<128x128xbf16, #tpu.memory_space<vmem>>, vector<128x128xbf16>
    %cst = arith.constant dense<0.000000e+00> : vector<256x128xf32>
    %3 = tpu.matmul %1, %2, %cst {dimension_numbers = #tpu.dot_dimension_numbers<[1], [0], [0], [1], [0, 0, 1, 1], [], []>} : vector<256x128xbf16>, vector<128x128xbf16>, vector<256x128xf32> -> vector<256x128xf32>
    %cst_4 = arith.constant dense<0.000000e+00> : vector<128xf32>
    %4 = vector.multi_reduction <add>, %3, %cst_4 [0] : vector<256x128xf32> to vector<128xf32>
    %5 = vector.shape_cast %4 : vector<128xf32> to vector<1x128xf32>
    %6 = arith.mulf %3, %3 : vector<256x128xf32>
    %cst_5 = arith.constant dense<0.000000e+00> : vector<128xf32>
    %7 = vector.multi_reduction <add>, %6, %cst_5 [0] : vector<256x128xf32> to vector<128xf32>
    %8 = vector.shape_cast %7 : vector<128xf32> to vector<1x128xf32>
    %cst_6 = arith.constant 3.906250e-03 : f32
    %9 = vector.broadcast %cst_6 : f32 to vector<1x128xf32>
    %10 = arith.mulf %5, %9 : vector<1x128xf32>
    %cst_7 = arith.constant 3.906250e-03 : f32
    %11 = vector.broadcast %cst_7 : f32 to vector<1x128xf32>
    %12 = arith.mulf %8, %11 : vector<1x128xf32>
    %13 = arith.mulf %10, %10 : vector<1x128xf32>
    %14 = arith.subf %12, %13 : vector<1x128xf32>
    %cst_8 = arith.constant 9.99999974E-6 : f32
    %15 = vector.broadcast %cst_8 : f32 to vector<1x128xf32>
    %16 = arith.addf %14, %15 : vector<1x128xf32>
    %17 = math.rsqrt %16 : vector<1x128xf32>
    %c0_9 = arith.constant 0 : index
    %c0_10 = arith.constant 0 : index
    %18 = vector.load %arg4[%c0_9, %c0_10] : memref<1x128xf32, #tpu.memory_space<vmem>>, vector<1x128xf32>
    %19 = arith.mulf %17, %18 : vector<1x128xf32>
    %c0_11 = arith.constant 0 : index
    %c0_12 = arith.constant 0 : index
    %20 = vector.load %arg5[%c0_11, %c0_12] : memref<1x128xf32, #tpu.memory_space<vmem>>, vector<1x128xf32>
    %21 = arith.mulf %10, %19 : vector<1x128xf32>
    %22 = arith.subf %20, %21 : vector<1x128xf32>
    %23 = vector.broadcast %19 : vector<1x128xf32> to vector<256x128xf32>
    %24 = arith.mulf %3, %23 : vector<256x128xf32>
    %25 = vector.broadcast %22 : vector<1x128xf32> to vector<256x128xf32>
    %26 = arith.addf %24, %25 : vector<256x128xf32>
    %c0_13 = arith.constant 0 : index
    %c0_14 = arith.constant 0 : index
    %c0_15 = arith.constant 0 : index
    %27 = vector.load %arg6[%c0_13, %c0_14, %c0_15] : memref<1x256x128xbf16, #tpu.memory_space<vmem>>, vector<1x256x128xbf16>
    %28 = vector.shape_cast %27 : vector<1x256x128xbf16> to vector<256x128xbf16>
    %29 = arith.extf %28 : vector<256x128xbf16> to vector<256x128xf32>
    %30 = arith.addf %26, %29 : vector<256x128xf32>
    %cst_16 = arith.constant 0.000000e+00 : f32
    %31 = vector.broadcast %cst_16 : f32 to vector<256x128xf32>
    %32 = arith.maximumf %30, %31 : vector<256x128xf32>
    %c0_17 = arith.constant 0 : index
    %c0_18 = arith.constant 0 : index
    %c0_19 = arith.constant 0 : index
    %33 = vector.load %arg7[%c0_17, %c0_18, %c0_19] : memref<1x256x128xf32, #tpu.memory_space<vmem>>, vector<1x256x128xf32>
    %34 = vector.shape_cast %33 : vector<1x256x128xf32> to vector<256x128xf32>
    %35 = vector.shape_cast %32 : vector<256x128xf32> to vector<1x256x128xf32>
    tpu.vector_store %arg7[%c0_17, %c0_18, %c0_19], %35 {strides = array<i32>} : memref<1x256x128xf32, #tpu.memory_space<vmem>>, vector<1x256x128xf32>,
    return
  }
  func.func @transform_0(%arg0: i32, %arg1: i32) -> (i32, i32, i32) {
    %c0_i32 = arith.constant 0 : i32
    %c0_i32_0 = arith.constant 0 : i32
    %c0_i32_1 = arith.constant 0 : i32
    return %arg0, %c0_i32, %c0_i32_0 : i32, i32, i32
  }
  func.func @transform_1(%arg0: i32, %arg1: i32) -> (i32, i32) {
    %c0_i32 = arith.constant 0 : i32
    %c0_i32_0 = arith.constant 0 : i32
    return %c0_i32, %arg1 : i32, i32
  }
  func.func @transform_2(%arg0: i32, %arg1: i32) -> (i32, i32) {
    %c0_i32 = arith.constant 0 : i32
    %c0_i32_0 = arith.constant 0 : i32
    return %c0_i32, %arg1 : i32, i32
  }
  func.func @transform_3(%arg0: i32, %arg1: i32) -> (i32, i32) {
    %c0_i32 = arith.constant 0 : i32
    %c0_i32_0 = arith.constant 0 : i32
    return %c0_i32, %arg1 : i32, i32
  }
  func.func @transform_4(%arg0: i32, %arg1: i32) -> (i32, i32, i32) {
    %c0_i32 = arith.constant 0 : i32
    %c0_i32_0 = arith.constant 0 : i32
    return %arg0, %c0_i32, %arg1 : i32, i32, i32
  }
  func.func @transform_5(%arg0: i32, %arg1: i32) -> (i32, i32, i32) {
    %c0_i32 = arith.constant 0 : i32
    %c0_i32_0 = arith.constant 0 : i32
    return %arg0, %c0_i32, %arg1 : i32, i32, i32
  }
}

</mosaic_0001>

<bundles_post_ra>
// kernel: res_bottleneck_forward.3
= control target key start
LH: loop header
LB: loop body
LE: loop exit
PB: predicated region body
PF: predicated region fallthrough
CT: control target
= control target key end

     0   :  { %s1503_s15 = smov 0   ;;  %s1505_s16 = smov 0   ;;  %s1822_s0 = inlined_call_operand.vmem [shape: bf16[2,256,128], index: 0, kind: input, shape index: {}]   ;;  %s1823_s1 = inlined_call_operand.vmem [shape: bf16[128,128], index: 1, kind: input, shape index: {}]   ;;  %s1824_s2 = inlined_call_operand.vmem [shape: f32[1,128], index: 2, kind: input, shape index: {}]   ;;  %s1825_s3 = inlined_call_operand.vmem [shape: f32[1,128], index: 3, kind: input, shape index: {}]   ;;  %s1826_s4 = inlined_call_operand.vmem [shape: bf16[2,256,128], index: 4, kind: output, shape index: {}]  }
   0x1   :  { %s1507_s17 = smov 0  }
   0x2 LB: > { %s26_s18 = sadd.s32 1, %s1472_s16  ;;  %p1124_p0 = scmp.ge.s32.totalorder %s1476_s17, 1  ;;  %s1476_s17 = sphi %s1507_s17, %s14_s17   ;;  %s1472_s16 = sphi %s1505_s16, %s1828_s16   ;;  %s1468_s15 = sphi %s1503_s15, %s1827_s15  }
   0x3   : > { %p28_p1 = scmp.ge.s32.totalorder %s26_s18, 2  ;;  %p201_p2 = scmp.lt.s32.totalorder %s1476_s17, 3 }
   0x5   : > { %s1830_s18 = smov (%p28_p1, %s26_s18), 0  ;;  %p202_p3 = pnand %p1124_p0, %p201_p2 }
   0x6   : > { %v1428_v0 = vld [vmem:[%s1823_s1] sm:$0xff] (!%p202_p3)   ;;  %p240_p4 = scmp.lt.s32.totalorder (!%p202_p3), %s1468_s15, 1  ;;  %v1429_v1 = vld [vmem:[%s1823_s1 + $0x8] sm:$0xff] (!%p202_p3)   ;;  %v1430_v2 = vld [vmem:[%s1823_s1 + $0x10] sm:$0xff] (!%p202_p3)  }
   0x7   : > { %205 = sbr.rel (%p202_p3) target bundleno = 387 (0x183), region = 36  ;;  %1340 = vmatprep.subr.bf16.mxu0 (!%p202_p3), %v1428_v0  ;;  %1388 = vmatprep.subr.bf16.mxu1 (!%p202_p3), %v1428_v0  ;;  %v1431_v3 = vld [vmem:[%s1823_s1 + $0x18] sm:$0xff] (!%p202_p3)   ;;  %v1432_v5 = vld [vmem:[%s1823_s1 + $0x20] sm:$0xff] (!%p202_p3)   ;;  %v1433_v6 = vld [vmem:[%s1823_s1 + $0x28] sm:$0xff] (!%p202_p3)  }
   0x8   : > { %1341 = vmatpush3.bf16.msra.mxu0 (!%p202_p3), %v1428_v0  ;;  %1396 = vmatpush3.bf16.msra.mxu1 (!%p202_p3), %v1428_v0  ;;  %v1434_v8 = vld [vmem:[%s1823_s1 + $0x30] sm:$0xff] (!%p202_p3)   ;;  %v1435_v9 = vld [vmem:[%s1823_s1 + $0x38] sm:$0xff] (!%p202_p3)  }
   0x9   : > { %1342 = vmatprep.subr.bf16.mxu0 (!%p202_p3), %v1429_v1  ;;  %1389 = vmatprep.subr.bf16.mxu1 (!%p202_p3), %v1429_v1 }
   0xc   : > { %1343 = vmatpush3.bf16.msra.mxu0 (!%p202_p3), %v1429_v1  ;;  %1397 = vmatpush3.bf16.msra.mxu1 (!%p202_p3), %v1429_v1 }
   0xd   : > { %1344 = vmatprep.subr.bf16.mxu0 (!%p202_p3), %v1430_v2  ;;  %1390 = vmatprep.subr.bf16.mxu1 (!%p202_p3), %v1430_v2 }
   0xe   : > { %s1832_s15 = smov (!%p240_p4, %s1468_s15), 1 }
   0xf   : > { %s1187_s25 = sshll.u32 %s1832_s15, 7 }
  0x10   : > { %s1538_s28 = scalar_lea.vmem %s1822_s0, %s1187_s25  ;;  %1345 = vmatpush3.bf16.msra.mxu0 %v1430_v2  ;;  %1398 = vmatpush3.bf16.msra.mxu1 %v1430_v2  ;;  %s1795_s23 = scalar_lea.vmem %s1826_s4, %s1187_s25 }
  0x11   : > { %v1436_v4 = vld [vmem:[%s1538_s28] sm:$0xff]   ;;  %1346 = vmatprep.subr.bf16.mxu0 %v1431_v3  ;;  %1391 = vmatprep.subr.bf16.mxu1 %v1431_v3  ;;  %v1437_v10 = vld [vmem:[%s1538_s28 + $0x8] sm:$0xff]   ;;  %v1438_v12 = vld [vmem:[%s1538_s28 + $0x10] sm:$0xff]  }
  0x12   : > { %1356 = vmatprep.mubr.bf16.mxu0 %v1436_v4  ;;  %v1444_v7 = vld [vmem:[%s1538_s28 + $0x40] sm:$0xff]   ;;  %v1445_v11 = vld [vmem:[%s1538_s28 + $0x48] sm:$0xff]   ;;  %v1446_v13 = vld [vmem:[%s1538_s28 + $0x50] sm:$0xff]  }
  0x13   : > { %1372 = vmatprep.mubr.bf16.mxu1 %v1444_v7  ;;  %v1439_v14 = vld [vmem:[%s1538_s28 + $0x18] sm:$0xff]   ;;  %v1440_v16 = vld [vmem:[%s1538_s28 + $0x20] sm:$0xff]   ;;  %v1441_v18 = vld [vmem:[%s1538_s28 + $0x28] sm:$0xff]  }
  0x14   : > { %1347 = vmatpush3.bf16.msra.mxu0 %v1431_v3  ;;  %1399 = vmatpush3.bf16.msra.mxu1 %v1431_v3  ;;  %v1447_v15 = vld [vmem:[%s1538_s28 + $0x58] sm:$0xff]   ;;  %v1448_v17 = vld [vmem:[%s1538_s28 + $0x60] sm:$0xff]   ;;  %v1449_v19 = vld [vmem:[%s1538_s28 + $0x68] sm:$0xff]  }
  0x15   : > { %1348 = vmatprep.subr.bf16.mxu0 %v1432_v5  ;;  %1392 = vmatprep.subr.bf16.mxu1 %v1432_v5  ;;  %v1442_v20 = vld [vmem:[%s1538_s28 + $0x30] sm:$0xff]   ;;  %v1443_v22 = vld [vmem:[%s1538_s28 + $0x38] sm:$0xff]  }
  0x16   : > { %v1450_v21 = vld [vmem:[%s1538_s28 + $0x70] sm:$0xff]   ;;  %v1451_v23 = vld [vmem:[%s1538_s28 + $0x78] sm:$0xff]  }
  0x18   : > { %1349 = vmatpush3.bf16.msra.mxu0 %v1432_v5  ;;  %1400 = vmatpush3.bf16.msra.mxu1 %v1432_v5 }
  0x19   : > { %1350 = vmatprep.subr.bf16.mxu0 %v1433_v6  ;;  %1393 = vmatprep.subr.bf16.mxu1 %v1433_v6 }
  0x1c   : > { %1351 = vmatpush3.bf16.msra.mxu0 %v1433_v6  ;;  %1401 = vmatpush3.bf16.msra.mxu1 %v1433_v6 }
  0x1d   : > { %1352 = vmatprep.subr.bf16.mxu0 %v1434_v8  ;;  %1394 = vmatprep.subr.bf16.mxu1 %v1434_v8 }
  0x20   : > { %1353 = vmatpush3.bf16.msra.mxu0 %v1434_v8  ;;  %1402 = vmatpush3.bf16.msra.mxu1 %v1434_v8 }
  0x21   : > { %1354 = vmatprep.subr.bf16.mxu0 %v1435_v9  ;;  %1395 = vmatprep.subr.bf16.mxu1 %v1435_v9 }
  0x24   : > { %1355 = vmatpush3.bf16.msra.mxu0 %v1435_v9  ;;  %1403 = vmatpush3.bf16.msra.mxu1 %v1435_v9 }
  0x27   : > { %1357 = vmatmul.mubr.bf16.vlgmr.msra.gmra.mrb[0].mxu0 %v1437_v10  ;;  %1373 = vmatmul.mubr.bf16.vlgmr.msra.gmra.mrb[0].mxu1 %v1445_v11 }
  0x28   : > { %1360 = vmatprep.mubr.bf16.mxu0 %v1438_v12  ;;  %1376 = vmatprep.mubr.bf16.mxu1 %v1446_v13 }
  0x2f   : > { %1361 = vmatmul.mubr.bf16.gmra.mrb[4].mxu0 %v1439_v14  ;;  %1377 = vmatmul.mubr.bf16.gmra.mrb[4].mxu1 %v1447_v15 }
  0x30   : > { %1364 = vmatprep.mubr.bf16.mxu0 %v1440_v16  ;;  %1380 = vmatprep.mubr.bf16.mxu1 %v1448_v17 }
  0x37   : > { %1365 = vmatmul.mubr.bf16.gmra.mrb[8].mxu0 %v1441_v18  ;;  %1381 = vmatmul.mubr.bf16.gmra.mrb[8].mxu1 %v1449_v19 }
  0x38   : > { %1368 = vmatprep.mubr.bf16.mxu0 %v1442_v20  ;;  %1384 = vmatprep.mubr.bf16.mxu1 %v1450_v21 }
  0x3f   : > { %1369 = vmatmul.mubr.bf16.gmra.mrb[12].mxu0 %v1443_v22  ;;  %1385 = vmatmul.mubr.bf16.gmra.mrb[12].mxu1 %v1451_v23 }
  0xfa   : > { %v1571_v24 = vpop.f32.mrb[0].mxu0  ;;  %v1573_v25 = vpop.f32.mrb[0].mxu1 }
  0xfb   : > { %v1575_v26 = vpop.f32.mrb[1].mxu0  ;;  %v1577_v27 = vpop.f32.mrb[1].mxu1  ;;  %v656_v35 = vmul.f32 %v1571_v24, %v1571_v24 }
  0xfc   : > { %v1579_v28 = vpop.f32.mrb[2].mxu0  ;;  %v1581_v29 = vpop.f32.mrb[2].mxu1  ;;  %v654_v32 = vmul.f32 %v1575_v26, %v1575_v26 }
  0xfd   : > { %v1583_v30 = vpop.f32.mrb[3].mxu0  ;;  %v1585_v31 = vpop.f32.mrb[3].mxu1  ;;  %v657_v38 = vmul.f32 %v1579_v28, %v1579_v28 }
  0xfe   : > { %v617_v33 = vadd.f32 %v1583_v30, %v1575_v26  ;;  %v655_v34 = vmul.f32 %v1583_v30, %v1583_v30 }
 0x100   : > { %v618_v36 = vadd.f32 %v1571_v24, %v617_v33  ;;  %v686_v37 = vadd.f32 %v655_v34, %v654_v32 }
 0x102   : > { %v687_v39 = vadd.f32 %v686_v37, %v656_v35  ;;  %v1598_v40 = vpop.f32.mrb[4].mxu0  ;;  %v619_v41 = vadd.f32 %v1579_v28, %v618_v36  ;;  %v1601_v42 = vpop.f32.mrb[4].mxu1 }
 0x103   : > { %v1603_v43 = vpop.f32.mrb[5].mxu0  ;;  %v1605_v44 = vpop.f32.mrb[5].mxu1  ;;  %v660_v55 = vmul.f32 %v1598_v40, %v1598_v40 }
 0x104   : > { %v620_v45 = vadd.f32 %v619_v41, %v1603_v43  ;;  %v658_v46 = vmul.f32 %v1603_v43, %v1603_v43  ;;  %v688_v47 = vadd.f32 %v687_v39, %v657_v38  ;;  %v1610_v48 = vpop.f32.mrb[6].mxu0  ;;  %v1612_v49 = vpop.f32.mrb[6].mxu1 }
 0x105   : > { %v1614_v50 = vpop.f32.mrb[7].mxu0  ;;  %v1616_v51 = vpop.f32.mrb[7].mxu1  ;;  %v661_v58 = vmul.f32 %v1610_v48, %v1610_v48 }
 0x106   : > { %v689_v52 = vadd.f32 %v688_v47, %v658_v46  ;;  %v621_v53 = vadd.f32 %v620_v45, %v1614_v50  ;;  %v659_v54 = vmul.f32 %v1614_v50, %v1614_v50 }
 0x108   : > { %v622_v56 = vadd.f32 %v1598_v40, %v621_v53  ;;  %v690_v57 = vadd.f32 %v689_v52, %v659_v54  ;;  %v670_v53 = vmul.f32 %v1577_v27, %v1577_v27 }
 0x10a   : > { %v691_v59 = vadd.f32 %v690_v57, %v660_v55  ;;  %v1626_v60 = vpop.f32.mrb[8].mxu0  ;;  %v623_v61 = vadd.f32 %v1610_v48, %v622_v56  ;;  %v1629_v62 = vpop.f32.mrb[8].mxu1 }
 0x10b   : > { %v1631_v63 = vpop.f32.mrb[9].mxu0  ;;  %v1633_v0 = vpop.f32.mrb[9].mxu1  ;;  %v664_v11 = vmul.f32 %v1626_v60, %v1626_v60 }
 0x10c   : > { %v624_v1 = vadd.f32 %v623_v61, %v1631_v63  ;;  %v662_v2 = vmul.f32 %v1631_v63, %v1631_v63  ;;  %v692_v3 = vadd.f32 %v691_v59, %v661_v58  ;;  %v1638_v4 = vpop.f32.mrb[10].mxu0  ;;  %v1640_v5 = vpop.f32.mrb[10].mxu1  ;;  %v671_v58 = vmul.f32 %v1585_v31, %v1585_v31 }
 0x10d   : > { %v1642_v6 = vpop.f32.mrb[11].mxu0  ;;  %v1644_v7 = vpop.f32.mrb[11].mxu1  ;;  %v665_v14 = vmul.f32 %v1638_v4, %v1638_v4  ;;  %v672_v59 = vmul.f32 %v1573_v25, %v1573_v25 }
 0x10e   : > { %v693_v8 = vadd.f32 %v692_v3, %v662_v2  ;;  %v625_v9 = vadd.f32 %v624_v1, %v1642_v6  ;;  %v663_v10 = vmul.f32 %v1642_v6, %v1642_v6  ;;  %v673_v2 = vmul.f32 %v1581_v29, %v1581_v29 }
 0x110   : > { %v626_v12 = vadd.f32 %v1626_v60, %v625_v9  ;;  %v694_v13 = vadd.f32 %v693_v8, %v663_v10  ;;  %v674_v9 = vmul.f32 %v1605_v44, %v1605_v44 }
 0x112   : > { %v695_v15 = vadd.f32 %v694_v13, %v664_v11  ;;  %v1654_v16 = vpop.f32.mrb[12].mxu0  ;;  %v627_v17 = vadd.f32 %v1638_v4, %v626_v12  ;;  %v1657_v18 = vpop.f32.mrb[12].mxu1 }
 0x113   : > { %v1659_v19 = vpop.f32.mrb[13].mxu0  ;;  %v1661_v20 = vpop.f32.mrb[13].mxu1  ;;  %v668_v39 = vmul.f32 %v1654_v16, %v1654_v16 }
 0x114   : > { %v628_v21 = vadd.f32 %v627_v17, %v1659_v19  ;;  %v666_v22 = vmul.f32 %v1659_v19, %v1659_v19  ;;  %v696_v23 = vadd.f32 %v695_v15, %v665_v14  ;;  %v1666_v32 = vpop.f32.mrb[14].mxu0  ;;  %v1668_v33 = vpop.f32.mrb[14].mxu1  ;;  %v675_v14 = vmul.f32 %v1616_v51, %v1616_v51 }
 0x115   : > { %v1670_v34 = vpop.f32.mrb[15].mxu0  ;;  %v1672_v35 = vpop.f32.mrb[15].mxu1  ;;  %v669_v46 = vmul.f32 %v1666_v32, %v1666_v32  ;;  %v676_v15 = vmul.f32 %v1601_v42, %v1601_v42 }
 0x116   : > { %v697_v36 = vadd.f32 %v696_v23, %v666_v22  ;;  %v629_v37 = vadd.f32 %v628_v21, %v1670_v34  ;;  %v667_v38 = vmul.f32 %v1670_v34, %v1670_v34  ;;  %v677_v22 = vmul.f32 %v1612_v49, %v1612_v49 }
 0x118   : > { %v630_v41 = vadd.f32 %v1654_v16, %v629_v37  ;;  %v698_v45 = vadd.f32 %v697_v36, %v667_v38  ;;  %v678_v37 = vmul.f32 %v1633_v0, %v1633_v0 }
 0x11a   : > { %v699_v47 = vadd.f32 %v698_v45, %v668_v39  ;;  %v631_v52 = vadd.f32 %v1666_v32, %v630_v41 }
 0x11c   : > { %v632_v54 = vadd.f32 %v631_v52, %v1577_v27  ;;  %v700_v55 = vadd.f32 %v699_v47, %v669_v46  ;;  %v679_v46 = vmul.f32 %v1644_v7, %v1644_v7  ;;  %v680_v47 = vmul.f32 %v1629_v62, %v1629_v62 }
 0x11e   : > { %v701_v56 = vadd.f32 %v700_v55, %v670_v53  ;;  %v633_v57 = vadd.f32 %v632_v54, %v1585_v31  ;;  %v681_v54 = vmul.f32 %v1640_v5, %v1640_v5 }
 0x120   : > { %v634_v61 = vadd.f32 %v1573_v25, %v633_v57  ;;  %v702_v1 = vadd.f32 %v701_v56, %v671_v58  ;;  %v682_v57 = vmul.f32 %v1661_v20, %v1661_v20 }
 0x122   : > { %v703_v3 = vadd.f32 %v702_v1, %v672_v59  ;;  %v635_v8 = vadd.f32 %v1581_v29, %v634_v61 }
 0x124   : > { %v636_v10 = vadd.f32 %v635_v8, %v1605_v44  ;;  %v704_v11 = vadd.f32 %v703_v3, %v673_v2  ;;  %v683_v2 = vmul.f32 %v1672_v35, %v1672_v35  ;;  %v684_v3 = vmul.f32 %v1657_v18, %v1657_v18 }
 0x126   : > { %v705_v12 = vadd.f32 %v704_v11, %v674_v9  ;;  %v637_v13 = vadd.f32 %v636_v10, %v1616_v51  ;;  %v685_v10 = vmul.f32 %v1668_v33, %v1668_v33 }
 0x128   : > { %v638_v17 = vadd.f32 %v1601_v42, %v637_v13  ;;  %v706_v21 = vadd.f32 %v705_v12, %v675_v14 }
 0x12a   : > { %v707_v23 = vadd.f32 %v706_v21, %v676_v15  ;;  %v639_v36 = vadd.f32 %v1612_v49, %v638_v17 }
 0x12c   : > { %v640_v38 = vadd.f32 %v639_v36, %v1633_v0  ;;  %v708_v39 = vadd.f32 %v707_v23, %v677_v22 }
 0x12e   : > { %v709_v41 = vadd.f32 %v708_v39, %v678_v37  ;;  %v641_v45 = vadd.f32 %v640_v38, %v1644_v7 }
 0x130   : > { %v642_v52 = vadd.f32 %v1629_v62, %v641_v45  ;;  %v710_v53 = vadd.f32 %v709_v41, %v679_v46 }
 0x132   : > { %v711_v55 = vadd.f32 %v710_v53, %v680_v47  ;;  %v643_v56 = vadd.f32 %v1640_v5, %v642_v52 }
 0x134   : > { %v644_v58 = vadd.f32 %v643_v56, %v1661_v20  ;;  %v712_v59 = vadd.f32 %v711_v55, %v681_v54  ;;  %v734_v55 = vlaneseq }
 0x136   : > { %v713_v61 = vadd.f32 %v712_v59, %v682_v57  ;;  %v645_v1 = vadd.f32 %v644_v58, %v1672_v35  ;;  %v735_v56 = vshrl.u32 %v734_v55, 7  ;;  %v729_v57 = vld [vmem:[%s1824_s2] sm:$0x1] }
 0x138   : > { %v646_v8 = vadd.f32 %v1657_v18, %v645_v1  ;;  %v714_v9 = vadd.f32 %v713_v61, %v683_v2  ;;  %v736_v58 = vsub.s32 0, %v735_v56  ;;  %v731_v1 = vld [vmem:[%s1825_s3] sm:$0x1] }
 0x13a   : > { %v647_v11 = vadd.f32 %v1668_v33, %v646_v8  ;;  %v715_v12 = vadd.f32 %v714_v9, %v684_v3 }
 0x13c   : > { %v648_v13 = vrot.slane %v647_v11, 4  ;;  %v716_v14 = vadd.f32 %v715_v12, %v685_v10 }
 0x13e   : > { %v649_v15 = vadd.f32 %v648_v13, %v647_v11  ;;  %v717_v17 = vrot.slane %v716_v14, 4 }
 0x140   : > { %v650_v21 = vrot.slane %v649_v15, 2  ;;  %v718_v22 = vadd.f32 %v717_v17, %v716_v14 }
 0x142   : > { %v651_v23 = vadd.f32 %v650_v21, %v649_v15  ;;  %v719_v36 = vrot.slane %v718_v22, 2 }
 0x144   : > { %v652_v37 = vrot.slane %v651_v23, 1  ;;  %v720_v38 = vadd.f32 %v719_v36, %v718_v22 }
 0x146   : > { %v653_v39 = vadd.f32 %v652_v37, %v651_v23  ;;  %v721_v41 = vrot.slane %v720_v38, 1 }
 0x148   : > { %v722_v45 = vadd.f32 %v721_v41, %v720_v38  ;;  %v723_v46 = vmul.f32 0.00390625, %v653_v39 }
 0x14a   : > { %v724_v47 = vmul.f32 0.00390625, %v722_v45  ;;  %v725_v52 = vmul.f32 %v723_v46, %v723_v46 }
 0x14c   : > { %v726_v53 = vsub.f32 %v724_v47, %v725_v52 }
 0x14e   : > { %v727_v54 = vadd.f32 1e-05, %v726_v53 }
 0x150   : > { %1452 = vrsqrt.f32 %v727_v54 }
 0x15a   : > { %v1453_v59 = vpop.eup %1452 }
 0x15b   : > { %v730_v61 = vmul.f32 %v1453_v59, %v729_v57 }
 0x15d   : > { %v732_v2 = vmul.f32 %v730_v61, %v723_v46  ;;  %v737_v3 = vrot.slane %v730_v61, %v736_v58 }
 0x15f   : > { %v733_v8 = vsub.f32 %v731_v1, %v732_v2  ;;  %v738_v9 = vmul.f32 %v737_v3, %v1575_v26  ;;  %v739_v10 = vmul.f32 %v737_v3, %v1583_v30  ;;  %v740_v11 = vmul.f32 %v1571_v24, %v737_v3 }
 0x160   : > { %v741_v12 = vmul.f32 %v1579_v28, %v737_v3  ;;  %v742_v13 = vmul.f32 %v737_v3, %v1603_v43  ;;  %v743_v14 = vmul.f32 %v737_v3, %v1614_v50  ;;  %v744_v15 = vmul.f32 %v1598_v40, %v737_v3 }
 0x161   : > { %v745_v17 = vmul.f32 %v1610_v48, %v737_v3  ;;  %v746_v21 = vmul.f32 %v737_v3, %v1631_v63  ;;  %v747_v22 = vmul.f32 %v737_v3, %v1642_v6  ;;  %v748_v26 = vmul.f32 %v1626_v60, %v737_v3 }
 0x162   : > { %v749_v30 = vmul.f32 %v1638_v4, %v737_v3  ;;  %v750_v24 = vmul.f32 %v737_v3, %v1659_v19  ;;  %v751_v28 = vmul.f32 %v737_v3, %v1670_v34  ;;  %v752_v43 = vmul.f32 %v1654_v16, %v737_v3 }
 0x163   : > { %v753_v50 = vmul.f32 %v1666_v32, %v737_v3  ;;  %v754_v40 = vmul.f32 %v737_v3, %v1577_v27  ;;  %v755_v48 = vmul.f32 %v737_v3, %v1585_v31  ;;  %v756_v63 = vmul.f32 %v1573_v25, %v737_v3 }
 0x164   : > { %v757_v6 = vmul.f32 %v1581_v29, %v737_v3  ;;  %v758_v60 = vmul.f32 %v737_v3, %v1605_v44  ;;  %v759_v4 = vmul.f32 %v737_v3, %v1616_v51  ;;  %v760_v19 = vmul.f32 %v1601_v42, %v737_v3 }
 0x165   : > { %v761_v34 = vmul.f32 %v1612_v49, %v737_v3  ;;  %v762_v16 = vmul.f32 %v737_v3, %v1633_v0  ;;  %v763_v32 = vmul.f32 %v737_v3, %v1644_v7  ;;  %v764_v27 = vmul.f32 %v1629_v62, %v737_v3 }
 0x166   : > { %v765_v31 = vmul.f32 %v1640_v5, %v737_v3  ;;  %v766_v25 = vmul.f32 %v737_v3, %v1661_v20  ;;  %v767_v29 = vmul.f32 %v737_v3, %v1672_v35  ;;  %v768_v44 = vmul.f32 %v1657_v18, %v737_v3 }
 0x167   : > { %v769_v51 = vmul.f32 %v1668_v33, %v737_v3  ;;  %v774_v23 = vrot.slane %v733_v8, %v736_v58 }
 0x169   : > { %v1769_v42 = vadd.f32 %v774_v23, %v738_v9  ;;  %v1771_v49 = vadd.f32 %v774_v23, %v739_v10  ;;  %v1773_v0 = vadd.f32 %v774_v23, %v740_v11  ;;  %v1775_v7 = vadd.f32 %v774_v23, %v741_v12 }
 0x16a   : > { %v1777_v62 = vadd.f32 %v774_v23, %v742_v13  ;;  %v1779_v5 = vadd.f32 %v774_v23, %v743_v14  ;;  %v1781_v20 = vadd.f32 %v774_v23, %v744_v15  ;;  %v783_v35 = vadd.f32 %v774_v23, %v745_v17 }
 0x16b   : > { %v784_v36 = vadd.f32 %v774_v23, %v746_v21  ;;  %v785_v18 = vadd.f32 %v774_v23, %v747_v22  ;;  %v786_v37 = vadd.f32 %v774_v23, %v748_v26  ;;  %v787_v33 = vadd.f32 %v774_v23, %v749_v30 }
 0x16c   : > { %v788_v38 = vadd.f32 %v774_v23, %v750_v24  ;;  %v789_v39 = vadd.f32 %v774_v23, %v751_v28  ;;  %v790_v41 = vadd.f32 %v774_v23, %v752_v43  ;;  %v791_v45 = vadd.f32 %v774_v23, %v753_v50 }
 0x16d   : > { %v792_v46 = vadd.f32 %v774_v23, %v754_v40  ;;  %v793_v47 = vadd.f32 %v774_v23, %v755_v48  ;;  %v794_v52 = vadd.f32 %v774_v23, %v756_v63  ;;  %v795_v53 = vadd.f32 %v774_v23, %v757_v6 }
 0x16e   : > { %v796_v54 = vadd.f32 %v774_v23, %v758_v60  ;;  %v797_v55 = vadd.f32 %v774_v23, %v759_v4  ;;  %v798_v56 = vadd.f32 %v774_v23, %v760_v19  ;;  %v799_v57 = vadd.f32 %v774_v23, %v761_v34 }
 0x16f   : > { %v800_v58 = vadd.f32 %v774_v23, %v762_v16  ;;  %v801_v59 = vadd.f32 %v774_v23, %v763_v32  ;;  %v802_v61 = vadd.f32 %v774_v23, %v764_v27  ;;  %v803_v1 = vadd.f32 %v774_v23, %v765_v31 }
 0x170   : > { %v804_v2 = vadd.f32 %v774_v23, %v766_v25  ;;  %v805_v3 = vadd.f32 %v774_v23, %v767_v29  ;;  %v806_v8 = vadd.f32 %v774_v23, %v768_v44  ;;  %v807_v9 = vadd.f32 %v774_v23, %v769_v51 }
 0x171   : > { %v808_v10 = vmax.f32 %v1769_v42, 0.0  ;;  %v809_v11 = vmax.f32 %v1771_v49, 0.0  ;;  %v810_v12 = vmax.f32 %v1773_v0, 0.0  ;;  %v811_v13 = vmax.f32 %v1775_v7, 0.0 }
 0x172   : > { %v812_v14 = vmax.f32 %v1777_v62, 0.0  ;;  %v813_v15 = vmax.f32 %v1779_v5, 0.0  ;;  %v814_v17 = vmax.f32 %v1781_v20, 0.0  ;;  %v815_v21 = vmax.f32 %v783_v35, 0.0 }
 0x173   : > { %v816_v22 = vmax.f32 %v784_v36, 0.0  ;;  %v817_v26 = vmax.f32 %v785_v18, 0.0  ;;  %v818_v30 = vmax.f32 %v786_v37, 0.0  ;;  %v819_v24 = vmax.f32 %v787_v33, 0.0 }
 0x174   : > { %v820_v28 = vmax.f32 %v788_v38, 0.0  ;;  %v821_v43 = vmax.f32 %v789_v39, 0.0  ;;  %v822_v50 = vmax.f32 %v790_v41, 0.0  ;;  %v823_v40 = vmax.f32 %v791_v45, 0.0 }
 0x175   : > { %v824_v48 = vmax.f32 %v792_v46, 0.0  ;;  %v825_v63 = vmax.f32 %v793_v47, 0.0  ;;  %v826_v6 = vmax.f32 %v794_v52, 0.0  ;;  %v827_v60 = vmax.f32 %v795_v53, 0.0 }
 0x176   : > { %v828_v4 = vmax.f32 %v796_v54, 0.0  ;;  %v829_v19 = vmax.f32 %v797_v55, 0.0  ;;  %v830_v34 = vmax.f32 %v798_v56, 0.0  ;;  %v831_v16 = vmax.f32 %v799_v57, 0.0 }
 0x177   : > { %v832_v32 = vmax.f32 %v800_v58, 0.0  ;;  %v833_v27 = vmax.f32 %v801_v59, 0.0  ;;  %v834_v31 = vmax.f32 %v802_v61, 0.0  ;;  %v835_v25 = vmax.f32 %v803_v1, 0.0 }
 0x178   : > { %v836_v29 = vmax.f32 %v804_v2, 0.0  ;;  %v837_v44 = vmax.f32 %v805_v3, 0.0  ;;  %v838_v51 = vmax.f32 %v806_v8, 0.0  ;;  %v839_v23 = vmax.f32 %v807_v9, 0.0 }
 0x179   : > { %v1224_v42 = vpack.c.bf16 %v809_v11, %v808_v10  ;;  %v1229_v49 = vpack.c.bf16 %v811_v13, %v810_v12  ;;  %v1234_v0 = vpack.c.bf16 %v813_v15, %v812_v14  ;;  %v1239_v7 = vpack.c.bf16 %v815_v21, %v814_v17 }
 0x17a   : > { %v1244_v62 = vpack.c.bf16 %v817_v26, %v816_v22  ;;  %v1249_v5 = vpack.c.bf16 %v819_v24, %v818_v30  ;;  %v1254_v20 = vpack.c.bf16 %v821_v43, %v820_v28  ;;  %v1259_v35 = vpack.c.bf16 %v823_v40, %v822_v50 }
 0x17b   : > { %1225 = vst [vmem:[%s1795_s23] sm:$0xff] %v1224_v42   ;;  %1301 = vst [vmem:[%s1795_s23 + $0x8] sm:$0xff] %v1229_v49   ;;  %v1264_v36 = vpack.c.bf16 %v825_v63, %v824_v48  ;;  %v1269_v18 = vpack.c.bf16 %v827_v60, %v826_v6  ;;  %v1274_v37 = vpack.c.bf16 %v829_v19, %v828_v4 }
 0x17c   : > { %1302 = vst [vmem:[%s1795_s23 + $0x10] sm:$0xff] %v1234_v0   ;;  %1303 = vst [vmem:[%s1795_s23 + $0x18] sm:$0xff] %v1239_v7   ;;  %v1279_v33 = vpack.c.bf16 %v831_v16, %v830_v34  ;;  %v1284_v38 = vpack.c.bf16 %v833_v27, %v832_v32  ;;  %v1289_v39 = vpack.c.bf16 %v835_v25, %v834_v31 }
 0x17d   : > { %1304 = vst [vmem:[%s1795_s23 + $0x20] sm:$0xff] %v1244_v62   ;;  %1305 = vst [vmem:[%s1795_s23 + $0x28] sm:$0xff] %v1249_v5   ;;  %v1294_v41 = vpack.c.bf16 %v837_v44, %v836_v29  ;;  %v1299_v45 = vpack.c.bf16 %v839_v23, %v838_v51 }
 0x17e   : > { %1306 = vst [vmem:[%s1795_s23 + $0x30] sm:$0xff] %v1254_v20   ;;  %1307 = vst [vmem:[%s1795_s23 + $0x38] sm:$0xff] %v1259_v35  }
 0x17f   : > { %1308 = vst [vmem:[%s1795_s23 + $0x40] sm:$0xff] %v1264_v36   ;;  %1309 = vst [vmem:[%s1795_s23 + $0x48] sm:$0xff] %v1269_v18  }
 0x180   : > { %1310 = vst [vmem:[%s1795_s23 + $0x50] sm:$0xff] %v1274_v37   ;;  %1311 = vst [vmem:[%s1795_s23 + $0x58] sm:$0xff] %v1279_v33  }
 0x181   : > { %1312 = vst [vmem:[%s1795_s23 + $0x60] sm:$0xff] %v1284_v38   ;;  %1313 = vst [vmem:[%s1795_s23 + $0x68] sm:$0xff] %v1289_v39  }
 0x182   : > { %1314 = vst [vmem:[%s1795_s23 + $0x70] sm:$0xff] %v1294_v41   ;;  %1315 = vst [vmem:[%s1795_s23 + $0x78] sm:$0xff] %v1299_v45  }
 0x183 PF: > { %s14_s17 = sadd.s32 1, %s1476_s17   ;;  %s1827_s15 = smov %s1472_s16 }
 0x184   : > { %p11_p5 = scmp.ge.s32.totalorder %s14_s17, 4   ;;  %s1828_s16 = smov %s1830_s18 }
 0x186   :  { %13 = sbr.rel (!%p11_p5) target bundleno = 2 (0x2), region = 75 }

// kernel: res_bottleneck_forward.5
= control target key start
LH: loop header
LB: loop body
LE: loop exit
PB: predicated region body
PF: predicated region fallthrough
CT: control target
= control target key end

     0   :  { %s1475_s18 = smov 0   ;;  %s1477_s19 = smov 0   ;;  %s1982_s0 = inlined_call_operand.vmem [shape: bf16[2,256,128], index: 0, kind: input, shape index: {}]   ;;  %s1983_s1 = inlined_call_operand.vmem [shape: bf16[128,128], index: 1, kind: input, shape index: {}]   ;;  %s1984_s2 = inlined_call_operand.vmem [shape: f32[1,128], index: 2, kind: input, shape index: {}]   ;;  %s1985_s3 = inlined_call_operand.vmem [shape: f32[1,128], index: 3, kind: input, shape index: {}]   ;;  %s1986_s4 = inlined_call_operand.vmem [shape: bf16[2,256,128], index: 4, kind: input, shape index: {}]   ;;  %s1987_s5 = inlined_call_operand.vmem [shape: f32[2,256,128], index: 5, kind: output, shape index: {}]  }
   0x1   :  { %s1479_s20 = smov 0  }
   0x2 LB: > { %s27_s21 = sadd.s32 1, %s1439_s19  ;;  %p1168_p0 = scmp.ge.s32.totalorder %s1443_s20, 1  ;;  %s1443_s20 = sphi %s1479_s20, %s15_s20   ;;  %s1439_s19 = sphi %s1477_s19, %s2041_s19   ;;  %s1435_s18 = sphi %s1475_s18, %s2040_s18  }
   0x3   : > { %p29_p1 = scmp.ge.s32.totalorder %s27_s21, 2  ;;  %p241_p2 = scmp.lt.s32.totalorder %s1443_s20, 3 }
   0x5   : > { %s2043_s21 = smov (%p29_p1, %s27_s21), 0  ;;  %p242_p3 = pnand %p1168_p0, %p241_p2 }
   0x7   : > { %245 = sbr.rel (%p242_p3) target bundleno = 409 (0x199), region = 40 }
   0xe   : > { %v1395_v0 = vld [vmem:[%s1983_s1] sm:$0xff]   ;;  %p290_p4 = scmp.lt.s32.totalorder %s1435_s18, 1  ;;  %v1396_v1 = vld [vmem:[%s1983_s1 + $0x8] sm:$0xff]   ;;  %v1397_v2 = vld [vmem:[%s1983_s1 + $0x10] sm:$0xff]  }
   0xf   : > { %1307 = vmatprep.subr.bf16.mxu0 %v1395_v0  ;;  %1355 = vmatprep.subr.bf16.mxu1 %v1395_v0  ;;  %v1398_v3 = vld [vmem:[%s1983_s1 + $0x18] sm:$0xff]   ;;  %v1399_v5 = vld [vmem:[%s1983_s1 + $0x20] sm:$0xff]   ;;  %v1400_v6 = vld [vmem:[%s1983_s1 + $0x28] sm:$0xff]  }
  0x10   : > { %s2045_s18 = smov (!%p290_p4, %s1435_s18), 1  ;;  %1308 = vmatpush3.bf16.msra.mxu0 %v1395_v0  ;;  %1363 = vmatpush3.bf16.msra.mxu1 %v1395_v0  ;;  %v1401_v8 = vld [vmem:[%s1983_s1 + $0x30] sm:$0xff]   ;;  %v1402_v9 = vld [vmem:[%s1983_s1 + $0x38] sm:$0xff]  }
  0x11   : > { %1309 = vmatprep.subr.bf16.mxu0 %v1396_v1  ;;  %s1201_s28 = sshll.u32 %s2045_s18, 7  ;;  %1356 = vmatprep.subr.bf16.mxu1 %v1396_v1 }
  0x12   : > { %s1510_s6 = scalar_lea.vmem %s1982_s0, %s1201_s28  ;;  %s1708_s23 = scalar_lea.vmem %s1986_s4, %s1201_s28 }
  0x13   : > { %v1403_v4 = vld [vmem:[%s1510_s6] sm:$0xff]   ;;  %v1404_v10 = vld [vmem:[%s1510_s6 + $0x8] sm:$0xff]   ;;  %v1405_v12 = vld [vmem:[%s1510_s6 + $0x10] sm:$0xff]   ;;  %s1203_s28 = sshll.u32 %s2045_s18, 8 }
  0x14   : > { %1310 = vmatpush3.bf16.msra.mxu0 %v1396_v1  ;;  %1364 = vmatpush3.bf16.msra.mxu1 %v1396_v1  ;;  %v1411_v7 = vld [vmem:[%s1510_s6 + $0x40] sm:$0xff]   ;;  %v1412_v11 = vld [vmem:[%s1510_s6 + $0x48] sm:$0xff]   ;;  %v1413_v13 = vld [vmem:[%s1510_s6 + $0x50] sm:$0xff]   ;;  %s1911_s30 = scalar_lea.vmem %s1987_s5, %s1203_s28 }
  0x15   : > { %1311 = vmatprep.subr.bf16.mxu0 %v1397_v2  ;;  %1357 = vmatprep.subr.bf16.mxu1 %v1397_v2  ;;  %v1406_v14 = vld [vmem:[%s1510_s6 + $0x18] sm:$0xff]   ;;  %v1407_v16 = vld [vmem:[%s1510_s6 + $0x20] sm:$0xff]   ;;  %v1408_v18 = vld [vmem:[%s1510_s6 + $0x28] sm:$0xff]  }
  0x16   : > { %1323 = vmatprep.mubr.bf16.mxu0 %v1403_v4  ;;  %1339 = vmatprep.mubr.bf16.mxu1 %v1411_v7  ;;  %v1414_v15 = vld [vmem:[%s1510_s6 + $0x58] sm:$0xff]   ;;  %v1415_v17 = vld [vmem:[%s1510_s6 + $0x60] sm:$0xff]   ;;  %v1416_v19 = vld [vmem:[%s1510_s6 + $0x68] sm:$0xff]  }
  0x17   : > { %v1409_v20 = vld [vmem:[%s1510_s6 + $0x30] sm:$0xff]   ;;  %v1410_v22 = vld [vmem:[%s1510_s6 + $0x38] sm:$0xff]  }
  0x18   : > { %1312 = vmatpush3.bf16.msra.mxu0 %v1397_v2  ;;  %1365 = vmatpush3.bf16.msra.mxu1 %v1397_v2  ;;  %v1417_v21 = vld [vmem:[%s1510_s6 + $0x70] sm:$0xff]   ;;  %v1418_v23 = vld [vmem:[%s1510_s6 + $0x78] sm:$0xff]  }
  0x19   : > { %1313 = vmatprep.subr.bf16.mxu0 %v1398_v3  ;;  %1358 = vmatprep.subr.bf16.mxu1 %v1398_v3 }
  0x1c   : > { %1314 = vmatpush3.bf16.msra.mxu0 %v1398_v3  ;;  %1366 = vmatpush3.bf16.msra.mxu1 %v1398_v3 }
  0x1d   : > { %1315 = vmatprep.subr.bf16.mxu0 %v1399_v5  ;;  %1359 = vmatprep.subr.bf16.mxu1 %v1399_v5 }
  0x20   : > { %1316 = vmatpush3.bf16.msra.mxu0 %v1399_v5  ;;  %1367 = vmatpush3.bf16.msra.mxu1 %v1399_v5 }
  0x21   : > { %1317 = vmatprep.subr.bf16.mxu0 %v1400_v6  ;;  %1360 = vmatprep.subr.bf16.mxu1 %v1400_v6 }
  0x24   : > { %1318 = vmatpush3.bf16.msra.mxu0 %v1400_v6  ;;  %1368 = vmatpush3.bf16.msra.mxu1 %v1400_v6 }
  0x25   : > { %1319 = vmatprep.subr.bf16.mxu0 %v1401_v8  ;;  %1361 = vmatprep.subr.bf16.mxu1 %v1401_v8 }
  0x28   : > { %1320 = vmatpush3.bf16.msra.mxu0 %v1401_v8  ;;  %1369 = vmatpush3.bf16.msra.mxu1 %v1401_v8 }
  0x29   : > { %1321 = vmatprep.subr.bf16.mxu0 %v1402_v9  ;;  %1362 = vmatprep.subr.bf16.mxu1 %v1402_v9 }
  0x2c   : > { %1322 = vmatpush3.bf16.msra.mxu0 %v1402_v9  ;;  %1370 = vmatpush3.bf16.msra.mxu1 %v1402_v9 }
  0x2f   : > { %1324 = vmatmul.mubr.bf16.vlgmr.msra.gmra.mrb[0].mxu0 %v1404_v10  ;;  %1340 = vmatmul.mubr.bf16.vlgmr.msra.gmra.mrb[0].mxu1 %v1412_v11 }
  0x30   : > { %1327 = vmatprep.mubr.bf16.mxu0 %v1405_v12  ;;  %1343 = vmatprep.mubr.bf16.mxu1 %v1413_v13 }
  0x37   : > { %1328 = vmatmul.mubr.bf16.gmra.mrb[4].mxu0 %v1406_v14  ;;  %1344 = vmatmul.mubr.bf16.gmra.mrb[4].mxu1 %v1414_v15 }
  0x38   : > { %1331 = vmatprep.mubr.bf16.mxu0 %v1407_v16  ;;  %1347 = vmatprep.mubr.bf16.mxu1 %v1415_v17 }
  0x3f   : > { %1332 = vmatmul.mubr.bf16.gmra.mrb[8].mxu0 %v1408_v18  ;;  %1348 = vmatmul.mubr.bf16.gmra.mrb[8].mxu1 %v1416_v19 }
  0x40   : > { %1335 = vmatprep.mubr.bf16.mxu0 %v1409_v20  ;;  %1351 = vmatprep.mubr.bf16.mxu1 %v1417_v21 }
  0x47   : > { %1336 = vmatmul.mubr.bf16.gmra.mrb[12].mxu0 %v1410_v22  ;;  %1352 = vmatmul.mubr.bf16.gmra.mrb[12].mxu1 %v1418_v23 }
 0x102   : > { %v1543_v24 = vpop.f32.mrb[0].mxu0  ;;  %v1545_v25 = vpop.f32.mrb[0].mxu1 }
 0x103   : > { %v1547_v26 = vpop.f32.mrb[1].mxu0  ;;  %v1549_v27 = vpop.f32.mrb[1].mxu1  ;;  %v714_v35 = vmul.f32 %v1543_v24, %v1543_v24 }
 0x104   : > { %v1551_v28 = vpop.f32.mrb[2].mxu0  ;;  %v1553_v29 = vpop.f32.mrb[2].mxu1  ;;  %v712_v32 = vmul.f32 %v1547_v26, %v1547_v26 }
 0x105   : > { %v1555_v30 = vpop.f32.mrb[3].mxu0  ;;  %v1557_v31 = vpop.f32.mrb[3].mxu1  ;;  %v715_v38 = vmul.f32 %v1551_v28, %v1551_v28 }
 0x106   : > { %v675_v33 = vadd.f32 %v1555_v30, %v1547_v26  ;;  %v713_v34 = vmul.f32 %v1555_v30, %v1555_v30 }
 0x108   : > { %v676_v36 = vadd.f32 %v1543_v24, %v675_v33  ;;  %v744_v37 = vadd.f32 %v713_v34, %v712_v32 }
 0x10a   : > { %v745_v39 = vadd.f32 %v744_v37, %v714_v35  ;;  %v1570_v40 = vpop.f32.mrb[4].mxu0  ;;  %v677_v41 = vadd.f32 %v1551_v28, %v676_v36  ;;  %v1573_v42 = vpop.f32.mrb[4].mxu1 }
 0x10b   : > { %v1575_v43 = vpop.f32.mrb[5].mxu0  ;;  %v1577_v44 = vpop.f32.mrb[5].mxu1  ;;  %v718_v55 = vmul.f32 %v1570_v40, %v1570_v40 }
 0x10c   : > { %v678_v45 = vadd.f32 %v677_v41, %v1575_v43  ;;  %v716_v46 = vmul.f32 %v1575_v43, %v1575_v43  ;;  %v746_v47 = vadd.f32 %v745_v39, %v715_v38  ;;  %v1582_v48 = vpop.f32.mrb[6].mxu0  ;;  %v1584_v49 = vpop.f32.mrb[6].mxu1 }
 0x10d   : > { %v1586_v50 = vpop.f32.mrb[7].mxu0  ;;  %v1588_v51 = vpop.f32.mrb[7].mxu1  ;;  %v719_v58 = vmul.f32 %v1582_v48, %v1582_v48 }
 0x10e   : > { %v747_v52 = vadd.f32 %v746_v47, %v716_v46  ;;  %v679_v53 = vadd.f32 %v678_v45, %v1586_v50  ;;  %v717_v54 = vmul.f32 %v1586_v50, %v1586_v50 }
 0x110   : > { %v680_v56 = vadd.f32 %v1570_v40, %v679_v53  ;;  %v748_v57 = vadd.f32 %v747_v52, %v717_v54  ;;  %v728_v53 = vmul.f32 %v1549_v27, %v1549_v27 }
 0x112   : > { %v749_v59 = vadd.f32 %v748_v57, %v718_v55  ;;  %v1598_v60 = vpop.f32.mrb[8].mxu0  ;;  %v681_v61 = vadd.f32 %v1582_v48, %v680_v56  ;;  %v1601_v62 = vpop.f32.mrb[8].mxu1 }
 0x113   : > { %v1603_v63 = vpop.f32.mrb[9].mxu0  ;;  %v1605_v0 = vpop.f32.mrb[9].mxu1  ;;  %v722_v11 = vmul.f32 %v1598_v60, %v1598_v60 }
 0x114   : > { %v682_v1 = vadd.f32 %v681_v61, %v1603_v63  ;;  %v720_v2 = vmul.f32 %v1603_v63, %v1603_v63  ;;  %v750_v3 = vadd.f32 %v749_v59, %v719_v58  ;;  %v1610_v4 = vpop.f32.mrb[10].mxu0  ;;  %v1612_v5 = vpop.f32.mrb[10].mxu1  ;;  %v729_v58 = vmul.f32 %v1557_v31, %v1557_v31 }
 0x115   : > { %v1614_v6 = vpop.f32.mrb[11].mxu0  ;;  %v1616_v7 = vpop.f32.mrb[11].mxu1  ;;  %v723_v14 = vmul.f32 %v1610_v4, %v1610_v4  ;;  %v730_v59 = vmul.f32 %v1545_v25, %v1545_v25 }
 0x116   : > { %v751_v8 = vadd.f32 %v750_v3, %v720_v2  ;;  %v683_v9 = vadd.f32 %v682_v1, %v1614_v6  ;;  %v721_v10 = vmul.f32 %v1614_v6, %v1614_v6  ;;  %v731_v2 = vmul.f32 %v1553_v29, %v1553_v29 }
 0x118   : > { %v684_v12 = vadd.f32 %v1598_v60, %v683_v9  ;;  %v752_v13 = vadd.f32 %v751_v8, %v721_v10  ;;  %v732_v9 = vmul.f32 %v1577_v44, %v1577_v44 }
 0x11a   : > { %v753_v15 = vadd.f32 %v752_v13, %v722_v11  ;;  %v1626_v16 = vpop.f32.mrb[12].mxu0  ;;  %v685_v17 = vadd.f32 %v1610_v4, %v684_v12  ;;  %v1629_v18 = vpop.f32.mrb[12].mxu1 }
 0x11b   : > { %v1631_v19 = vpop.f32.mrb[13].mxu0  ;;  %v1633_v20 = vpop.f32.mrb[13].mxu1  ;;  %v726_v39 = vmul.f32 %v1626_v16, %v1626_v16 }
 0x11c   : > { %v686_v21 = vadd.f32 %v685_v17, %v1631_v19  ;;  %v724_v22 = vmul.f32 %v1631_v19, %v1631_v19  ;;  %v754_v23 = vadd.f32 %v753_v15, %v723_v14  ;;  %v1638_v32 = vpop.f32.mrb[14].mxu0  ;;  %v1640_v33 = vpop.f32.mrb[14].mxu1  ;;  %v733_v14 = vmul.f32 %v1588_v51, %v1588_v51 }
 0x11d   : > { %v1642_v34 = vpop.f32.mrb[15].mxu0  ;;  %v1644_v35 = vpop.f32.mrb[15].mxu1  ;;  %v727_v46 = vmul.f32 %v1638_v32, %v1638_v32  ;;  %v734_v15 = vmul.f32 %v1573_v42, %v1573_v42 }
 0x11e   : > { %v755_v36 = vadd.f32 %v754_v23, %v724_v22  ;;  %v687_v37 = vadd.f32 %v686_v21, %v1642_v34  ;;  %v725_v38 = vmul.f32 %v1642_v34, %v1642_v34  ;;  %v735_v22 = vmul.f32 %v1584_v49, %v1584_v49 }
 0x120   : > { %v688_v41 = vadd.f32 %v1626_v16, %v687_v37  ;;  %v756_v45 = vadd.f32 %v755_v36, %v725_v38  ;;  %v736_v37 = vmul.f32 %v1605_v0, %v1605_v0 }
 0x122   : > { %v757_v47 = vadd.f32 %v756_v45, %v726_v39  ;;  %v689_v52 = vadd.f32 %v1638_v32, %v688_v41 }
 0x124   : > { %v690_v54 = vadd.f32 %v689_v52, %v1549_v27  ;;  %v758_v55 = vadd.f32 %v757_v47, %v727_v46  ;;  %v737_v46 = vmul.f32 %v1616_v7, %v1616_v7  ;;  %v738_v47 = vmul.f32 %v1601_v62, %v1601_v62 }
 0x126   : > { %v759_v56 = vadd.f32 %v758_v55, %v728_v53  ;;  %v691_v57 = vadd.f32 %v690_v54, %v1557_v31  ;;  %v739_v54 = vmul.f32 %v1612_v5, %v1612_v5 }
 0x128   : > { %v692_v61 = vadd.f32 %v1545_v25, %v691_v57  ;;  %v760_v1 = vadd.f32 %v759_v56, %v729_v58  ;;  %v740_v57 = vmul.f32 %v1633_v20, %v1633_v20 }
 0x12a   : > { %v761_v3 = vadd.f32 %v760_v1, %v730_v59  ;;  %v693_v8 = vadd.f32 %v1553_v29, %v692_v61 }
 0x12c   : > { %v694_v10 = vadd.f32 %v693_v8, %v1577_v44  ;;  %v762_v11 = vadd.f32 %v761_v3, %v731_v2  ;;  %v741_v2 = vmul.f32 %v1644_v35, %v1644_v35  ;;  %v742_v3 = vmul.f32 %v1629_v18, %v1629_v18 }
 0x12e   : > { %v763_v12 = vadd.f32 %v762_v11, %v732_v9  ;;  %v695_v13 = vadd.f32 %v694_v10, %v1588_v51  ;;  %v743_v10 = vmul.f32 %v1640_v33, %v1640_v33 }
 0x130   : > { %v696_v17 = vadd.f32 %v1573_v42, %v695_v13  ;;  %v764_v21 = vadd.f32 %v763_v12, %v733_v14 }
 0x132   : > { %v765_v23 = vadd.f32 %v764_v21, %v734_v15  ;;  %v697_v36 = vadd.f32 %v1584_v49, %v696_v17 }
 0x134   : > { %v698_v38 = vadd.f32 %v697_v36, %v1605_v0  ;;  %v766_v39 = vadd.f32 %v765_v23, %v735_v22 }
 0x136   : > { %v767_v41 = vadd.f32 %v766_v39, %v736_v37  ;;  %v699_v45 = vadd.f32 %v698_v38, %v1616_v7 }
 0x138   : > { %v700_v52 = vadd.f32 %v1601_v62, %v699_v45  ;;  %v768_v53 = vadd.f32 %v767_v41, %v737_v46 }
 0x13a   : > { %v769_v55 = vadd.f32 %v768_v53, %v738_v47  ;;  %v701_v56 = vadd.f32 %v1612_v5, %v700_v52 }
 0x13c   : > { %v702_v58 = vadd.f32 %v701_v56, %v1633_v20  ;;  %v770_v59 = vadd.f32 %v769_v55, %v739_v54  ;;  %v792_v55 = vlaneseq }
 0x13e   : > { %v771_v61 = vadd.f32 %v770_v59, %v740_v57  ;;  %v703_v1 = vadd.f32 %v702_v58, %v1644_v35  ;;  %v1710_v56 = vshrl.u32 %v792_v55, 7  ;;  %v1713_v57 = vld [vmem:[%s1708_s23] sm:$0xff]   ;;  %v1716_v58 = vld [vmem:[%s1708_s23 + $0x8] sm:$0xff]   ;;  %v1719_v59 = vld [vmem:[%s1708_s23 + $0x10] sm:$0xff]  }
 0x140   : > { %v704_v8 = vadd.f32 %v1629_v18, %v703_v1  ;;  %v772_v9 = vadd.f32 %v771_v61, %v741_v2  ;;  %v1722_v61 = vld [vmem:[%s1708_s23 + $0x18] sm:$0xff]   ;;  %v1725_v1 = vld [vmem:[%s1708_s23 + $0x20] sm:$0xff]   ;;  %v794_v2 = vsub.s32 0, %v1710_v56 }
 0x142   : > { %v705_v11 = vadd.f32 %v1640_v33, %v704_v8  ;;  %v773_v12 = vadd.f32 %v772_v9, %v742_v3  ;;  %v1730_v8 = vld [vmem:[%s1708_s23 + $0x28] sm:$0xff]   ;;  %v1733_v9 = vld [vmem:[%s1708_s23 + $0x30] sm:$0xff]  }
 0x144   : > { %v706_v13 = vrot.slane %v705_v11, 4  ;;  %v774_v14 = vadd.f32 %v773_v12, %v743_v10  ;;  %v787_v10 = vld [vmem:[%s1984_s2] sm:$0x1] }
 0x146   : > { %v707_v15 = vadd.f32 %v706_v13, %v705_v11  ;;  %v775_v17 = vrot.slane %v774_v14, 4 }
 0x148   : > { %v708_v21 = vrot.slane %v707_v15, 2  ;;  %v776_v22 = vadd.f32 %v775_v17, %v774_v14 }
 0x14a   : > { %v709_v23 = vadd.f32 %v708_v21, %v707_v15  ;;  %v777_v36 = vrot.slane %v776_v22, 2  ;;  %v1743_v15 = vld [vmem:[%s1708_s23 + $0x38] sm:$0xff]   ;;  %v1769_v21 = vld [vmem:[%s1708_s23 + $0x60] sm:$0xff]  }
 0x14b   : > { %2000 = vst [vmem:[#allocation4_spill] sm:$0xff] %v1769_v21 }
 0x14c   : > { %v710_v37 = vrot.slane %v709_v23, 1  ;;  %v778_v38 = vadd.f32 %v777_v36, %v776_v22  ;;  %v1750_v36 = vld [vmem:[%s1708_s23 + $0x40] sm:$0xff]   ;;  %v1766_v22 = vld [vmem:[%s1708_s23 + $0x58] sm:$0xff]  }
 0x14d   : > { %1999 = vst [vmem:[#allocation3_spill] sm:$0xff] %v1766_v22 }
 0x14e   : > { %v711_v39 = vadd.f32 %v710_v37, %v709_v23  ;;  %v779_v41 = vrot.slane %v778_v38, 1  ;;  %v1753_v37 = vld [vmem:[%s1708_s23 + $0x48] sm:$0xff]  }
 0x150   : > { %v780_v45 = vadd.f32 %v779_v41, %v778_v38  ;;  %v781_v46 = vmul.f32 0.00390625, %v711_v39  ;;  %v789_v41 = vld [vmem:[%s1985_s3] sm:$0x1] }
 0x152   : > { %v782_v47 = vmul.f32 0.00390625, %v780_v45  ;;  %v783_v52 = vmul.f32 %v781_v46, %v781_v46 }
 0x154   : > { %v784_v53 = vsub.f32 %v782_v47, %v783_v52  ;;  %v1760_v52 = vld [vmem:[%s1708_s23 + $0x50] sm:$0xff]  }
 0x155   : > { %1998 = vst [vmem:[#allocation2_spill] sm:$0xff] %v1760_v52 }
 0x156   : > { %v785_v54 = vadd.f32 1e-05, %v784_v53 }
 0x158   : > { %1419 = vrsqrt.f32 %v785_v54 }
 0x162   : > { %v1420_v38 = vpop.eup %1419 }
 0x163   : > { %v788_v53 = vmul.f32 %v1420_v38, %v787_v10 }
 0x165   : > { %v790_v54 = vmul.f32 %v788_v53, %v781_v46  ;;  %v795_v23 = vrot.slane %v788_v53, %v794_v2 }
 0x167   : > { %v791_v13 = vsub.f32 %v789_v41, %v790_v54  ;;  %v796_v10 = vmul.f32 %v795_v23, %v1547_v26  ;;  %v797_v46 = vmul.f32 %v795_v23, %v1555_v30  ;;  %v798_v38 = vmul.f32 %v1543_v24, %v795_v23  ;;  %v1817_v54 = vld [vmem:[%s1708_s23 + $0x70] sm:$0xff]  }
 0x168   : > { %v799_v53 = vmul.f32 %v1551_v28, %v795_v23  ;;  %v800_v55 = vmul.f32 %v795_v23, %v1575_v43  ;;  %v801_v39 = vmul.f32 %v795_v23, %v1586_v50  ;;  %v802_v17 = vmul.f32 %v1570_v40, %v795_v23  ;;  %2002 = vst [vmem:[#allocation6_spill] sm:$0xff] %v1817_v54 }
 0x169   : > { %v803_v14 = vmul.f32 %v1582_v48, %v795_v23  ;;  %v804_v47 = vmul.f32 %v795_v23, %v1603_v63  ;;  %v805_v41 = vmul.f32 %v795_v23, %v1614_v6  ;;  %v806_v26 = vmul.f32 %v1598_v60, %v795_v23 }
 0x16a   : > { %v807_v30 = vmul.f32 %v1610_v4, %v795_v23  ;;  %v808_v24 = vmul.f32 %v795_v23, %v1631_v19  ;;  %v809_v28 = vmul.f32 %v795_v23, %v1642_v34  ;;  %v810_v43 = vmul.f32 %v1626_v16, %v795_v23  ;;  %v1810_v34 = vld [vmem:[%s1708_s23 + $0x68] sm:$0xff]  }
 0x16b   : > { %v811_v40 = vmul.f32 %v1638_v32, %v795_v23  ;;  %v812_v48 = vmul.f32 %v795_v23, %v1549_v27  ;;  %v813_v50 = vmul.f32 %v795_v23, %v1557_v31  ;;  %v814_v63 = vmul.f32 %v1545_v25, %v795_v23  ;;  %2001 = vst [vmem:[#allocation5_spill] sm:$0xff] %v1810_v34  ;;  %v1820_v25 = vld [vmem:[%s1708_s23 + $0x78] sm:$0xff]  }
 0x16c   : > { %v815_v60 = vmul.f32 %v1553_v29, %v795_v23  ;;  %v816_v4 = vmul.f32 %v795_v23, %v1577_v44  ;;  %v817_v6 = vmul.f32 %v795_v23, %v1588_v51  ;;  %v818_v19 = vmul.f32 %v1573_v42, %v795_v23 }
 0x16d   : > { %v819_v16 = vmul.f32 %v1584_v49, %v795_v23  ;;  %v820_v32 = vmul.f32 %v795_v23, %v1605_v0  ;;  %v821_v27 = vmul.f32 %v795_v23, %v1616_v7  ;;  %v822_v31 = vmul.f32 %v1601_v62, %v795_v23 }
 0x16e   : > { %v823_v29 = vmul.f32 %v1612_v5, %v795_v23  ;;  %v824_v44 = vmul.f32 %v795_v23, %v1633_v20  ;;  %v825_v42 = vmul.f32 %v795_v23, %v1644_v35  ;;  %v826_v51 = vmul.f32 %v1629_v18, %v795_v23 }
 0x16f   : > { %v827_v49 = vmul.f32 %v1640_v33, %v795_v23  ;;  %v832_v0 = vrot.slane %v791_v13, %v794_v2 }
 0x171   : > { %v834_v35 = vadd.f32 %v832_v0, %v796_v10  ;;  %v835_v11 = vadd.f32 %v832_v0, %v797_v46  ;;  %v836_v18 = vadd.f32 %v832_v0, %v798_v38  ;;  %v837_v3 = vadd.f32 %v832_v0, %v799_v53 }
 0x172   : > { %v838_v33 = vadd.f32 %v832_v0, %v800_v55  ;;  %v839_v23 = vadd.f32 %v832_v0, %v801_v39  ;;  %v840_v56 = vadd.f32 %v832_v0, %v802_v17  ;;  %v841_v2 = vadd.f32 %v832_v0, %v803_v14 }
 0x173   : > { %v842_v13 = vadd.f32 %v832_v0, %v804_v47  ;;  %v843_v7 = vadd.f32 %v832_v0, %v805_v41  ;;  %v844_v21 = vadd.f32 %v832_v0, %v806_v26  ;;  %v845_v62 = vadd.f32 %v832_v0, %v807_v30 }
 0x174   : > { %v846_v34 = vadd.f32 %v832_v0, %v808_v24  ;;  %v847_v45 = vadd.f32 %v832_v0, %v809_v28  ;;  %v848_v22 = vadd.f32 %v832_v0, %v810_v43  ;;  %v849_v12 = vadd.f32 %v832_v0, %v811_v40 }
 0x175   : > { %v850_v54 = vadd.f32 %v832_v0, %v812_v48  ;;  %v851_v5 = vadd.f32 %v832_v0, %v813_v50  ;;  %v852_v52 = vadd.f32 %v832_v0, %v814_v63  ;;  %v853_v20 = vadd.f32 %v832_v0, %v815_v60 }
 0x176   : > { %v854_v10 = vadd.f32 %v832_v0, %v816_v4  ;;  %v855_v46 = vadd.f32 %v832_v0, %v817_v6  ;;  %v856_v38 = vadd.f32 %v832_v0, %v818_v19  ;;  %v857_v53 = vadd.f32 %v832_v0, %v819_v16 }
 0x177   : > { %v858_v55 = vadd.f32 %v832_v0, %v820_v32  ;;  %v859_v39 = vadd.f32 %v832_v0, %v821_v27  ;;  %v860_v17 = vadd.f32 %v832_v0, %v822_v31  ;;  %v861_v14 = vadd.f32 %v832_v0, %v823_v29 }
 0x178   : > { %v862_v47 = vadd.f32 %v832_v0, %v824_v44  ;;  %v863_v41 = vadd.f32 %v832_v0, %v825_v42  ;;  %v864_v26 = vadd.f32 %v832_v0, %v826_v51  ;;  %v865_v30 = vadd.f32 %v832_v0, %v827_v49 }
 0x179   : > { %v2003_v24 = vunpack.c.l.bf16 %v1713_v57  ;;  %v2004_v43 = vunpack.c.h.bf16 %v1713_v57  ;;  %v2005_v48 = vunpack.c.l.bf16 %v1716_v58  ;;  %v2006_v63 = vunpack.c.h.bf16 %v1716_v58 }
 0x17a   : > { %v2007_v4 = vunpack.c.l.bf16 %v1719_v59  ;;  %v2008_v19 = vunpack.c.h.bf16 %v1719_v59  ;;  %v2009_v32 = vunpack.c.l.bf16 %v1722_v61  ;;  %v2010_v31 = vunpack.c.h.bf16 %v1722_v61 }
 0x17b   : > { %v930_v28 = vadd.f32 %v2003_v24, %v834_v35  ;;  %v931_v40 = vadd.f32 %v2004_v43, %v835_v11  ;;  %v932_v50 = vadd.f32 %v2005_v48, %v836_v18  ;;  %v933_v60 = vadd.f32 %v2006_v63, %v837_v3  ;;  %v2032_v63 = vld [vmem:[#allocation5_spill] sm:$0xff] }
 0x17c   : > { %v934_v6 = vadd.f32 %v2007_v4, %v838_v33  ;;  %v935_v16 = vadd.f32 %v2008_v19, %v839_v23  ;;  %v936_v27 = vadd.f32 %v2009_v32, %v840_v56  ;;  %v937_v57 = vadd.f32 %v2010_v31, %v841_v2 }
 0x17d   : > { %v2011_v11 = vunpack.c.l.bf16 %v1725_v1  ;;  %v2012_v44 = vunpack.c.h.bf16 %v1725_v1  ;;  %v2013_v58 = vunpack.c.l.bf16 %v1730_v8  ;;  %v2014_v51 = vunpack.c.h.bf16 %v1730_v8 }
 0x17e   : > { %v2015_v59 = vunpack.c.l.bf16 %v1733_v9  ;;  %v2016_v35 = vunpack.c.h.bf16 %v1733_v9  ;;  %v2017_v61 = vunpack.c.l.bf16 %v1743_v15  ;;  %v2018_v23 = vunpack.c.h.bf16 %v1743_v15 }
 0x17f   : > { %v938_v29 = vadd.f32 %v2011_v11, %v842_v13  ;;  %v939_v42 = vadd.f32 %v2012_v44, %v843_v7  ;;  %v940_v3 = vadd.f32 %v2013_v58, %v844_v21  ;;  %v941_v49 = vadd.f32 %v2014_v51, %v845_v62 }
 0x180   : > { %v942_v0 = vadd.f32 %v2015_v59, %v846_v34  ;;  %v943_v18 = vadd.f32 %v2016_v35, %v847_v45  ;;  %v944_v33 = vadd.f32 %v2017_v61, %v848_v22  ;;  %v945_v56 = vadd.f32 %v2018_v23, %v849_v12  ;;  %v2023_v45 = vld [vmem:[#allocation2_spill] sm:$0xff]  ;;  %v2026_v22 = vld [vmem:[#allocation3_spill] sm:$0xff] }
 0x181   : > { %v2019_v1 = vunpack.c.l.bf16 %v1750_v36  ;;  %v2020_v21 = vunpack.c.h.bf16 %v1750_v36  ;;  %v2021_v62 = vunpack.c.l.bf16 %v1753_v37  ;;  %v2022_v34 = vunpack.c.h.bf16 %v1753_v37 }
 0x182   : > { %v2024_v13 = vunpack.c.l.bf16 %v2023_v45  ;;  %v2025_v15 = vunpack.c.h.bf16 %v2023_v45  ;;  %v2027_v43 = vunpack.c.l.bf16 %v2026_v22  ;;  %v2028_v36 = vunpack.c.h.bf16 %v2026_v22 }
 0x183   : > { %v946_v7 = vadd.f32 %v2019_v1, %v850_v54  ;;  %v947_v8 = vadd.f32 %v2020_v21, %v851_v5  ;;  %v948_v2 = vadd.f32 %v2021_v62, %v852_v52  ;;  %v949_v9 = vadd.f32 %v2022_v34, %v853_v20  ;;  %v2029_v52 = vld [vmem:[#allocation4_spill] sm:$0xff] }
 0x184   : > { %v1878_v24 = vadd.f32 %v2024_v13, %v854_v10  ;;  %v1882_v12 = vadd.f32 %v2025_v15, %v855_v46  ;;  %v1886_v54 = vadd.f32 %v2027_v43, %v856_v38  ;;  %v1890_v5 = vadd.f32 %v2028_v36, %v857_v53  ;;  %v2035_v53 = vld [vmem:[#allocation6_spill] sm:$0xff] }
 0x185   : > { %v2030_v48 = vunpack.c.l.bf16 %v2029_v52  ;;  %v2031_v20 = vunpack.c.h.bf16 %v2029_v52  ;;  %v2033_v4 = vunpack.c.l.bf16 %v2032_v63  ;;  %v2034_v19 = vunpack.c.h.bf16 %v2032_v63 }
 0x186   : > { %v962_v58 = vmax.f32 %v930_v28, 0.0  ;;  %v963_v51 = vmax.f32 %v931_v40, 0.0  ;;  %v965_v59 = vmax.f32 %v933_v60, 0.0  ;;  %v966_v35 = vmax.f32 %v934_v6, 0.0 }
 0x187   : > { %v1894_v37 = vadd.f32 %v2030_v48, %v858_v55  ;;  %v1898_v10 = vadd.f32 %v2031_v20, %v859_v39  ;;  %v1902_v46 = vadd.f32 %v2033_v4, %v860_v17  ;;  %v1906_v38 = vadd.f32 %v2034_v19, %v861_v14 }
 0x188   : > { %v2036_v55 = vunpack.c.l.bf16 %v2035_v53  ;;  %v2037_v39 = vunpack.c.h.bf16 %v2035_v53  ;;  %v2038_v17 = vunpack.c.l.bf16 %v1820_v25  ;;  %v2039_v14 = vunpack.c.h.bf16 %v1820_v25  ;;  %994 = vst [vmem:[%s1911_s30] sm:$0xff] %v962_v58  ;;  %995 = vst [vmem:[%s1911_s30 + $0x8] sm:$0xff] %v963_v51 }
 0x189   : > { %v967_v61 = vmax.f32 %v935_v16, 0.0  ;;  %v969_v23 = vmax.f32 %v937_v57, 0.0  ;;  %v971_v1 = vmax.f32 %v939_v42, 0.0  ;;  %v972_v21 = vmax.f32 %v940_v3, 0.0  ;;  %997 = vst [vmem:[%s1911_s30 + $0x18] sm:$0xff] %v965_v59  ;;  %998 = vst [vmem:[%s1911_s30 + $0x20] sm:$0xff] %v966_v35 }
 0x18a   : > { %v1915_v32 = vadd.f32 %v2036_v55, %v862_v47  ;;  %v1919_v31 = vadd.f32 %v2037_v39, %v863_v41  ;;  %v1923_v11 = vadd.f32 %v2038_v17, %v864_v26  ;;  %v1927_v44 = vadd.f32 %v2039_v14, %v865_v30 }
 0x18b   : > { %v964_v47 = vmax.f32 %v932_v50, 0.0  ;;  %v968_v41 = vmax.f32 %v936_v27, 0.0  ;;  %v970_v26 = vmax.f32 %v938_v29, 0.0  ;;  %v973_v25 = vmax.f32 %v941_v49, 0.0  ;;  %999 = vst [vmem:[%s1911_s30 + $0x28] sm:$0xff] %v967_v61  ;;  %1001 = vst [vmem:[%s1911_s30 + $0x38] sm:$0xff] %v969_v23 }
 0x18c   : > { %v974_v30 = vmax.f32 %v942_v0, 0.0  ;;  %v975_v28 = vmax.f32 %v943_v18, 0.0  ;;  %v976_v40 = vmax.f32 %v944_v33, 0.0  ;;  %v977_v50 = vmax.f32 %v945_v56, 0.0  ;;  %1003 = vst [vmem:[%s1911_s30 + $0x48] sm:$0xff] %v971_v1  ;;  %1004 = vst [vmem:[%s1911_s30 + $0x50] sm:$0xff] %v972_v21 }
 0x18d   : > { %996 = vst [vmem:[%s1911_s30 + $0x10] sm:$0xff] %v964_v47  ;;  %1000 = vst [vmem:[%s1911_s30 + $0x30] sm:$0xff] %v968_v41  ;;  %v978_v60 = vmax.f32 %v946_v7, 0.0  ;;  %v979_v6 = vmax.f32 %v947_v8, 0.0  ;;  %v980_v16 = vmax.f32 %v948_v2, 0.0  ;;  %v981_v27 = vmax.f32 %v949_v9, 0.0 }
 0x18e   : > { %1002 = vst [vmem:[%s1911_s30 + $0x40] sm:$0xff] %v970_v26  ;;  %1005 = vst [vmem:[%s1911_s30 + $0x58] sm:$0xff] %v973_v25  ;;  %v982_v57 = vmax.f32 %v1878_v24, 0.0  ;;  %v983_v29 = vmax.f32 %v1882_v12, 0.0  ;;  %v984_v42 = vmax.f32 %v1886_v54, 0.0  ;;  %v985_v3 = vmax.f32 %v1890_v5, 0.0 }
 0x18f   : > { %1006 = vst [vmem:[%s1911_s30 + $0x60] sm:$0xff] %v974_v30  ;;  %1007 = vst [vmem:[%s1911_s30 + $0x68] sm:$0xff] %v975_v28  ;;  %v986_v49 = vmax.f32 %v1894_v37, 0.0  ;;  %v987_v0 = vmax.f32 %v1898_v10, 0.0  ;;  %v988_v18 = vmax.f32 %v1902_v46, 0.0  ;;  %v989_v33 = vmax.f32 %v1906_v38, 0.0 }
 0x190   : > { %1008 = vst [vmem:[%s1911_s30 + $0x70] sm:$0xff] %v976_v40  ;;  %1009 = vst [vmem:[%s1911_s30 + $0x78] sm:$0xff] %v977_v50  ;;  %v990_v56 = vmax.f32 %v1915_v32, 0.0  ;;  %v991_v7 = vmax.f32 %v1919_v31, 0.0  ;;  %v992_v8 = vmax.f32 %v1923_v11, 0.0  ;;  %v993_v62 = vmax.f32 %v1927_v44, 0.0 }
 0x191   : > { %1010 = vst [vmem:[%s1911_s30 + $0x80] sm:$0xff] %v978_v60  ;;  %1011 = vst [vmem:[%s1911_s30 + $0x88] sm:$0xff] %v979_v6 }
 0x192   : > { %1012 = vst [vmem:[%s1911_s30 + $0x90] sm:$0xff] %v980_v16  ;;  %1013 = vst [vmem:[%s1911_s30 + $0x98] sm:$0xff] %v981_v27 }
 0x193   : > { %1014 = vst [vmem:[%s1911_s30 + $0xa0] sm:$0xff] %v982_v57  ;;  %1015 = vst [vmem:[%s1911_s30 + $0xa8] sm:$0xff] %v983_v29 }
 0x194   : > { %1016 = vst [vmem:[%s1911_s30 + $0xb0] sm:$0xff] %v984_v42  ;;  %1017 = vst [vmem:[%s1911_s30 + $0xb8] sm:$0xff] %v985_v3 }
 0x195   : > { %1018 = vst [vmem:[%s1911_s30 + $0xc0] sm:$0xff] %v986_v49  ;;  %1019 = vst [vmem:[%s1911_s30 + $0xc8] sm:$0xff] %v987_v0 }
 0x196   : > { %1020 = vst [vmem:[%s1911_s30 + $0xd0] sm:$0xff] %v988_v18  ;;  %1021 = vst [vmem:[%s1911_s30 + $0xd8] sm:$0xff] %v989_v33 }
 0x197   : > { %1022 = vst [vmem:[%s1911_s30 + $0xe0] sm:$0xff] %v990_v56  ;;  %1023 = vst [vmem:[%s1911_s30 + $0xe8] sm:$0xff] %v991_v7 }
 0x198   : > { %1024 = vst [vmem:[%s1911_s30 + $0xf0] sm:$0xff] %v992_v8  ;;  %1025 = vst [vmem:[%s1911_s30 + $0xf8] sm:$0xff] %v993_v62 }
 0x199 PF: > { %s15_s20 = sadd.s32 1, %s1443_s20   ;;  %s2040_s18 = smov %s1439_s19 }
 0x19a   : > { %p12_p5 = scmp.ge.s32.totalorder %s15_s20, 4   ;;  %s2041_s19 = smov %s2043_s21 }
 0x19c   :  { %14 = sbr.rel (!%p12_p5) target bundleno = 2 (0x2), region = 82 }

// kernel: res_bottleneck_forward.4
= control target key start
LH: loop header
LB: loop body
LE: loop exit
PB: predicated region body
PF: predicated region fallthrough
CT: control target
= control target key end

     0   :  { %s6447_s18 = smov 0   ;;  %s6449_s19 = smov 0   ;;  %s9185_s0 = inlined_call_operand.vmem [shape: bf16[2,336,128], index: 0, kind: input, shape index: {}]   ;;  %s9186_s1 = inlined_call_operand.vmem [shape: bf16[1152,128], index: 1, kind: input, shape index: {}]   ;;  %s9187_s2 = inlined_call_operand.vmem [shape: f32[336,1], index: 2, kind: input, shape index: {}]   ;;  %s9188_s3 = inlined_call_operand.vmem [shape: f32[1,128], index: 3, kind: input, shape index: {}]   ;;  %s9189_s4 = inlined_call_operand.vmem [shape: f32[1,128], index: 4, kind: input, shape index: {}]   ;;  %s9190_s5 = inlined_call_operand.vmem [shape: bf16[2,336,128], index: 5, kind: output, shape index: {}]  }
   0x1   :  { %s6451_s20 = smov 0  }
   0x2 LB: > { %s27_s21 = sadd.s32 1, %s6408_s19  ;;  %p4729_p0 = scmp.ge.s32.totalorder %s6412_s20, 1  ;;  %s6412_s20 = sphi %s6451_s20, %s15_s20   ;;  %s6408_s19 = sphi %s6449_s19, %s9254_s19   ;;  %s6404_s18 = sphi %s6447_s18, %s9253_s18  }
   0x3   : > { %p29_p1 = scmp.ge.s32.totalorder %s27_s21, 2  ;;  %p226_p2 = scmp.lt.s32.totalorder %s6412_s20, 3 }
   0x5   : > { %s9256_s21 = smov (%p29_p1, %s27_s21), 0  ;;  %p227_p3 = pnand %p4729_p0, %p226_p2 }
   0x7   : > { %230 = sbr.rel (%p227_p3) target bundleno = 1112 (0x458), region = 40 }
   0xe   : > { %v6243_v0 = vld [vmem:[%s9186_s1 + $0x40] sm:$0xff]   ;;  %v9193_v1 = vmov 0.0   ;;  %v6244_v2 = vld [vmem:[%s9186_s1 + $0x48] sm:$0xff]   ;;  %p267_p4 = scmp.lt.s32.totalorder %s6404_s18, 1  ;;  %vm6415_vm0 = vmmov 0   ;;  %v6245_v3 = vld [vmem:[%s9186_s1 + $0x50] sm:$0xff]   ;;  %v782_v62 = vlaneseq }
   0xf   : > { %5297 = vmatprep.subr.bf16.mxu0 %v9193_v1  ;;  %6197 = vmatprep.subr.bf16.mxu1 %v9193_v1  ;;  %v6246_v4 = vld [vmem:[%s9186_s1 + $0x58] sm:$0xff]   ;;  %v6247_v5 = vld [vmem:[%s9186_s1 + $0x60] sm:$0xff]   ;;  %v6248_v6 = vld [vmem:[%s9186_s1 + $0x68] sm:$0xff]  }
  0x10   : > { %5298 = vmatpush3.bf16.msra.mxu0 %v6243_v0  ;;  %6205 = vmatpush3.bf16.msra.mxu1 %v6243_v0  ;;  %s9258_s18 = smov (!%p267_p4, %s6404_s18), 1  ;;  %v6249_v7 = vld [vmem:[%s9186_s1 + $0x70] sm:$0xff]   ;;  %v6250_v8 = vld [vmem:[%s9186_s1 + $0x78] sm:$0xff]   ;;  %v6253_v11 = vld [vmem:[%s9186_s1 + $0x80] sm:$0xff]  }
  0x11   : > { %5299 = vmatprep.subr.bf16.mxu0 %v9193_v1  ;;  %6198 = vmatprep.subr.bf16.mxu1 %v9193_v1  ;;  %s6213_s28 = smul.u32 168, %s9258_s18  ;;  %v6254_v12 = vld [vmem:[%s9186_s1] sm:$0xff]   ;;  %v6257_v13 = vld [vmem:[%s9186_s1 + $0x88] sm:$0xff]   ;;  %v6261_v17 = vld [vmem:[%s9186_s1 + $0x90] sm:$0xff]  }
  0x12   : > { %5313 = vmatprep.mubr.msk.bf16.mxu0 %vm6415_vm0, %v9193_v1  ;;  %5357 = vmatprep.mubr.msk.bf16.mxu1 %vm6415_vm0, %v9193_v1  ;;  %v6260_v14 = vld [vmem:[%s9186_s1 + $0x8] sm:$0xff]   ;;  %v6264_v18 = vld [vmem:[%s9186_s1 + $0x10] sm:$0xff]   ;;  %v6267_v19 = vld [vmem:[%s9186_s1 + $0x98] sm:$0xff]  }
  0x13   : > { %s6492_s6 = scalar_lea.vmem %s9185_s0, %s6213_s28  ;;  %v6268_v20 = vld [vmem:[%s9186_s1 + $0x18] sm:$0xff]   ;;  %v6271_v23 = vld [vmem:[%s9186_s1 + $0xa0] sm:$0xff]   ;;  %v6277_v25 = vld [vmem:[%s9186_s1 + $0xa8] sm:$0xff]   ;;  %s9149_s30 = scalar_lea.vmem %s9190_s5, %s6213_s28 }
  0x14   : > { %5300 = vmatpush3.bf16.msra.mxu0 %v6244_v2  ;;  %6206 = vmatpush3.bf16.msra.mxu1 %v6244_v2  ;;  %v6520_v9 = vld [vmem:[%s6492_s6] sm:$0xff]   ;;  %v6523_v10 = vld [vmem:[%s6492_s6 + $0x58] sm:$0xff]   ;;  %v6546_v15 = vld [vmem:[%s6492_s6 + $0x8] sm:$0xff]   ;;  %v6878_v2 = vshrl.u32 %v782_v62, 7 }
  0x15   : > { %5301 = vmatprep.subr.bf16.mxu0 %v9193_v1  ;;  %6199 = vmatprep.subr.bf16.mxu1 %v9193_v1  ;;  %v6551_v16 = vld [vmem:[%s6492_s6 + $0x60] sm:$0xff]   ;;  %v6574_v21 = vld [vmem:[%s6492_s6 + $0x10] sm:$0xff]   ;;  %v6579_v22 = vld [vmem:[%s6492_s6 + $0x68] sm:$0xff]  }
  0x16   : > { %v6272_v24 = vld [vmem:[%s9186_s1 + $0x20] sm:$0xff]   ;;  %v6599_v26 = vld [vmem:[%s6492_s6 + $0x18] sm:$0xff]   ;;  %v6602_v27 = vld [vmem:[%s6492_s6 + $0x70] sm:$0xff]   ;;  %vm784_vm1 = vcmp.lt.s32.totalorder %v6878_v2, 7  ;;  %vm1383_vm2 = vcmp.lt.s32.totalorder %v6878_v2, 6  ;;  %vm2166_vm3 = vcmp.lt.s32.totalorder %v6878_v2, 5 }
  0x17   : > { %v6278_v28 = vld [vmem:[%s9186_s1 + $0x28] sm:$0xff]   ;;  %v6281_v29 = vld [vmem:[%s9186_s1 + $0x30] sm:$0xff]   ;;  %v6285_v31 = vld [vmem:[%s9186_s1 + $0x38] sm:$0xff]   ;;  %vm2558_vm4 = vcmp.lt.s32.totalorder %v6878_v2, 4  ;;  %vm3341_vm5 = vcmp.lt.s32.totalorder %v6878_v2, 3  ;;  %vm3733_vm6 = vcmp.lt.s32.totalorder %v6878_v2, 2 }
  0x18   : > { %5302 = vmatpush3.bf16.msra.mxu0 %v6245_v3  ;;  %6207 = vmatpush3.bf16.msra.mxu1 %v6245_v3  ;;  %v6282_v30 = vld [vmem:[%s9186_s1 + $0xb0] sm:$0xff]   ;;  %v6286_v32 = vld [vmem:[%s9186_s1 + $0xb8] sm:$0xff]   ;;  %v6630_v33 = vld [vmem:[%s6492_s6 + $0x20] sm:$0xff]  }
  0x19   : > { %5303 = vmatprep.subr.bf16.mxu0 %v9193_v1  ;;  %6200 = vmatprep.subr.bf16.mxu1 %v9193_v1  ;;  %v6633_v34 = vld [vmem:[%s6492_s6 + $0x78] sm:$0xff]   ;;  %v6646_v35 = vld [vmem:[%s6492_s6 + $0x28] sm:$0xff]   ;;  %v6649_v36 = vld [vmem:[%s6492_s6 + $0x80] sm:$0xff]  }
  0x1a   : > { %v6658_v37 = vld [vmem:[%s6492_s6 + $0x30] sm:$0xff]   ;;  %v6661_v38 = vld [vmem:[%s6492_s6 + $0x88] sm:$0xff]   ;;  %v6670_v39 = vld [vmem:[%s6492_s6 + $0x38] sm:$0xff]  }
  0x1b   : > { %v6673_v40 = vld [vmem:[%s6492_s6 + $0x90] sm:$0xff]   ;;  %v6682_v41 = vld [vmem:[%s6492_s6 + $0x40] sm:$0xff]   ;;  %v6685_v42 = vld [vmem:[%s6492_s6 + $0x98] sm:$0xff]  }
  0x1c   : > { %5304 = vmatpush3.bf16.msra.mxu0 %v6246_v4  ;;  %6208 = vmatpush3.bf16.msra.mxu1 %v6246_v4  ;;  %v6694_v43 = vld [vmem:[%s6492_s6 + $0x48] sm:$0xff]   ;;  %v6697_v44 = vld [vmem:[%s6492_s6 + $0xa0] sm:$0xff]   ;;  %v6706_v45 = vld [vmem:[%s6492_s6 + $0x50] sm:$0xff]  }
  0x1d   : > { %5305 = vmatprep.subr.bf16.mxu0 %v9193_v1  ;;  %6201 = vmatprep.subr.bf16.mxu1 %v9193_v1  ;;  %v6288_v46 = vld [vmem:[%s9186_s1 + $0xc0] sm:$0xff]   ;;  %v6290_v47 = vld [vmem:[%s9186_s1 + $0xc8] sm:$0xff]   ;;  %v6292_v49 = vld [vmem:[%s9186_s1 + $0xd0] sm:$0xff]  }
  0x1e   : > { %v6289_v48 = vld [vmem:[%s9186_s1 + $0x100] sm:$0xff]   ;;  %v6291_v50 = vld [vmem:[%s9186_s1 + $0x108] sm:$0xff]   ;;  %v6294_v51 = vld [vmem:[%s9186_s1 + $0xd8] sm:$0xff]  }
  0x1f   : > { %v6293_v52 = vld [vmem:[%s9186_s1 + $0x110] sm:$0xff]   ;;  %v6296_v53 = vld [vmem:[%s9186_s1 + $0xe0] sm:$0xff]   ;;  %v6295_v54 = vld [vmem:[%s9186_s1 + $0x118] sm:$0xff]  }
  0x20   : > { %5306 = vmatpush3.bf16.msra.mxu0 %v6247_v5  ;;  %6209 = vmatpush3.bf16.msra.mxu1 %v6247_v5  ;;  %v6298_v55 = vld [vmem:[%s9186_s1 + $0xe8] sm:$0xff]   ;;  %v6297_v56 = vld [vmem:[%s9186_s1 + $0x120] sm:$0xff]   ;;  %v6300_v57 = vld [vmem:[%s9186_s1 + $0xf0] sm:$0xff]  }
  0x21   : > { %5307 = vmatprep.subr.bf16.mxu0 %v9193_v1  ;;  %6202 = vmatprep.subr.bf16.mxu1 %v9193_v1  ;;  %v6299_v58 = vld [vmem:[%s9186_s1 + $0x128] sm:$0xff]   ;;  %v6302_v59 = vld [vmem:[%s9186_s1 + $0xf8] sm:$0xff]   ;;  %v6301_v60 = vld [vmem:[%s9186_s1 + $0x130] sm:$0xff]  }
  0x22   : > { %v6303_v61 = vld [vmem:[%s9186_s1 + $0x138] sm:$0xff]  }
  0x24   : > { %5308 = vmatpush3.bf16.msra.mxu0 %v6248_v6  ;;  %6210 = vmatpush3.bf16.msra.mxu1 %v6248_v6 }
  0x25   : > { %5309 = vmatprep.subr.bf16.mxu0 %v9193_v1  ;;  %6203 = vmatprep.subr.bf16.mxu1 %v9193_v1 }
  0x28   : > { %5310 = vmatpush3.bf16.msra.mxu0 %v6249_v7  ;;  %6211 = vmatpush3.bf16.msra.mxu1 %v6249_v7 }
  0x29   : > { %5311 = vmatprep.subr.bf16.mxu0 %v9193_v1  ;;  %6204 = vmatprep.subr.bf16.mxu1 %v9193_v1 }
  0x2c   : > { %5312 = vmatpush3.bf16.msra.mxu0 %v6250_v8  ;;  %6212 = vmatpush3.bf16.msra.mxu1 %v6250_v8 }
  0x2d   : > { %5497 = vmatprep.subr.bf16.mxu0 %v9193_v1  ;;  %5397 = vmatprep.subr.bf16.mxu1 %v9193_v1 }
  0x2f   : > { %5314 = vmatmul.mubr.bf16.vlgmr.msra.gmra.mrb[0].mxu0 %v6520_v9  ;;  %5358 = vmatmul.mubr.bf16.vlgmr.msra.gmra.mrb[0].mxu1 %v6523_v10 }
  0x30   : > { %5498 = vmatpush3.bf16.msra.mxu0 %v6253_v11  ;;  %5317 = vmatprep.mubr.msk.bf16.mxu0 %vm6415_vm0, %v9193_v1 }
  0x31   : > { %5361 = vmatprep.mubr.msk.bf16.mxu1 %vm6415_vm0, %v9193_v1  ;;  %5398 = vmatpush3.bf16.msra.mxu1 %v6254_v12 }
  0x32   : > { %5499 = vmatprep.subr.bf16.mxu0 %v9193_v1  ;;  %5399 = vmatprep.subr.bf16.mxu1 %v9193_v1 }
  0x34   : > { %5500 = vmatpush3.bf16.msra.mxu0 %v6257_v13 }
  0x35   : > { %5400 = vmatpush3.bf16.msra.mxu1 %v6260_v14  ;;  %5501 = vmatprep.subr.bf16.mxu0 %v9193_v1 }
  0x36   : > { %5401 = vmatprep.subr.bf16.mxu1 %v9193_v1 }
  0x37   : > { %5318 = vmatmul.mubr.bf16.gmra.mrb[4].mxu0 %v6546_v15  ;;  %5362 = vmatmul.mubr.bf16.gmra.mrb[4].mxu1 %v6551_v16 }
  0x38   : > { %5321 = vmatprep.mubr.msk.bf16.mxu0 %vm6415_vm0, %v9193_v1  ;;  %5365 = vmatprep.mubr.msk.bf16.mxu1 %vm6415_vm0, %v9193_v1 }
  0x39   : > { %5502 = vmatpush3.bf16.msra.mxu0 %v6261_v17  ;;  %5402 = vmatpush3.bf16.msra.mxu1 %v6264_v18 }
  0x3a   : > { %5503 = vmatprep.subr.bf16.mxu0 %v9193_v1  ;;  %5403 = vmatprep.subr.bf16.mxu1 %v9193_v1 }
  0x3d   : > { %5504 = vmatpush3.bf16.msra.mxu0 %v6267_v19  ;;  %5404 = vmatpush3.bf16.msra.mxu1 %v6268_v20 }
  0x3e   : > { %5505 = vmatprep.subr.bf16.mxu0 %v9193_v1  ;;  %5405 = vmatprep.subr.bf16.mxu1 %v9193_v1 }
  0x3f   : > { %5322 = vmatmul.mubr.bf16.gmra.mrb[8].mxu0 %v6574_v21  ;;  %5366 = vmatmul.mubr.bf16.gmra.mrb[8].mxu1 %v6579_v22 }
  0x40   : > { %5325 = vmatprep.mubr.msk.bf16.mxu0 %vm6415_vm0, %v9193_v1  ;;  %5369 = vmatprep.mubr.msk.bf16.mxu1 %vm6415_vm0, %v9193_v1 }
  0x41   : > { %5506 = vmatpush3.bf16.msra.mxu0 %v6271_v23  ;;  %5406 = vmatpush3.bf16.msra.mxu1 %v6272_v24 }
  0x42   : > { %5507 = vmatprep.subr.bf16.mxu0 %v9193_v1  ;;  %5407 = vmatprep.subr.bf16.mxu1 %v9193_v1 }
  0x45   : > { %5508 = vmatpush3.bf16.msra.mxu0 %v6277_v25  ;;  %5408 = vmatpush3.bf16.msra.mxu1 %v6278_v28 }
  0x46   : > { %5409 = vmatprep.subr.bf16.mxu1 %v9193_v1  ;;  %5509 = vmatprep.subr.bf16.mxu0 %v9193_v1 }
  0x47   : > { %5326 = vmatmul.mubr.bf16.gmra.mrb[12].mxu0 %v6599_v26  ;;  %5370 = vmatmul.mubr.bf16.gmra.mrb[12].mxu1 %v6602_v27 }
  0x48   : > { %5329 = vmatprep.mubr.msk.bf16.mxu0 %vm6415_vm0, %v9193_v1  ;;  %5373 = vmatprep.mubr.msk.bf16.mxu1 %vm6415_vm0, %v9193_v1 }
  0x49   : > { %5410 = vmatpush3.bf16.msra.mxu1 %v6281_v29  ;;  %5510 = vmatpush3.bf16.msra.mxu0 %v6282_v30 }
  0x4a   : > { %5411 = vmatprep.subr.bf16.mxu1 %v9193_v1  ;;  %5511 = vmatprep.subr.bf16.mxu0 %v9193_v1 }
  0x4d   : > { %5412 = vmatpush3.bf16.msra.mxu1 %v6285_v31  ;;  %5512 = vmatpush3.bf16.msra.mxu0 %v6286_v32 }
  0x4e   : > { %5597 = vmatprep.subr.bf16.mxu1 %v9193_v1  ;;  %5697 = vmatprep.subr.bf16.mxu0 %v9193_v1 }
  0x4f   : > { %5330 = vmatmul.mubr.bf16.gmra.mrb[16].mxu0 %v6630_v33  ;;  %5374 = vmatmul.mubr.bf16.gmra.mrb[16].mxu1 %v6633_v34 }
  0x50   : > { %5333 = vmatprep.mubr.msk.bf16.mxu0 %vm6415_vm0, %v9193_v1  ;;  %5377 = vmatprep.mubr.msk.bf16.mxu1 %vm6415_vm0, %v9193_v1 }
  0x57   : > { %5334 = vmatmul.mubr.bf16.gmra.mrb[20].mxu0 %v6646_v35  ;;  %5378 = vmatmul.mubr.bf16.gmra.mrb[20].mxu1 %v6649_v36 }
  0x58   : > { %5337 = vmatprep.mubr.msk.bf16.mxu0 %vm6415_vm0, %v9193_v1  ;;  %5381 = vmatprep.mubr.msk.bf16.mxu1 %vm6415_vm0, %v9193_v1 }
  0x5f   : > { %5338 = vmatmul.mubr.bf16.gmra.mrb[24].mxu0 %v6658_v37  ;;  %5382 = vmatmul.mubr.bf16.gmra.mrb[24].mxu1 %v6661_v38 }
  0x60   : > { %5341 = vmatprep.mubr.msk.bf16.mxu0 %vm6415_vm0, %v9193_v1  ;;  %5385 = vmatprep.mubr.msk.bf16.mxu1 %vm6415_vm0, %v9193_v1 }
  0x67   : > { %5342 = vmatmul.mubr.bf16.gmra.mrb[28].mxu0 %v6670_v39  ;;  %5386 = vmatmul.mubr.bf16.gmra.mrb[28].mxu1 %v6673_v40 }
  0x68   : > { %5345 = vmatprep.mubr.msk.bf16.mxu0 %vm6415_vm0, %v9193_v1  ;;  %5389 = vmatprep.mubr.msk.bf16.mxu1 %vm6415_vm0, %v9193_v1 }
  0x6f   : > { %5346 = vmatmul.mubr.bf16.gmra.mrb[32].mxu0 %v6682_v41  ;;  %5390 = vmatmul.mubr.bf16.gmra.mrb[32].mxu1 %v6685_v42 }
  0x70   : > { %5349 = vmatprep.mubr.msk.bf16.mxu0 %vm6415_vm0, %v9193_v1  ;;  %5393 = vmatprep.mubr.msk.bf16.mxu1 %vm6415_vm0, %v9193_v1 }
  0x77   : > { %5350 = vmatmul.mubr.bf16.gmra.mrb[36].mxu0 %v6694_v43  ;;  %5394 = vmatmul.mubr.bf16.gmra.mrb[36].mxu1 %v6697_v44 }
  0x78   : > { %5353 = vmatprep.mubr.msk.bf16.mxu0 %vm6415_vm0, %v9193_v1  ;;  %5413 = vmatprep.mubr.msk.bf16.mxu1 %vm6415_vm0, %v9193_v1 }
  0x7f   : > { %5354 = vmatmul.mubr.bf16.gmra.mrb[40].mxu0 %v6706_v45  ;;  %5414 = vmatmul.mubr.bf16.vlgmr.msra.gmra.mrb[40].mxu1 %v6520_v9 }
  0x80   : > { %5417 = vmatprep.mubr.msk.bf16.mxu1 %vm6415_vm0, %v9193_v1  ;;  %5513 = vmatprep.mubr.msk.bf16.mxu0 %vm6415_vm0, %v9193_v1 }
  0x81   : > { %5598 = vmatpush3.bf16.msra.mxu1 %v6288_v46 }
  0x82   : > { %5599 = vmatprep.subr.bf16.mxu1 %v9193_v1 }
  0x85   : > { %5600 = vmatpush3.bf16.msra.mxu1 %v6290_v47 }
  0x86   : > { %5601 = vmatprep.subr.bf16.mxu1 %v9193_v1 }
  0x87   : > { %5418 = vmatmul.mubr.bf16.gmra.mrb[44].mxu1 %v6546_v15  ;;  %5514 = vmatmul.mubr.bf16.vlgmr.msra.gmra.mrb[44].mxu0 %v6520_v9 }
  0x88   : > { %5698 = vmatpush3.bf16.msra.mxu0 %v6289_v48  ;;  %5421 = vmatprep.mubr.msk.bf16.mxu1 %vm6415_vm0, %v9193_v1 }
  0x89   : > { %5517 = vmatprep.mubr.msk.bf16.mxu0 %vm6415_vm0, %v9193_v1  ;;  %5699 = vmatprep.subr.bf16.mxu0 %v9193_v1 }
  0x8a   : > { %5602 = vmatpush3.bf16.msra.mxu1 %v6292_v49 }
  0x8b   : > { %5603 = vmatprep.subr.bf16.mxu1 %v9193_v1 }
  0x8c   : > { %5700 = vmatpush3.bf16.msra.mxu0 %v6291_v50 }
  0x8d   : > { %5701 = vmatprep.subr.bf16.mxu0 %v9193_v1 }
  0x8e   : > { %5604 = vmatpush3.bf16.msra.mxu1 %v6294_v51 }
  0x8f   : > { %5422 = vmatmul.mubr.bf16.gmra.mrb[48].mxu1 %v6574_v21  ;;  %5518 = vmatmul.mubr.bf16.gmra.mrb[48].mxu0 %v6546_v15 }
  0x90   : > { %5425 = vmatprep.mubr.msk.bf16.mxu1 %vm6415_vm0, %v9193_v1  ;;  %5521 = vmatprep.mubr.msk.bf16.mxu0 %vm6415_vm0, %v9193_v1 }
  0x91   : > { %5702 = vmatpush3.bf16.msra.mxu0 %v6293_v52  ;;  %5605 = vmatprep.subr.bf16.mxu1 %v9193_v1 }
  0x92   : > { %5703 = vmatprep.subr.bf16.mxu0 %v9193_v1  ;;  %5606 = vmatpush3.bf16.msra.mxu1 %v6296_v53 }
  0x93   : > { %5607 = vmatprep.subr.bf16.mxu1 %v9193_v1 }
  0x95   : > { %5704 = vmatpush3.bf16.msra.mxu0 %v6295_v54 }
  0x96   : > { %5705 = vmatprep.subr.bf16.mxu0 %v9193_v1  ;;  %5608 = vmatpush3.bf16.msra.mxu1 %v6298_v55 }
  0x97   : > { %5426 = vmatmul.mubr.bf16.gmra.mrb[52].mxu1 %v6599_v26  ;;  %5522 = vmatmul.mubr.bf16.gmra.mrb[52].mxu0 %v6574_v21 }
  0x98   : > { %5429 = vmatprep.mubr.msk.bf16.mxu1 %vm6415_vm0, %v9193_v1  ;;  %5525 = vmatprep.mubr.msk.bf16.mxu0 %vm6415_vm0, %v9193_v1 }
  0x99   : > { %5706 = vmatpush3.bf16.msra.mxu0 %v6297_v56  ;;  %5609 = vmatprep.subr.bf16.mxu1 %v9193_v1 }
  0x9a   : > { %5707 = vmatprep.subr.bf16.mxu0 %v9193_v1  ;;  %5610 = vmatpush3.bf16.msra.mxu1 %v6300_v57 }
  0x9b   : > { %5611 = vmatprep.subr.bf16.mxu1 %v9193_v1 }
  0x9d   : > { %5708 = vmatpush3.bf16.msra.mxu0 %v6299_v58 }
  0x9e   : > { %5709 = vmatprep.subr.bf16.mxu0 %v9193_v1  ;;  %5612 = vmatpush3.bf16.msra.mxu1 %v6302_v59 }
  0x9f   : > { %5430 = vmatmul.mubr.bf16.gmra.mrb[56].mxu1 %v6630_v33  ;;  %5526 = vmatmul.mubr.bf16.gmra.mrb[56].mxu0 %v6599_v26 }
  0xa0   : > { %5433 = vmatprep.mubr.msk.bf16.mxu1 %vm6415_vm0, %v9193_v1  ;;  %5529 = vmatprep.mubr.msk.bf16.mxu0 %vm6415_vm0, %v9193_v1 }
  0xa1   : > { %5710 = vmatpush3.bf16.msra.mxu0 %v6301_v60  ;;  %5797 = vmatprep.subr.bf16.mxu1 %v9193_v1 }
  0xa2   : > { %5711 = vmatprep.subr.bf16.mxu0 %v9193_v1 }
  0xa5   : > { %5712 = vmatpush3.bf16.msra.mxu0 %v6303_v61 }
  0xa6   : > { %5897 = vmatprep.subr.bf16.mxu0 %v9193_v1 }
  0xa7   : > { %5434 = vmatmul.mubr.bf16.gmra.mrb[60].mxu1 %v6646_v35  ;;  %5530 = vmatmul.mubr.bf16.gmra.mrb[60].mxu0 %v6630_v33 }
  0xa8   : > { %5437 = vmatprep.mubr.msk.bf16.mxu1 %vm6415_vm0, %v9193_v1  ;;  %5533 = vmatprep.mubr.msk.bf16.mxu0 %vm6415_vm0, %v9193_v1 }
  0xaf   : > { %5438 = vmatmul.mubr.bf16.gmra.mrb[64].mxu1 %v6658_v37  ;;  %5534 = vmatmul.mubr.bf16.gmra.mrb[64].mxu0 %v6646_v35 }
  0xb0   : > { %5441 = vmatprep.mubr.msk.bf16.mxu1 %vm6415_vm0, %v9193_v1  ;;  %5537 = vmatprep.mubr.msk.bf16.mxu0 %vm6415_vm0, %v9193_v1 }
  0xb7   : > { %5442 = vmatmul.mubr.bf16.gmra.mrb[68].mxu1 %v6670_v39  ;;  %5538 = vmatmul.mubr.bf16.gmra.mrb[68].mxu0 %v6658_v37 }
  0xb8   : > { %5445 = vmatprep.mubr.msk.bf16.mxu1 %vm6415_vm0, %v9193_v1  ;;  %5541 = vmatprep.mubr.msk.bf16.mxu0 %vm6415_vm0, %v9193_v1 }
  0xbf   : > { %5446 = vmatmul.mubr.bf16.gmra.mrb[72].mxu1 %v6682_v41  ;;  %5542 = vmatmul.mubr.bf16.gmra.mrb[72].mxu0 %v6670_v39 }
  0xc0   : > { %5449 = vmatprep.mubr.msk.bf16.mxu1 %vm6415_vm0, %v9193_v1  ;;  %5545 = vmatprep.mubr.msk.bf16.mxu0 %vm6415_vm0, %v9193_v1 }
  0xc7   : > { %5450 = vmatmul.mubr.bf16.gmra.mrb[76].mxu1 %v6694_v43  ;;  %5546 = vmatmul.mubr.bf16.gmra.mrb[76].mxu0 %v6682_v41 }
  0xc8   : > { %5453 = vmatprep.mubr.msk.bf16.mxu1 %vm6415_vm0, %v9193_v1  ;;  %5549 = vmatprep.mubr.msk.bf16.mxu0 %vm6415_vm0, %v9193_v1 }
  0xcf   : > { %5454 = vmatmul.mubr.bf16.gmra.mrb[80].mxu1 %v6706_v45  ;;  %5550 = vmatmul.mubr.bf16.gmra.mrb[80].mxu0 %v6694_v43 }
  0xd0   : > { %5457 = vmatprep.mubr.msk.bf16.mxu1 %vm6415_vm0, %v9193_v1  ;;  %5553 = vmatprep.mubr.msk.bf16.mxu0 %vm6415_vm0, %v9193_v1 }
  0xd7   : > { %5458 = vmatmul.mubr.bf16.gmra.mrb[84].mxu1 %v6523_v10  ;;  %5554 = vmatmul.mubr.bf16.gmra.mrb[84].mxu0 %v6706_v45 }
  0xd8   : > { %5461 = vmatprep.mubr.msk.bf16.mxu1 %vm6415_vm0, %v9193_v1  ;;  %5557 = vmatprep.mubr.msk.bf16.mxu0 %vm6415_vm0, %v9193_v1 }
  0xdf   : > { %5462 = vmatmul.mubr.bf16.gmra.mrb[88].mxu1 %v6551_v16  ;;  %5558 = vmatmul.mubr.bf16.gmra.mrb[88].mxu0 %v6523_v10 }
  0xe0   : > { %5465 = vmatprep.mubr.msk.bf16.mxu1 %vm6415_vm0, %v9193_v1  ;;  %5561 = vmatprep.mubr.msk.bf16.mxu0 %vm6415_vm0, %v9193_v1 }
  0xe7   : > { %5466 = vmatmul.mubr.bf16.gmra.mrb[92].mxu1 %v6579_v22  ;;  %5562 = vmatmul.mubr.bf16.gmra.mrb[92].mxu0 %v6551_v16 }
  0xe8   : > { %5469 = vmatprep.mubr.msk.bf16.mxu1 %vm6415_vm0, %v9193_v1  ;;  %5565 = vmatprep.mubr.msk.bf16.mxu0 %vm6415_vm0, %v9193_v1 }
  0xef   : > { %5470 = vmatmul.mubr.bf16.gmra.mrb[96].mxu1 %v6602_v27  ;;  %5566 = vmatmul.mubr.bf16.gmra.mrb[96].mxu0 %v6579_v22 }
  0xf0   : > { %5473 = vmatprep.mubr.msk.bf16.mxu1 %vm6415_vm0, %v9193_v1  ;;  %5569 = vmatprep.mubr.msk.bf16.mxu0 %vm6415_vm0, %v9193_v1 }
  0xf7   : > { %5474 = vmatmul.mubr.bf16.gmra.mrb[100].mxu1 %v6633_v34  ;;  %5570 = vmatmul.mubr.bf16.gmra.mrb[100].mxu0 %v6602_v27 }
  0xf8   : > { %5477 = vmatprep.mubr.msk.bf16.mxu1 %vm6415_vm0, %v9193_v1  ;;  %5573 = vmatprep.mubr.msk.bf16.mxu0 %vm6415_vm0, %v9193_v1 }
  0xff   : > { %5478 = vmatmul.mubr.bf16.gmra.mrb[104].mxu1 %v6649_v36  ;;  %5574 = vmatmul.mubr.bf16.gmra.mrb[104].mxu0 %v6633_v34 }
 0x100   : > { %5481 = vmatprep.mubr.msk.bf16.mxu1 %vm6415_vm0, %v9193_v1  ;;  %5577 = vmatprep.mubr.msk.bf16.mxu0 %vm6415_vm0, %v9193_v1 }
 0x102   : > { %v6874_v63 = vpop.f32.mrb[0].mxu0  ;;  %v6876_v0 = vpop.f32.mrb[0].mxu1 }
 0x103   : > { %9210 = vst [vmem:[#allocation2_spill] sm:$0xff] %v6874_v63  ;;  %v5315_v3 = vpop.f32.mrb[1].mxu0  ;;  %v9192_v4 = vrot.slane %v6876_v0, 1  ;;  %v5359_v5 = vpop.f32.mrb[1].mxu1 }
 0x104   : > { %v6881_v6 = vpop.f32.mrb[2].mxu0  ;;  %v664_v7 = vpop.f32.mrb[2].mxu1 }
 0x105   : > { %v5316_v8 = vpop.f32.mrb[3].mxu0  ;;  %v763_v10 = vrot.slane %v664_v7, 1  ;;  %v5360_v11 = vpop.f32.mrb[3].mxu1  ;;  %v741_v16 = vrot.slane %v6881_v6, 1 }
 0x107   : > { %5482 = vmatmul.mubr.bf16.gmra.mrb[108].mxu1 %v6661_v38  ;;  %5578 = vmatmul.mubr.bf16.gmra.mrb[108].mxu0 %v6649_v36  ;;  %v6890_v12 = vsel %vm784_vm1, %v9192_v4, %v763_v10 }
 0x108   : > { %5485 = vmatprep.mubr.msk.bf16.mxu1 %vm6415_vm0, %v9193_v1  ;;  %5581 = vmatprep.mubr.msk.bf16.mxu0 %vm6415_vm0, %v9193_v1 }
 0x10a   : > { %v581_v13 = vpop.f32.mrb[4].mxu0  ;;  %v669_v14 = vpop.f32.mrb[4].mxu1 }
 0x10b   : > { %v742_v17 = vrot.slane %v581_v13, 1  ;;  %v764_v18 = vrot.slane %v669_v14, 1  ;;  %v5319_v19 = vpop.f32.mrb[5].mxu0  ;;  %v5363_v20 = vpop.f32.mrb[5].mxu1 }
 0x10c   : > { %v584_v22 = vpop.f32.mrb[6].mxu0  ;;  %v672_v23 = vpop.f32.mrb[6].mxu1 }
 0x10d   : > { %v743_v24 = vrot.slane %v584_v22, 1  ;;  %v5320_v25 = vpop.f32.mrb[7].mxu0  ;;  %v765_v27 = vrot.slane %v672_v23, 1  ;;  %v5364_v28 = vpop.f32.mrb[7].mxu1  ;;  %v6901_v29 = vsel %vm784_vm1, %v741_v16, %v742_v17  ;;  %v6905_v30 = vsel %vm784_vm1, %v763_v10, %v764_v18 }
 0x10f   : > { %5486 = vmatmul.mubr.bf16.gmra.mrb[112].mxu1 %v6673_v40  ;;  %5582 = vmatmul.mubr.bf16.gmra.mrb[112].mxu0 %v6661_v38  ;;  %v6911_v31 = vsel %vm784_vm1, %v742_v17, %v743_v24  ;;  %v6915_v32 = vsel %vm784_vm1, %v764_v18, %v765_v27 }
 0x110   : > { %5489 = vmatprep.mubr.msk.bf16.mxu1 %vm6415_vm0, %v9193_v1  ;;  %5585 = vmatprep.mubr.msk.bf16.mxu0 %vm6415_vm0, %v9193_v1 }
 0x112   : > { %v589_v34 = vpop.f32.mrb[8].mxu0  ;;  %v677_v36 = vpop.f32.mrb[8].mxu1 }
 0x113   : > { %v744_v46 = vrot.slane %v589_v34, 1  ;;  %v766_v47 = vrot.slane %v677_v36, 1  ;;  %v5323_v48 = vpop.f32.mrb[9].mxu0  ;;  %v5367_v38 = vpop.f32.mrb[9].mxu1 }
 0x114   : > { %v592_v49 = vpop.f32.mrb[10].mxu0  ;;  %v680_v50 = vpop.f32.mrb[10].mxu1  ;;  %v6304_v48 = vld [vmem:[%s9186_s1 + $0x140] sm:$0xff]  }
 0x115   : > { %v745_v51 = vrot.slane %v592_v49, 1  ;;  %v5324_v52 = vpop.f32.mrb[11].mxu0  ;;  %v767_v53 = vrot.slane %v680_v50, 1  ;;  %v5368_v54 = vpop.f32.mrb[11].mxu1  ;;  %v6923_v55 = vsel %vm784_vm1, %v743_v24, %v744_v46  ;;  %v6927_v56 = vsel %vm784_vm1, %v765_v27, %v766_v47 }
 0x117   : > { %5490 = vmatmul.mubr.bf16.gmra.mrb[116].mxu1 %v6685_v42  ;;  %5586 = vmatmul.mubr.bf16.gmra.mrb[116].mxu0 %v6673_v40  ;;  %v6933_v57 = vsel %vm784_vm1, %v744_v46, %v745_v51  ;;  %v6937_v58 = vsel %vm784_vm1, %v766_v47, %v767_v53 }
 0x118   : > { %5493 = vmatprep.mubr.msk.bf16.mxu1 %vm6415_vm0, %v9193_v1  ;;  %5589 = vmatprep.mubr.msk.bf16.mxu0 %vm6415_vm0, %v9193_v1 }
 0x11a   : > { %v597_v59 = vpop.f32.mrb[12].mxu0  ;;  %v685_v60 = vpop.f32.mrb[12].mxu1 }
 0x11b   : > { %v746_v61 = vrot.slane %v597_v59, 1  ;;  %v768_v62 = vrot.slane %v685_v60, 1  ;;  %v5327_v3 = vpop.f32.mrb[13].mxu0  ;;  %v5371_v40 = vpop.f32.mrb[13].mxu1 }
 0x11c   : > { %v600_v5 = vpop.f32.mrb[14].mxu0  ;;  %v688_v7 = vpop.f32.mrb[14].mxu1  ;;  %v6305_v40 = vld [vmem:[%s9186_s1 + $0x180] sm:$0xff]  }
 0x11d   : > { %v747_v8 = vrot.slane %v600_v5, 1  ;;  %v5328_v10 = vpop.f32.mrb[15].mxu0  ;;  %v769_v11 = vrot.slane %v688_v7, 1  ;;  %v5372_v13 = vpop.f32.mrb[15].mxu1  ;;  %v6945_v14 = vsel %vm784_vm1, %v745_v51, %v746_v61  ;;  %v6949_v17 = vsel %vm784_vm1, %v767_v53, %v768_v62 }
 0x11f   : > { %5494 = vmatmul.mubr.bf16.gmra.mrb[120].mxu1 %v6697_v44  ;;  %5590 = vmatmul.mubr.bf16.gmra.mrb[120].mxu0 %v6685_v42  ;;  %v6955_v18 = vsel %vm784_vm1, %v746_v61, %v747_v8  ;;  %v6959_v19 = vsel %vm784_vm1, %v768_v62, %v769_v11 }
 0x120   : > { %5593 = vmatprep.mubr.msk.bf16.mxu0 %vm6415_vm0, %v9193_v1  ;;  %5613 = vmatprep.mubr.msk.bf16.mxu1 %vm6415_vm0, %v9193_v1 }
 0x122   : > { %v605_v20 = vpop.f32.mrb[16].mxu0  ;;  %v693_v22 = vpop.f32.mrb[16].mxu1 }
 0x123   : > { %v748_v23 = vrot.slane %v605_v20, 1  ;;  %v770_v24 = vrot.slane %v693_v22, 1  ;;  %v5331_v25 = vpop.f32.mrb[17].mxu0  ;;  %v5375_v42 = vpop.f32.mrb[17].mxu1  ;;  %v6308_v20 = vld [vmem:[%s9186_s1 + $0x150] sm:$0xff]  }
 0x124   : > { %v608_v27 = vpop.f32.mrb[18].mxu0  ;;  %v696_v28 = vpop.f32.mrb[18].mxu1  ;;  %v6310_v42 = vld [vmem:[%s9186_s1 + $0x158] sm:$0xff]  }
 0x125   : > { %v749_v34 = vrot.slane %v608_v27, 1  ;;  %v5332_v36 = vpop.f32.mrb[19].mxu0  ;;  %v771_v46 = vrot.slane %v696_v28, 1  ;;  %v5376_v47 = vpop.f32.mrb[19].mxu1  ;;  %v6970_v38 = vsel %vm784_vm1, %v747_v8, %v748_v23  ;;  %v6974_v49 = vsel %vm784_vm1, %v769_v11, %v770_v24 }
 0x127   : > { %5594 = vmatmul.mubr.bf16.gmra.mrb[124].mxu0 %v6697_v44  ;;  %5614 = vmatmul.mubr.bf16.vlgmr.msra.gmra.mrb[124].mxu1 %v6520_v9  ;;  %v6980_v50 = vsel %vm784_vm1, %v748_v23, %v749_v34  ;;  %v6984_v51 = vsel %vm784_vm1, %v770_v24, %v771_v46  ;;  %v6306_v44 = vld [vmem:[%s9186_s1 + $0x148] sm:$0xff]  }
 0x128   : > { %5617 = vmatprep.mubr.msk.bf16.mxu1 %vm6415_vm0, %v9193_v1  ;;  %5713 = vmatprep.mubr.msk.bf16.mxu0 %vm6415_vm0, %v9193_v1  ;;  %v6307_v24 = vld [vmem:[%s9186_s1 + $0x188] sm:$0xff]  }
 0x129   : > { %5798 = vmatpush3.bf16.msra.mxu1 %v6304_v48 }
 0x12a   : > { %v613_v52 = vpop.f32.mrb[20].mxu0  ;;  %v701_v53 = vpop.f32.mrb[20].mxu1  ;;  %5799 = vmatprep.subr.bf16.mxu1 %v9193_v1 }
 0x12b   : > { %v750_v54 = vrot.slane %v613_v52, 1  ;;  %v772_v59 = vrot.slane %v701_v53, 1  ;;  %v5335_v60 = vpop.f32.mrb[21].mxu0  ;;  %v5379_v61 = vpop.f32.mrb[21].mxu1 }
 0x12c   : > { %v616_v62 = vpop.f32.mrb[22].mxu0  ;;  %v704_v3 = vpop.f32.mrb[22].mxu1  ;;  %v6312_v61 = vld [vmem:[%s9186_s1 + $0x160] sm:$0xff]  }
 0x12d   : > { %v751_v5 = vrot.slane %v616_v62, 1  ;;  %v5336_v7 = vpop.f32.mrb[23].mxu0  ;;  %v773_v8 = vrot.slane %v704_v3, 1  ;;  %v5380_v10 = vpop.f32.mrb[23].mxu1  ;;  %5800 = vmatpush3.bf16.msra.mxu1 %v6306_v44  ;;  %v6999_v11 = vsel %vm784_vm1, %v749_v34, %v750_v54  ;;  %v7003_v13 = vsel %vm784_vm1, %v771_v46, %v772_v59 }
 0x12e   : > { %5801 = vmatprep.subr.bf16.mxu1 %v9193_v1  ;;  %v6314_v7 = vld [vmem:[%s9186_s1 + $0x168] sm:$0xff]  }
 0x12f   : > { %5618 = vmatmul.mubr.bf16.gmra.mrb[128].mxu1 %v6546_v15  ;;  %5714 = vmatmul.mubr.bf16.vlgmr.msra.gmra.mrb[128].mxu0 %v6520_v9  ;;  %v7013_v22 = vsel %vm784_vm1, %v750_v54, %v751_v5  ;;  %v7017_v23 = vsel %vm784_vm1, %v772_v59, %v773_v8  ;;  %v6309_v54 = vld [vmem:[%s9186_s1 + $0x190] sm:$0xff]  }
 0x130   : > { %5898 = vmatpush3.bf16.msra.mxu0 %v6305_v40  ;;  %5621 = vmatprep.mubr.msk.bf16.mxu1 %vm6415_vm0, %v9193_v1  ;;  %v6311_v40 = vld [vmem:[%s9186_s1 + $0x198] sm:$0xff]  }
 0x131   : > { %5717 = vmatprep.mubr.msk.bf16.mxu0 %vm6415_vm0, %v9193_v1  ;;  %5899 = vmatprep.subr.bf16.mxu0 %v9193_v1 }
 0x132   : > { %v621_v9 = vpop.f32.mrb[24].mxu0  ;;  %v709_v25 = vpop.f32.mrb[24].mxu1  ;;  %5802 = vmatpush3.bf16.msra.mxu1 %v6308_v20 }
 0x133   : > { %v752_v27 = vrot.slane %v621_v9, 1  ;;  %v774_v28 = vrot.slane %v709_v25, 1  ;;  %v5339_v34 = vpop.f32.mrb[25].mxu0  ;;  %v5383_v36 = vpop.f32.mrb[25].mxu1  ;;  %5803 = vmatprep.subr.bf16.mxu1 %v9193_v1 }
 0x134   : > { %v624_v46 = vpop.f32.mrb[26].mxu0  ;;  %v712_v47 = vpop.f32.mrb[26].mxu1  ;;  %5900 = vmatpush3.bf16.msra.mxu0 %v6307_v24 }
 0x135   : > { %v753_v48 = vrot.slane %v624_v46, 1  ;;  %v5340_v44 = vpop.f32.mrb[27].mxu0  ;;  %v775_v52 = vrot.slane %v712_v47, 1  ;;  %v5384_v53 = vpop.f32.mrb[27].mxu1  ;;  %5901 = vmatprep.subr.bf16.mxu0 %v9193_v1  ;;  %v7037_v59 = vsel %vm784_vm1, %v751_v5, %v752_v27  ;;  %v7041_v60 = vsel %vm784_vm1, %v773_v8, %v774_v28  ;;  %v6313_v46 = vld [vmem:[%s9186_s1 + $0x1a0] sm:$0xff]  }
 0x136   : > { %5804 = vmatpush3.bf16.msra.mxu1 %v6310_v42  ;;  %v6316_v44 = vld [vmem:[%s9186_s1 + $0x170] sm:$0xff]  }
 0x137   : > { %5622 = vmatmul.mubr.bf16.gmra.mrb[132].mxu1 %v6574_v21  ;;  %5718 = vmatmul.mubr.bf16.gmra.mrb[132].mxu0 %v6546_v15  ;;  %v7050_v62 = vsel %vm784_vm1, %v752_v27, %v753_v48  ;;  %v7054_v3 = vsel %vm784_vm1, %v774_v28, %v775_v52 }
 0x138   : > { %5625 = vmatprep.mubr.msk.bf16.mxu1 %vm6415_vm0, %v9193_v1  ;;  %5721 = vmatprep.mubr.msk.bf16.mxu0 %vm6415_vm0, %v9193_v1 }
 0x139   : > { %5902 = vmatpush3.bf16.msra.mxu0 %v6309_v54  ;;  %5805 = vmatprep.subr.bf16.mxu1 %v9193_v1 }
 0x13a   : > { %v629_v15 = vpop.f32.mrb[28].mxu0  ;;  %v717_v5 = vpop.f32.mrb[28].mxu1  ;;  %5903 = vmatprep.subr.bf16.mxu0 %v9193_v1  ;;  %5806 = vmatpush3.bf16.msra.mxu1 %v6312_v61  ;;  %v6318_v61 = vld [vmem:[%s9186_s1 + $0x178] sm:$0xff]  }
 0x13b   : > { %v754_v8 = vrot.slane %v629_v15, 1  ;;  %v776_v10 = vrot.slane %v717_v5, 1  ;;  %v5343_v20 = vpop.f32.mrb[29].mxu0  ;;  %v5387_v24 = vpop.f32.mrb[29].mxu1  ;;  %5807 = vmatprep.subr.bf16.mxu1 %v9193_v1 }
 0x13c   : > { %v632_v9 = vpop.f32.mrb[30].mxu0  ;;  %v720_v25 = vpop.f32.mrb[30].mxu1 }
 0x13d   : > { %v755_v42 = vrot.slane %v632_v9, 1  ;;  %v5344_v27 = vpop.f32.mrb[31].mxu0  ;;  %v777_v28 = vrot.slane %v720_v25, 1  ;;  %v5388_v34 = vpop.f32.mrb[31].mxu1  ;;  %5904 = vmatpush3.bf16.msra.mxu0 %v6311_v40  ;;  %v7071_v36 = vsel %vm784_vm1, %v753_v48, %v754_v8  ;;  %v7078_v47 = vsel %vm784_vm1, %v775_v52, %v776_v10  ;;  %v6315_v52 = vld [vmem:[%s9186_s1 + $0x1a8] sm:$0xff]  }
 0x13e   : > { %5905 = vmatprep.subr.bf16.mxu0 %v9193_v1  ;;  %5808 = vmatpush3.bf16.msra.mxu1 %v6314_v7  ;;  %v6317_v34 = vld [vmem:[%s9186_s1 + $0x1b0] sm:$0xff]  }
 0x13f   : > { %5626 = vmatmul.mubr.bf16.gmra.mrb[136].mxu1 %v6599_v26  ;;  %5722 = vmatmul.mubr.bf16.gmra.mrb[136].mxu0 %v6574_v21  ;;  %v7088_v48 = vsel %vm784_vm1, %v754_v8, %v755_v42  ;;  %v7092_v53 = vsel %vm784_vm1, %v776_v10, %v777_v28 }
 0x140   : > { %5629 = vmatprep.mubr.msk.bf16.mxu1 %vm6415_vm0, %v9193_v1  ;;  %5725 = vmatprep.mubr.msk.bf16.mxu0 %vm6415_vm0, %v9193_v1 }
 0x141   : > { %5906 = vmatpush3.bf16.msra.mxu0 %v6313_v46  ;;  %5809 = vmatprep.subr.bf16.mxu1 %v9193_v1 }
 0x142   : > { %v637_v21 = vpop.f32.mrb[32].mxu0  ;;  %v725_v54 = vpop.f32.mrb[32].mxu1  ;;  %5907 = vmatprep.subr.bf16.mxu0 %v9193_v1  ;;  %5810 = vmatpush3.bf16.msra.mxu1 %v6316_v44 }
 0x143   : > { %v756_v40 = vrot.slane %v637_v21, 1  ;;  %v778_v15 = vrot.slane %v725_v54, 1  ;;  %v5347_v5 = vpop.f32.mrb[33].mxu0  ;;  %v5391_v7 = vpop.f32.mrb[33].mxu1  ;;  %5811 = vmatprep.subr.bf16.mxu1 %v9193_v1 }
 0x144   : > { %v640_v8 = vpop.f32.mrb[34].mxu0  ;;  %v728_v10 = vpop.f32.mrb[34].mxu1 }
 0x145   : > { %v757_v20 = vrot.slane %v640_v8, 1  ;;  %v5348_v24 = vpop.f32.mrb[35].mxu0  ;;  %v779_v9 = vrot.slane %v728_v10, 1  ;;  %v5392_v25 = vpop.f32.mrb[35].mxu1  ;;  %v7109_v27 = vsel %vm784_vm1, %v755_v42, %v756_v40  ;;  %5908 = vmatpush3.bf16.msra.mxu0 %v6315_v52  ;;  %v7116_v46 = vsel %vm784_vm1, %v777_v28, %v778_v15  ;;  %v6319_v28 = vld [vmem:[%s9186_s1 + $0x1b8] sm:$0xff]  }
 0x146   : > { %5909 = vmatprep.subr.bf16.mxu0 %v9193_v1  ;;  %5812 = vmatpush3.bf16.msra.mxu1 %v6318_v61 }
 0x147   : > { %5630 = vmatmul.mubr.bf16.gmra.mrb[140].mxu1 %v6630_v33  ;;  %5726 = vmatmul.mubr.bf16.gmra.mrb[140].mxu0 %v6599_v26  ;;  %v7123_v42 = vsel %vm784_vm1, %v756_v40, %v757_v20  ;;  %v7127_v44 = vsel %vm784_vm1, %v778_v15, %v779_v9 }
 0x148   : > { %5633 = vmatprep.mubr.msk.bf16.mxu1 %vm6415_vm0, %v9193_v1  ;;  %5729 = vmatprep.mubr.msk.bf16.mxu0 %vm6415_vm0, %v9193_v1 }
 0x149   : > { %5910 = vmatpush3.bf16.msra.mxu0 %v6317_v34  ;;  %5997 = vmatprep.subr.bf16.mxu1 %v9193_v1 }
 0x14a   : > { %v645_v26 = vpop.f32.mrb[36].mxu0  ;;  %v733_v52 = vpop.f32.mrb[36].mxu1  ;;  %5911 = vmatprep.subr.bf16.mxu0 %v9193_v1 }
 0x14b   : > { %v758_v21 = vrot.slane %v645_v26, 1  ;;  %v780_v54 = vrot.slane %v733_v52, 1  ;;  %v5351_v61 = vpop.f32.mrb[37].mxu0  ;;  %v5395_v40 = vpop.f32.mrb[37].mxu1 }
 0x14c   : > { %v648_v15 = vpop.f32.mrb[38].mxu0  ;;  %v7138_v5 = vpop.f32.mrb[38].mxu1 }
 0x14d   : > { %9211 = vst [vmem:[#allocation3_spill] sm:$0xff] %v7138_v5  ;;  %v759_v7 = vrot.slane %v648_v15, 1  ;;  %v9191_v8 = vrot.slane %v7138_v5, 1  ;;  %v5352_v10 = vpop.f32.mrb[39].mxu0  ;;  %v5396_v24 = vpop.f32.mrb[39].mxu1  ;;  %v7143_v25 = vsel %vm784_vm1, %v757_v20, %v758_v21  ;;  %5912 = vmatpush3.bf16.msra.mxu0 %v6319_v28  ;;  %v7147_v34 = vsel %vm784_vm1, %v779_v9, %v780_v54 }
 0x14e   : > { %6097 = vmatprep.subr.bf16.mxu0 %v9193_v1  ;;  %v9196_v28 = vrot.slane %v6874_v63, 1 }
 0x14f   : > { %5634 = vmatmul.mubr.bf16.gmra.mrb[144].mxu1 %v6646_v35  ;;  %5730 = vmatmul.mubr.bf16.gmra.mrb[144].mxu0 %v6630_v33  ;;  %v7154_v26 = vsel %vm784_vm1, %v758_v21, %v759_v7  ;;  %v7160_v20 = vsel %vm784_vm1, %v780_v54, %v9191_v8 }
 0x150   : > { %5637 = vmatprep.mubr.msk.bf16.mxu1 %vm6415_vm0, %v9193_v1  ;;  %5733 = vmatprep.mubr.msk.bf16.mxu0 %vm6415_vm0, %v9193_v1  ;;  %v825_v33 = vsel %vm784_vm1, %v9196_v28, %v741_v16 }
 0x152   : > { %v653_v9 = vpop.f32.mrb[40].mxu0  ;;  %v909_v52 = vpop.f32.mrb[40].mxu1 }
 0x153   : > { %v760_v21 = vrot.slane %v653_v9, 1  ;;  %v910_v54 = vadd.f32 %v909_v52, %v825_v33  ;;  %v5355_v61 = vpop.f32.mrb[41].mxu0  ;;  %v5415_v40 = vpop.f32.mrb[41].mxu1  ;;  %v9212_v9 = vrot.slane %v6876_v0, 1 }
 0x154   : > { %v656_v15 = vpop.f32.mrb[42].mxu0  ;;  %v912_v10 = vpop.f32.mrb[42].mxu1 }
 0x155   : > { %v761_v24 = vrot.slane %v656_v15, 1  ;;  %v913_v8 = vadd.f32 %v912_v10, %v6901_v29  ;;  %v5356_v4 = vpop.f32.mrb[43].mxu0  ;;  %v5416_v1 = vpop.f32.mrb[43].mxu1  ;;  %v7176_v6 = vsel %vm784_vm1, %v759_v7, %v760_v21 }
 0x156   : > { %v9213_v4 = vmov 0.0  }
 0x157   : > { %5638 = vmatmul.mubr.bf16.gmra.mrb[148].mxu1 %v6658_v37  ;;  %5734 = vmatmul.mubr.bf16.gmra.mrb[148].mxu0 %v6646_v35  ;;  %v7182_v16 = vsel %vm784_vm1, %v760_v21, %v761_v24  ;;  %v7188_v33 = vsel %vm784_vm1, %v761_v24, %v9212_v9 }
 0x158   : > { %5641 = vmatprep.mubr.msk.bf16.mxu1 %vm6415_vm0, %v9213_v4  ;;  %5737 = vmatprep.mubr.msk.bf16.mxu0 %vm6415_vm0, %v9213_v4 }
 0x15a   : > { %v917_v1 = vpop.f32.mrb[44].mxu1  ;;  %v7194_v29 = vpop.f32.mrb[44].mxu0 }
 0x15b   : > { %9214 = vst [vmem:[#allocation4_spill] sm:$0xff] %v7194_v29  ;;  %v918_v35 = vadd.f32 %v917_v1, %v6911_v31  ;;  %v5419_v7 = vpop.f32.mrb[45].mxu1  ;;  %v5515_v52 = vpop.f32.mrb[45].mxu0  ;;  %v9195_v0 = vrot.slane %v7194_v29, 2 }
 0x15c   : > { %v920_v21 = vpop.f32.mrb[46].mxu1  ;;  %v1177_v61 = vpop.f32.mrb[46].mxu0 }
 0x15d   : > { %v921_v40 = vadd.f32 %v920_v21, %v6923_v55  ;;  %v1342_v15 = vrot.slane %v1177_v61, 2  ;;  %v5516_v10 = vpop.f32.mrb[47].mxu0  ;;  %v5420_v24 = vpop.f32.mrb[47].mxu1 }
 0x15f   : > { %v1424_v9 = vsel %vm1383_vm2, %v9195_v0, %v1342_v15  ;;  %5642 = vmatmul.mubr.bf16.gmra.mrb[152].mxu1 %v6670_v39  ;;  %5738 = vmatmul.mubr.bf16.gmra.mrb[152].mxu0 %v6658_v37 }
 0x160   : > { %5645 = vmatprep.mubr.msk.bf16.mxu1 %vm6415_vm0, %v9213_v4  ;;  %5741 = vmatprep.mubr.msk.bf16.mxu0 %vm6415_vm0, %v9213_v4  ;;  %v7210_v31 = vadd.f32 %v1424_v9, %v910_v54 }
 0x162   : > { %v925_v55 = vpop.f32.mrb[48].mxu1  ;;  %v1182_v1 = vpop.f32.mrb[48].mxu0 }
 0x163   : > { %v926_v7 = vadd.f32 %v925_v55, %v6933_v57  ;;  %v1343_v52 = vrot.slane %v1182_v1, 2  ;;  %v5423_v21 = vpop.f32.mrb[49].mxu1  ;;  %v5519_v61 = vpop.f32.mrb[49].mxu0 }
 0x164   : > { %v928_v10 = vpop.f32.mrb[50].mxu1  ;;  %v1185_v24 = vpop.f32.mrb[50].mxu0 }
 0x165   : > { %v1423_v37 = vsel %vm1383_vm2, %v1342_v15, %v1343_v52  ;;  %v929_v0 = vadd.f32 %v928_v10, %v6945_v14  ;;  %v1344_v28 = vrot.slane %v1185_v24, 2  ;;  %v5520_v29 = vpop.f32.mrb[51].mxu0  ;;  %v5424_v5 = vpop.f32.mrb[51].mxu1 }
 0x166   : > { %v7216_v63 = vadd.f32 %v1423_v37, %v913_v8 }
 0x167   : > { %v1422_v54 = vsel %vm1383_vm2, %v1343_v52, %v1344_v28  ;;  %5646 = vmatmul.mubr.bf16.gmra.mrb[156].mxu1 %v6682_v41  ;;  %5742 = vmatmul.mubr.bf16.gmra.mrb[156].mxu0 %v6670_v39 }
 0x168   : > { %5649 = vmatprep.mubr.msk.bf16.mxu1 %vm6415_vm0, %v9213_v4  ;;  %5745 = vmatprep.mubr.msk.bf16.mxu0 %vm6415_vm0, %v9213_v4  ;;  %v7226_v57 = vadd.f32 %v1422_v54, %v918_v35 }
 0x16a   : > { %v933_v14 = vpop.f32.mrb[52].mxu1  ;;  %v1190_v29 = vpop.f32.mrb[52].mxu0 }
 0x16b   : > { %v934_v5 = vadd.f32 %v933_v14, %v6955_v18  ;;  %v1345_v8 = vrot.slane %v1190_v29, 2  ;;  %v5427_v15 = vpop.f32.mrb[53].mxu1  ;;  %v5523_v9 = vpop.f32.mrb[53].mxu0 }
 0x16c   : > { %v936_v55 = vpop.f32.mrb[54].mxu1  ;;  %v1193_v1 = vpop.f32.mrb[54].mxu0 }
 0x16d   : > { %v1421_v39 = vsel %vm1383_vm2, %v1344_v28, %v1345_v8  ;;  %v937_v52 = vadd.f32 %v936_v55, %v6970_v38  ;;  %v1346_v21 = vrot.slane %v1193_v1, 2  ;;  %v5524_v61 = vpop.f32.mrb[55].mxu0  ;;  %v5428_v10 = vpop.f32.mrb[55].mxu1 }
 0x16e   : > { %v7232_v24 = vadd.f32 %v1421_v39, %v921_v40 }
 0x16f   : > { %v1420_v35 = vsel %vm1383_vm2, %v1345_v8, %v1346_v21  ;;  %5650 = vmatmul.mubr.bf16.gmra.mrb[160].mxu1 %v6694_v43  ;;  %5746 = vmatmul.mubr.bf16.gmra.mrb[160].mxu0 %v6682_v41 }
 0x170   : > { %5653 = vmatprep.mubr.msk.bf16.mxu1 %vm6415_vm0, %v9213_v4  ;;  %5749 = vmatprep.mubr.msk.bf16.mxu0 %vm6415_vm0, %v9213_v4  ;;  %v7242_v18 = vadd.f32 %v1420_v35, %v926_v7 }
 0x172   : > { %v941_v38 = vpop.f32.mrb[56].mxu1  ;;  %v1198_v28 = vpop.f32.mrb[56].mxu0 }
 0x173   : > { %v942_v40 = vadd.f32 %v941_v38, %v6980_v50  ;;  %v1347_v37 = vrot.slane %v1198_v28, 2  ;;  %v5431_v54 = vpop.f32.mrb[57].mxu1  ;;  %v5527_v14 = vpop.f32.mrb[57].mxu0 }
 0x174   : > { %v944_v29 = vpop.f32.mrb[58].mxu1  ;;  %v1201_v8 = vpop.f32.mrb[58].mxu0 }
 0x175   : > { %v1419_v41 = vsel %vm1383_vm2, %v1346_v21, %v1347_v37  ;;  %v945_v15 = vadd.f32 %v944_v29, %v6999_v11  ;;  %v1348_v9 = vrot.slane %v1201_v8, 2  ;;  %v5528_v55 = vpop.f32.mrb[59].mxu0  ;;  %v5432_v1 = vpop.f32.mrb[59].mxu1 }
 0x176   : > { %v7248_v39 = vadd.f32 %v1419_v41, %v929_v0  ;;  %v6338_v41 = vld [vmem:[%s6492_s6 + $0x58] sm:$0xff]  }
 0x177   : > { %v1418_v7 = vsel %vm1383_vm2, %v1347_v37, %v1348_v9  ;;  %5654 = vmatmul.mubr.bf16.gmra.mrb[164].mxu1 %v6706_v45  ;;  %5750 = vmatmul.mubr.bf16.gmra.mrb[164].mxu0 %v6694_v43 }
 0x178   : > { %5657 = vmatprep.mubr.msk.bf16.mxu1 %vm6415_vm0, %v9213_v4  ;;  %5753 = vmatprep.mubr.msk.bf16.mxu0 %vm6415_vm0, %v9213_v4  ;;  %v7258_v50 = vadd.f32 %v1418_v7, %v934_v5 }
 0x17a   : > { %v949_v11 = vpop.f32.mrb[60].mxu1  ;;  %v1206_v21 = vpop.f32.mrb[60].mxu0 }
 0x17b   : > { %v950_v0 = vadd.f32 %v949_v11, %v7013_v22  ;;  %v1349_v61 = vrot.slane %v1206_v21, 2  ;;  %v5435_v10 = vpop.f32.mrb[61].mxu1  ;;  %v5531_v35 = vpop.f32.mrb[61].mxu0 }
 0x17c   : > { %v952_v38 = vpop.f32.mrb[62].mxu1  ;;  %v1209_v28 = vpop.f32.mrb[62].mxu0 }
 0x17d   : > { %v1417_v43 = vsel %vm1383_vm2, %v1348_v9, %v1349_v61  ;;  %v953_v37 = vadd.f32 %v952_v38, %v7037_v59  ;;  %v1350_v54 = vrot.slane %v1209_v28, 2  ;;  %v5532_v14 = vpop.f32.mrb[63].mxu0  ;;  %v5436_v29 = vpop.f32.mrb[63].mxu1 }
 0x17e   : > { %v7264_v5 = vadd.f32 %v1417_v43, %v937_v52  ;;  %v6339_v43 = vld [vmem:[%s6492_s6 + $0x60] sm:$0xff]  }
 0x17f   : > { %v1416_v8 = vsel %vm1383_vm2, %v1349_v61, %v1350_v54  ;;  %5658 = vmatmul.mubr.bf16.gmra.mrb[168].mxu1 %v6338_v41  ;;  %5754 = vmatmul.mubr.bf16.gmra.mrb[168].mxu0 %v6706_v45 }
 0x180   : > { %5661 = vmatprep.mubr.msk.bf16.mxu1 %vm6415_vm0, %v9213_v4  ;;  %5757 = vmatprep.mubr.msk.bf16.mxu0 %vm6415_vm0, %v9213_v4  ;;  %v7274_v22 = vadd.f32 %v1416_v8, %v942_v40 }
 0x182   : > { %v957_v59 = vpop.f32.mrb[64].mxu1  ;;  %v1214_v9 = vpop.f32.mrb[64].mxu0 }
 0x183   : > { %v958_v52 = vadd.f32 %v957_v59, %v7050_v62  ;;  %v1351_v55 = vrot.slane %v1214_v9, 2  ;;  %v5439_v1 = vpop.f32.mrb[65].mxu1  ;;  %v5535_v7 = vpop.f32.mrb[65].mxu0 }
 0x184   : > { %v960_v11 = vpop.f32.mrb[66].mxu1  ;;  %v1217_v21 = vpop.f32.mrb[66].mxu0 }
 0x185   : > { %v1415_v45 = vsel %vm1383_vm2, %v1350_v54, %v1351_v55  ;;  %v961_v61 = vadd.f32 %v960_v11, %v7071_v36  ;;  %v1352_v10 = vrot.slane %v1217_v21, 2  ;;  %v5536_v35 = vpop.f32.mrb[67].mxu0  ;;  %v5440_v38 = vpop.f32.mrb[67].mxu1 }
 0x186   : > { %v7280_v40 = vadd.f32 %v1415_v45, %v945_v15  ;;  %v6340_v45 = vld [vmem:[%s6492_s6 + $0x68] sm:$0xff]  }
 0x187   : > { %v1414_v28 = vsel %vm1383_vm2, %v1351_v55, %v1352_v10  ;;  %5662 = vmatmul.mubr.bf16.gmra.mrb[172].mxu1 %v6339_v43  ;;  %5758 = vmatmul.mubr.bf16.gmra.mrb[172].mxu0 %v6338_v41 }
 0x188   : > { %5665 = vmatprep.mubr.msk.bf16.mxu1 %vm6415_vm0, %v9213_v4  ;;  %5761 = vmatprep.mubr.msk.bf16.mxu0 %vm6415_vm0, %v9213_v4  ;;  %v7289_v62 = vadd.f32 %v1414_v28, %v950_v0 }
 0x18a   : > { %v965_v36 = vpop.f32.mrb[68].mxu1  ;;  %v1222_v54 = vpop.f32.mrb[68].mxu0 }
 0x18b   : > { %v966_v15 = vadd.f32 %v965_v36, %v7088_v48  ;;  %v1353_v14 = vrot.slane %v1222_v54, 2  ;;  %v5443_v29 = vpop.f32.mrb[69].mxu1  ;;  %v5539_v8 = vpop.f32.mrb[69].mxu0 }
 0x18c   : > { %v968_v59 = vpop.f32.mrb[70].mxu1  ;;  %v1225_v9 = vpop.f32.mrb[70].mxu0 }
 0x18d   : > { %v1413_v41 = vsel %vm1383_vm2, %v1352_v10, %v1353_v14  ;;  %v969_v55 = vadd.f32 %v968_v59, %v7109_v27  ;;  %v1354_v1 = vrot.slane %v1225_v9, 2  ;;  %v5540_v7 = vpop.f32.mrb[71].mxu0  ;;  %v5444_v11 = vpop.f32.mrb[71].mxu1 }
 0x18e   : > { %v7295_v0 = vadd.f32 %v1413_v41, %v953_v37  ;;  %v6341_v41 = vld [vmem:[%s6492_s6 + $0x70] sm:$0xff]  }
 0x18f   : > { %v1412_v21 = vsel %vm1383_vm2, %v1353_v14, %v1354_v1  ;;  %5666 = vmatmul.mubr.bf16.gmra.mrb[176].mxu1 %v6340_v45  ;;  %5762 = vmatmul.mubr.bf16.gmra.mrb[176].mxu0 %v6339_v43 }
 0x190   : > { %5669 = vmatprep.mubr.msk.bf16.mxu1 %vm6415_vm0, %v9213_v4  ;;  %5765 = vmatprep.mubr.msk.bf16.mxu0 %vm6415_vm0, %v9213_v4  ;;  %v7304_v48 = vadd.f32 %v1412_v21, %v958_v52 }
 0x192   : > { %v973_v27 = vpop.f32.mrb[72].mxu1  ;;  %v1230_v10 = vpop.f32.mrb[72].mxu0 }
 0x193   : > { %v974_v37 = vadd.f32 %v973_v27, %v7123_v42  ;;  %v1355_v35 = vrot.slane %v1230_v10, 2  ;;  %v5447_v38 = vpop.f32.mrb[73].mxu1  ;;  %v5543_v28 = vpop.f32.mrb[73].mxu0 }
 0x194   : > { %v976_v36 = vpop.f32.mrb[74].mxu1  ;;  %v1233_v54 = vpop.f32.mrb[74].mxu0 }
 0x195   : > { %v1411_v43 = vsel %vm1383_vm2, %v1354_v1, %v1355_v35  ;;  %v977_v14 = vadd.f32 %v976_v36, %v7143_v25  ;;  %v1356_v29 = vrot.slane %v1233_v54, 2  ;;  %v5544_v8 = vpop.f32.mrb[75].mxu0  ;;  %v5448_v59 = vpop.f32.mrb[75].mxu1 }
 0x196   : > { %v7310_v52 = vadd.f32 %v1411_v43, %v961_v61  ;;  %v6342_v43 = vld [vmem:[%s6492_s6 + $0x78] sm:$0xff]  }
 0x197   : > { %v1410_v9 = vsel %vm1383_vm2, %v1355_v35, %v1356_v29  ;;  %5670 = vmatmul.mubr.bf16.gmra.mrb[180].mxu1 %v6341_v41  ;;  %5766 = vmatmul.mubr.bf16.gmra.mrb[180].mxu0 %v6340_v45 }
 0x198   : > { %5673 = vmatprep.mubr.msk.bf16.mxu1 %vm6415_vm0, %v9213_v4  ;;  %5769 = vmatprep.mubr.msk.bf16.mxu0 %vm6415_vm0, %v9213_v4  ;;  %v7319_v42 = vadd.f32 %v1410_v9, %v966_v15 }
 0x19a   : > { %v981_v25 = vpop.f32.mrb[76].mxu1  ;;  %v1238_v1 = vpop.f32.mrb[76].mxu0 }
 0x19b   : > { %v982_v61 = vadd.f32 %v981_v25, %v7154_v26  ;;  %v1357_v7 = vrot.slane %v1238_v1, 2  ;;  %v5451_v11 = vpop.f32.mrb[77].mxu1  ;;  %v5547_v21 = vpop.f32.mrb[77].mxu0 }
 0x19c   : > { %v984_v27 = vpop.f32.mrb[78].mxu1  ;;  %v1241_v10 = vpop.f32.mrb[78].mxu0 }
 0x19d   : > { %v1409_v45 = vsel %vm1383_vm2, %v1356_v29, %v1357_v7  ;;  %v985_v35 = vadd.f32 %v984_v27, %v7176_v6  ;;  %v1358_v38 = vrot.slane %v1241_v10, 2  ;;  %v5548_v28 = vpop.f32.mrb[79].mxu0  ;;  %v5452_v36 = vpop.f32.mrb[79].mxu1 }
 0x19e   : > { %v7325_v15 = vadd.f32 %v1409_v45, %v969_v55  ;;  %v6343_v45 = vld [vmem:[%s6492_s6 + $0x80] sm:$0xff]  }
 0x19f   : > { %v1408_v54 = vsel %vm1383_vm2, %v1357_v7, %v1358_v38  ;;  %5674 = vmatmul.mubr.bf16.gmra.mrb[184].mxu1 %v6342_v43  ;;  %5770 = vmatmul.mubr.bf16.gmra.mrb[184].mxu0 %v6341_v41 }
 0x1a0   : > { %5677 = vmatprep.mubr.msk.bf16.mxu1 %vm6415_vm0, %v9213_v4  ;;  %5773 = vmatprep.mubr.msk.bf16.mxu0 %vm6415_vm0, %v9213_v4  ;;  %v7334_v26 = vadd.f32 %v1408_v54, %v974_v37 }
 0x1a2   : > { %v989_v6 = vpop.f32.mrb[80].mxu1  ;;  %v1246_v29 = vpop.f32.mrb[80].mxu0 }
 0x1a3   : > { %v990_v55 = vadd.f32 %v989_v6, %v7182_v16  ;;  %v1359_v8 = vrot.slane %v1246_v29, 2  ;;  %v5455_v59 = vpop.f32.mrb[81].mxu1  ;;  %v5551_v9 = vpop.f32.mrb[81].mxu0 }
 0x1a4   : > { %v992_v25 = vpop.f32.mrb[82].mxu1  ;;  %v1249_v1 = vpop.f32.mrb[82].mxu0 }
 0x1a5   : > { %v1407_v41 = vsel %vm1383_vm2, %v1358_v38, %v1359_v8  ;;  %v993_v7 = vadd.f32 %v992_v25, %v7188_v33  ;;  %v1360_v11 = vrot.slane %v1249_v1, 2  ;;  %v5552_v21 = vpop.f32.mrb[83].mxu0  ;;  %v5456_v27 = vpop.f32.mrb[83].mxu1 }
 0x1a6   : > { %v7340_v37 = vadd.f32 %v1407_v41, %v977_v14  ;;  %v6344_v41 = vld [vmem:[%s6492_s6 + $0x88] sm:$0xff]  }
 0x1a7   : > { %v1406_v10 = vsel %vm1383_vm2, %v1359_v8, %v1360_v11  ;;  %5678 = vmatmul.mubr.bf16.gmra.mrb[188].mxu1 %v6343_v45  ;;  %5774 = vmatmul.mubr.bf16.gmra.mrb[188].mxu0 %v6342_v43 }
 0x1a8   : > { %5681 = vmatprep.mubr.msk.bf16.mxu1 %vm6415_vm0, %v9213_v4  ;;  %5777 = vmatprep.mubr.msk.bf16.mxu0 %vm6415_vm0, %v9213_v4  ;;  %v7349_v16 = vadd.f32 %v1406_v10, %v982_v61 }
 0x1aa   : > { %v997_v33 = vpop.f32.mrb[84].mxu1  ;;  %v1254_v38 = vpop.f32.mrb[84].mxu0 }
 0x1ab   : > { %v998_v14 = vadd.f32 %v997_v33, %v6890_v12  ;;  %v1361_v28 = vrot.slane %v1254_v38, 2  ;;  %v5459_v36 = vpop.f32.mrb[85].mxu1  ;;  %v5555_v54 = vpop.f32.mrb[85].mxu0 }
 0x1ac   : > { %v1000_v6 = vpop.f32.mrb[86].mxu1  ;;  %v1257_v29 = vpop.f32.mrb[86].mxu0 }
 0x1ad   : > { %v1405_v43 = vsel %vm1383_vm2, %v1360_v11, %v1361_v28  ;;  %v1001_v8 = vadd.f32 %v1000_v6, %v6905_v30  ;;  %v1362_v59 = vrot.slane %v1257_v29, 2  ;;  %v5556_v9 = vpop.f32.mrb[87].mxu0  ;;  %v5460_v25 = vpop.f32.mrb[87].mxu1 }
 0x1ae   : > { %v7355_v61 = vadd.f32 %v1405_v43, %v985_v35  ;;  %v6345_v43 = vld [vmem:[%s6492_s6 + $0x90] sm:$0xff]  }
 0x1af   : > { %v1404_v1 = vsel %vm1383_vm2, %v1361_v28, %v1362_v59  ;;  %5682 = vmatmul.mubr.bf16.gmra.mrb[192].mxu1 %v6344_v41  ;;  %5778 = vmatmul.mubr.bf16.gmra.mrb[192].mxu0 %v6343_v45 }
 0x1b0   : > { %5685 = vmatprep.mubr.msk.bf16.mxu1 %vm6415_vm0, %v9213_v4  ;;  %5781 = vmatprep.mubr.msk.bf16.mxu0 %vm6415_vm0, %v9213_v4  ;;  %v7364_v12 = vadd.f32 %v1404_v1, %v990_v55 }
 0x1b2   : > { %v1005_v30 = vpop.f32.mrb[88].mxu1  ;;  %v1262_v11 = vpop.f32.mrb[88].mxu0 }
 0x1b3   : > { %v1006_v35 = vadd.f32 %v1005_v30, %v6915_v32  ;;  %v1363_v21 = vrot.slane %v1262_v11, 2  ;;  %v5463_v27 = vpop.f32.mrb[89].mxu1  ;;  %v5559_v10 = vpop.f32.mrb[89].mxu0 }
 0x1b4   : > { %v1008_v33 = vpop.f32.mrb[90].mxu1  ;;  %v1265_v38 = vpop.f32.mrb[90].mxu0 }
 0x1b5   : > { %v1403_v45 = vsel %vm1383_vm2, %v1362_v59, %v1363_v21  ;;  %v1009_v28 = vadd.f32 %v1008_v33, %v6927_v56  ;;  %v1364_v36 = vrot.slane %v1265_v38, 2  ;;  %v5560_v54 = vpop.f32.mrb[91].mxu0  ;;  %v5464_v6 = vpop.f32.mrb[91].mxu1 }
 0x1b6   : > { %v7370_v55 = vadd.f32 %v1403_v45, %v993_v7  ;;  %v6346_v45 = vld [vmem:[%s6492_s6 + $0x98] sm:$0xff]  }
 0x1b7   : > { %v1402_v29 = vsel %vm1383_vm2, %v1363_v21, %v1364_v36  ;;  %5686 = vmatmul.mubr.bf16.gmra.mrb[196].mxu1 %v6345_v43  ;;  %5782 = vmatmul.mubr.bf16.gmra.mrb[196].mxu0 %v6344_v41 }
 0x1b8   : > { %5689 = vmatprep.mubr.msk.bf16.mxu1 %vm6415_vm0, %v9213_v4  ;;  %5785 = vmatprep.mubr.msk.bf16.mxu0 %vm6415_vm0, %v9213_v4  ;;  %v7379_v32 = vadd.f32 %v1402_v29, %v998_v14 }
 0x1ba   : > { %v1013_v56 = vpop.f32.mrb[92].mxu1  ;;  %v1270_v59 = vpop.f32.mrb[92].mxu0 }
 0x1bb   : > { %v1014_v7 = vadd.f32 %v1013_v56, %v6937_v58  ;;  %v1365_v9 = vrot.slane %v1270_v59, 2  ;;  %v5467_v25 = vpop.f32.mrb[93].mxu1  ;;  %v5563_v1 = vpop.f32.mrb[93].mxu0 }
 0x1bc   : > { %v1016_v30 = vpop.f32.mrb[94].mxu1  ;;  %v1273_v11 = vpop.f32.mrb[94].mxu0 }
 0x1bd   : > { %v1401_v41 = vsel %vm1383_vm2, %v1364_v36, %v1365_v9  ;;  %v1017_v21 = vadd.f32 %v1016_v30, %v6949_v17  ;;  %v1366_v27 = vrot.slane %v1273_v11, 2  ;;  %v5564_v10 = vpop.f32.mrb[95].mxu0  ;;  %v5468_v33 = vpop.f32.mrb[95].mxu1 }
 0x1be   : > { %v7385_v14 = vadd.f32 %v1401_v41, %v1001_v8  ;;  %v6347_v41 = vld [vmem:[%s6492_s6 + $0xa0] sm:$0xff]  }
 0x1bf   : > { %v1400_v38 = vsel %vm1383_vm2, %v1365_v9, %v1366_v27  ;;  %5690 = vmatmul.mubr.bf16.gmra.mrb[200].mxu1 %v6346_v45  ;;  %5786 = vmatmul.mubr.bf16.gmra.mrb[200].mxu0 %v6345_v43 }
 0x1c0   : > { %5693 = vmatprep.mubr.msk.bf16.mxu1 %vm6415_vm0, %v9213_v4  ;;  %5789 = vmatprep.mubr.msk.bf16.mxu0 %vm6415_vm0, %v9213_v4  ;;  %v7394_v58 = vadd.f32 %v1400_v38, %v1006_v35 }
 0x1c2   : > { %v1021_v17 = vpop.f32.mrb[96].mxu1  ;;  %v1278_v36 = vpop.f32.mrb[96].mxu0 }
 0x1c3   : > { %v1022_v8 = vadd.f32 %v1021_v17, %v6959_v19  ;;  %v1367_v54 = vrot.slane %v1278_v36, 2  ;;  %v5471_v6 = vpop.f32.mrb[97].mxu1  ;;  %v5567_v29 = vpop.f32.mrb[97].mxu0 }
 0x1c4   : > { %v1024_v56 = vpop.f32.mrb[98].mxu1  ;;  %v1281_v59 = vpop.f32.mrb[98].mxu0 }
 0x1c5   : > { %v1399_v43 = vsel %vm1383_vm2, %v1366_v27, %v1367_v54  ;;  %v1025_v9 = vadd.f32 %v1024_v56, %v6974_v49  ;;  %v1368_v25 = vrot.slane %v1281_v59, 2  ;;  %v5568_v1 = vpop.f32.mrb[99].mxu0  ;;  %v5472_v30 = vpop.f32.mrb[99].mxu1  ;;  %v6320_v56 = vld [vmem:[%s9186_s1 + $0x1c0] sm:$0xff]  }
 0x1c6   : > { %v7400_v35 = vadd.f32 %v1399_v43, %v1009_v28  ;;  %v6348_v43 = vld [vmem:[%s6492_s6] sm:$0xff]  }
 0x1c7   : > { %v1398_v11 = vsel %vm1383_vm2, %v1367_v54, %v1368_v25  ;;  %5694 = vmatmul.mubr.bf16.gmra.mrb[204].mxu1 %v6347_v41  ;;  %5790 = vmatmul.mubr.bf16.gmra.mrb[204].mxu0 %v6346_v45 }
 0x1c8   : > { %5793 = vmatprep.mubr.msk.bf16.mxu0 %vm6415_vm0, %v9213_v4  ;;  %5813 = vmatprep.mubr.msk.bf16.mxu1 %vm6415_vm0, %v9213_v4  ;;  %v7409_v19 = vadd.f32 %v1398_v11, %v1014_v7 }
 0x1ca   : > { %v1029_v49 = vpop.f32.mrb[100].mxu1  ;;  %v1286_v27 = vpop.f32.mrb[100].mxu0 }
 0x1cb   : > { %v1030_v28 = vadd.f32 %v1029_v49, %v6984_v51  ;;  %v1369_v10 = vrot.slane %v1286_v27, 2  ;;  %v5475_v33 = vpop.f32.mrb[101].mxu1  ;;  %v5571_v38 = vpop.f32.mrb[101].mxu0 }
 0x1cc   : > { %v1032_v17 = vpop.f32.mrb[102].mxu1  ;;  %v1289_v36 = vpop.f32.mrb[102].mxu0 }
 0x1cd   : > { %v1397_v45 = vsel %vm1383_vm2, %v1368_v25, %v1369_v10  ;;  %v7415_v54 = vadd.f32 %v1032_v17, %v7003_v13  ;;  %v1370_v6 = vrot.slane %v1289_v36, 2  ;;  %v5572_v29 = vpop.f32.mrb[103].mxu0  ;;  %v5476_v7 = vpop.f32.mrb[103].mxu1 }
 0x1ce   : > { %v7420_v59 = vadd.f32 %v1397_v45, %v1017_v21  ;;  %v6322_v21 = vld [vmem:[%s9186_s1 + $0x1c8] sm:$0xff]  }
 0x1cf   : > { %v1396_v51 = vsel %vm1383_vm2, %v1369_v10, %v1370_v6  ;;  %5794 = vmatmul.mubr.bf16.gmra.mrb[208].mxu0 %v6347_v41  ;;  %5814 = vmatmul.mubr.bf16.vlgmr.msra.gmra.mrb[208].mxu1 %v6348_v43 }
 0x1d0   : > { %5817 = vmatprep.mubr.msk.bf16.mxu1 %vm6415_vm0, %v9213_v4  ;;  %5913 = vmatprep.mubr.msk.bf16.mxu0 %vm6415_vm0, %v9213_v4  ;;  %v7429_v13 = vadd.f32 %v1396_v51, %v1022_v8  ;;  %v6321_v8 = vld [vmem:[%s9186_s1 + $0x200] sm:$0xff]  }
 0x1d1   : > { %5998 = vmatpush3.bf16.msra.mxu1 %v6320_v56  ;;  %v6349_v56 = vld [vmem:[%s6492_s6 + $0x8] sm:$0xff]  }
 0x1d2   : > { %v1037_v25 = vpop.f32.mrb[104].mxu1  ;;  %v1294_v1 = vpop.f32.mrb[104].mxu0  ;;  %5999 = vmatprep.subr.bf16.mxu1 %v9213_v4 }
 0x1d3   : > { %v1038_v30 = vadd.f32 %v1037_v25, %v7017_v23  ;;  %v1371_v11 = vrot.slane %v1294_v1, 2  ;;  %v5479_v41 = vpop.f32.mrb[105].mxu1  ;;  %v5575_v49 = vpop.f32.mrb[105].mxu0  ;;  %v6324_v23 = vld [vmem:[%s9186_s1 + $0x1d0] sm:$0xff]  }
 0x1d4   : > { %v1040_v27 = vpop.f32.mrb[106].mxu1  ;;  %v1297_v10 = vpop.f32.mrb[106].mxu0 }
 0x1d5   : > { %v1395_v33 = vsel %vm1383_vm2, %v1370_v6, %v1371_v11  ;;  %v7442_v38 = vadd.f32 %v1040_v27, %v7041_v60  ;;  %v1372_v17 = vrot.slane %v1297_v10, 2  ;;  %v5576_v36 = vpop.f32.mrb[107].mxu0  ;;  %v5480_v45 = vpop.f32.mrb[107].mxu1  ;;  %6000 = vmatpush3.bf16.msra.mxu1 %v6322_v21  ;;  %v6323_v60 = vld [vmem:[%s9186_s1 + $0x208] sm:$0xff]  }
 0x1d6   : > { %6001 = vmatprep.subr.bf16.mxu1 %v9213_v4  ;;  %v7448_v29 = vadd.f32 %v1395_v33, %v1025_v9  ;;  %v6328_v36 = vld [vmem:[%s9186_s1 + $0x1e0] sm:$0xff]  }
 0x1d7   : > { %v1394_v7 = vsel %vm1383_vm2, %v1371_v11, %v1372_v17  ;;  %5818 = vmatmul.mubr.bf16.gmra.mrb[212].mxu1 %v6349_v56  ;;  %5914 = vmatmul.mubr.bf16.vlgmr.msra.gmra.mrb[212].mxu0 %v6348_v43  ;;  %v6326_v43 = vld [vmem:[%s9186_s1 + $0x1d8] sm:$0xff]  }
 0x1d8   : > { %6098 = vmatpush3.bf16.msra.mxu0 %v6321_v8  ;;  %5821 = vmatprep.mubr.msk.bf16.mxu1 %vm6415_vm0, %v9213_v4  ;;  %v7458_v6 = vadd.f32 %v1394_v7, %v1030_v28 }
 0x1d9   : > { %5917 = vmatprep.mubr.msk.bf16.mxu0 %vm6415_vm0, %v9213_v4  ;;  %6099 = vmatprep.subr.bf16.mxu0 %v9213_v4 }
 0x1da   : > { %v1045_v9 = vpop.f32.mrb[108].mxu1  ;;  %v1302_v51 = vpop.f32.mrb[108].mxu0  ;;  %6002 = vmatpush3.bf16.msra.mxu1 %v6324_v23 }
 0x1db   : > { %v1046_v21 = vadd.f32 %v1045_v9, %v7054_v3  ;;  %v1373_v25 = vrot.slane %v1302_v51, 2  ;;  %v5483_v1 = vpop.f32.mrb[109].mxu1  ;;  %v5579_v11 = vpop.f32.mrb[109].mxu0  ;;  %6003 = vmatprep.subr.bf16.mxu1 %v9213_v4  ;;  %v6325_v3 = vld [vmem:[%s9186_s1 + $0x210] sm:$0xff]  }
 0x1dc   : > { %v1048_v28 = vpop.f32.mrb[110].mxu1  ;;  %v1305_v41 = vpop.f32.mrb[110].mxu0  ;;  %6100 = vmatpush3.bf16.msra.mxu0 %v6323_v60 }
 0x1dd   : > { %v1393_v49 = vsel %vm1383_vm2, %v1372_v17, %v1373_v25  ;;  %v7471_v27 = vadd.f32 %v1048_v28, %v7078_v47  ;;  %v1374_v10 = vrot.slane %v1305_v41, 2  ;;  %v5580_v8 = vpop.f32.mrb[111].mxu0  ;;  %v5484_v33 = vpop.f32.mrb[111].mxu1  ;;  %6101 = vmatprep.subr.bf16.mxu0 %v9213_v4  ;;  %v6350_v17 = vld [vmem:[%s6492_s6 + $0x10] sm:$0xff]  }
 0x1de   : > { %6004 = vmatpush3.bf16.msra.mxu1 %v6326_v43  ;;  %v7481_v45 = vadd.f32 %v1393_v49, %v7415_v54  ;;  %v6327_v54 = vld [vmem:[%s9186_s1 + $0x218] sm:$0xff]   ;;  %v6332_v33 = vld [vmem:[%s9186_s1 + $0x1f0] sm:$0xff]  }
 0x1df   : > { %v1392_v47 = vsel %vm1383_vm2, %v1373_v25, %v1374_v10  ;;  %5822 = vmatmul.mubr.bf16.gmra.mrb[216].mxu1 %v6350_v17  ;;  %5918 = vmatmul.mubr.bf16.gmra.mrb[216].mxu0 %v6349_v56  ;;  %v6330_v56 = vld [vmem:[%s9186_s1 + $0x1e8] sm:$0xff]  }
 0x1e0   : > { %5825 = vmatprep.mubr.msk.bf16.mxu1 %vm6415_vm0, %v9213_v4  ;;  %5921 = vmatprep.mubr.msk.bf16.mxu0 %vm6415_vm0, %v9213_v4  ;;  %v7490_v23 = vadd.f32 %v1392_v47, %v1038_v30 }
 0x1e1   : > { %6102 = vmatpush3.bf16.msra.mxu0 %v6325_v3  ;;  %6005 = vmatprep.subr.bf16.mxu1 %v9213_v4  ;;  %v6351_v3 = vld [vmem:[%s6492_s6 + $0x18] sm:$0xff]  }
 0x1e2   : > { %v1053_v7 = vpop.f32.mrb[112].mxu1  ;;  %v1310_v60 = vpop.f32.mrb[112].mxu0  ;;  %6103 = vmatprep.subr.bf16.mxu0 %v9213_v4  ;;  %6006 = vmatpush3.bf16.msra.mxu1 %v6328_v36 }
 0x1e3   : > { %v1054_v9 = vadd.f32 %v1053_v7, %v7092_v53  ;;  %v1375_v30 = vrot.slane %v1310_v60, 2  ;;  %v5487_v51 = vpop.f32.mrb[113].mxu1  ;;  %v5583_v43 = vpop.f32.mrb[113].mxu0  ;;  %6007 = vmatprep.subr.bf16.mxu1 %v9213_v4  ;;  %v6329_v53 = vld [vmem:[%s9186_s1 + $0x220] sm:$0xff]  }
 0x1e4   : > { %v1056_v25 = vpop.f32.mrb[114].mxu1  ;;  %v1313_v1 = vpop.f32.mrb[114].mxu0 }
 0x1e5   : > { %v1391_v11 = vsel %vm1383_vm2, %v1374_v10, %v1375_v30  ;;  %v7505_v28 = vadd.f32 %v1056_v25, %v7116_v46  ;;  %v1376_v41 = vrot.slane %v1313_v1, 2  ;;  %v5584_v49 = vpop.f32.mrb[115].mxu0  ;;  %v5488_v8 = vpop.f32.mrb[115].mxu1  ;;  %6104 = vmatpush3.bf16.msra.mxu0 %v6327_v54 }
 0x1e6   : > { %6105 = vmatprep.subr.bf16.mxu0 %v9213_v4  ;;  %6008 = vmatpush3.bf16.msra.mxu1 %v6330_v56  ;;  %v7515_v10 = vadd.f32 %v1391_v11, %v7442_v38  ;;  %v6331_v38 = vld [vmem:[%s9186_s1 + $0x228] sm:$0xff]  }
 0x1e7   : > { %v1390_v46 = vsel %vm1383_vm2, %v1375_v30, %v1376_v41  ;;  %5826 = vmatmul.mubr.bf16.gmra.mrb[220].mxu1 %v6351_v3  ;;  %5922 = vmatmul.mubr.bf16.gmra.mrb[220].mxu0 %v6350_v17  ;;  %v6334_v17 = vld [vmem:[%s9186_s1 + $0x1f8] sm:$0xff]  }
 0x1e8   : > { %5829 = vmatprep.mubr.msk.bf16.mxu1 %vm6415_vm0, %v9213_v4  ;;  %5925 = vmatprep.mubr.msk.bf16.mxu0 %vm6415_vm0, %v9213_v4  ;;  %v7524_v36 = vadd.f32 %v1390_v46, %v1046_v21 }
 0x1e9   : > { %6106 = vmatpush3.bf16.msra.mxu0 %v6329_v53  ;;  %6009 = vmatprep.subr.bf16.mxu1 %v9213_v4 }
 0x1ea   : > { %v1061_v47 = vpop.f32.mrb[116].mxu1  ;;  %v1318_v54 = vpop.f32.mrb[116].mxu0  ;;  %6107 = vmatprep.subr.bf16.mxu0 %v9213_v4  ;;  %6010 = vmatpush3.bf16.msra.mxu1 %v6332_v33 }
 0x1eb   : > { %v1062_v7 = vadd.f32 %v1061_v47, %v7127_v44  ;;  %v1377_v21 = vrot.slane %v1318_v54, 2  ;;  %v5491_v60 = vpop.f32.mrb[117].mxu1  ;;  %v5587_v56 = vpop.f32.mrb[117].mxu0  ;;  %6011 = vmatprep.subr.bf16.mxu1 %v9213_v4  ;;  %v6333_v44 = vld [vmem:[%s9186_s1 + $0x230] sm:$0xff]  }
 0x1ec   : > { %v1064_v30 = vpop.f32.mrb[118].mxu1  ;;  %v1321_v51 = vpop.f32.mrb[118].mxu0  ;;  %v9217_v60 = vld [vmem:[#allocation3_spill] sm:$0xff] }
 0x1ed   : > { %v1389_v43 = vsel %vm1383_vm2, %v1376_v41, %v1377_v21  ;;  %v1065_v25 = vadd.f32 %v1064_v30, %v7147_v34  ;;  %v1378_v1 = vrot.slane %v1321_v51, 2  ;;  %v5588_v11 = vpop.f32.mrb[119].mxu0  ;;  %v5492_v49 = vpop.f32.mrb[119].mxu1  ;;  %6108 = vmatpush3.bf16.msra.mxu0 %v6331_v38  ;;  %v6352_v41 = vld [vmem:[%s6492_s6 + $0x20] sm:$0xff]  }
 0x1ee   : > { %6109 = vmatprep.subr.bf16.mxu0 %v9213_v4  ;;  %6012 = vmatpush3.bf16.msra.mxu1 %v6334_v17  ;;  %v7544_v8 = vadd.f32 %v1389_v43, %v7471_v27  ;;  %v6335_v27 = vld [vmem:[%s9186_s1 + $0x238] sm:$0xff]   ;;  %v9215_v17 = vld [vmem:[#allocation2_spill] sm:$0xff] }
 0x1ef   : > { %v1388_v53 = vsel %vm1383_vm2, %v1377_v21, %v1378_v1  ;;  %5830 = vmatmul.mubr.bf16.gmra.mrb[224].mxu1 %v6352_v41  ;;  %5926 = vmatmul.mubr.bf16.gmra.mrb[224].mxu0 %v6351_v3  ;;  %v9216_v21 = vrot.slane %v9215_v17, 1 }
 0x1f0   : > { %5833 = vmatprep.mubr.msk.bf16.mxu1 %vm6415_vm0, %v9213_v4  ;;  %5929 = vmatprep.mubr.msk.bf16.mxu0 %vm6415_vm0, %v9213_v4  ;;  %v7553_v34 = vadd.f32 %v1388_v53, %v1054_v9  ;;  %v9218_v9 = vrot.slane %v9217_v60, 1 }
 0x1f1   : > { %6110 = vmatpush3.bf16.msra.mxu0 %v6333_v44 }
 0x1f2   : > { %v1069_v33 = vpop.f32.mrb[120].mxu1  ;;  %v1326_v46 = vpop.f32.mrb[120].mxu0  ;;  %6111 = vmatprep.subr.bf16.mxu0 %v9213_v4  ;;  %v826_v56 = vsel %vm784_vm1, %v9218_v9, %v9216_v21 }
 0x1f3   : > { %v1070_v3 = vadd.f32 %v1069_v33, %v7160_v20  ;;  %v1379_v38 = vrot.slane %v1326_v46, 2  ;;  %v5495_v47 = vpop.f32.mrb[121].mxu1  ;;  %v5591_v54 = vpop.f32.mrb[121].mxu0  ;;  %v6353_v46 = vld [vmem:[%s6492_s6 + $0x28] sm:$0xff]  }
 0x1f4   : > { %v1072_v30 = vpop.f32.mrb[122].mxu1  ;;  %v1329_v51 = vpop.f32.mrb[122].mxu0 }
 0x1f5   : > { %v1387_v43 = vsel %vm1383_vm2, %v1378_v1, %v1379_v38  ;;  %v1073_v11 = vadd.f32 %v1072_v30, %v826_v56  ;;  %v1380_v49 = vrot.slane %v1329_v51, 2  ;;  %v5592_v44 = vpop.f32.mrb[123].mxu0  ;;  %v5496_v53 = vpop.f32.mrb[123].mxu1  ;;  %6112 = vmatpush3.bf16.msra.mxu0 %v6335_v27 }
 0x1f6   : > { %v7569_v20 = vadd.f32 %v1387_v43, %v7505_v28  ;;  %v9219_v44 = vld [vmem:[#allocation4_spill] sm:$0xff] }
 0x1f7   : > { %v1386_v33 = vsel %vm1383_vm2, %v1379_v38, %v1380_v49  ;;  %5834 = vmatmul.mubr.bf16.gmra.mrb[228].mxu1 %v6353_v46  ;;  %5930 = vmatmul.mubr.bf16.gmra.mrb[228].mxu0 %v6352_v41  ;;  %v9220_v53 = vrot.slane %v9219_v44, 2 }
 0x1f8   : > { %5837 = vmatprep.mubr.msk.bf16.mxu1 %vm6415_vm0, %v9213_v4  ;;  %5933 = vmatprep.mubr.msk.bf16.mxu0 %vm6415_vm0, %v9213_v4  ;;  %v7578_v1 = vadd.f32 %v1386_v33, %v1062_v7 }
 0x1fa   : > { %v1334_v47 = vpop.f32.mrb[124].mxu0  ;;  %v7580_v54 = vpop.f32.mrb[124].mxu1 }
 0x1fb   : > { %v1381_v28 = vrot.slane %v1334_v47, 2  ;;  %v5595_v27 = vpop.f32.mrb[125].mxu0  ;;  %v9201_v17 = vrot.slane %v7580_v54, 2  ;;  %v5615_v38 = vpop.f32.mrb[125].mxu1 }
 0x1fc   : > { %v1337_v21 = vpop.f32.mrb[126].mxu0  ;;  %v1569_v60 = vpop.f32.mrb[126].mxu1 }
 0x1fd   : > { %v1385_v41 = vsel %vm1383_vm2, %v1380_v49, %v1381_v28  ;;  %v1382_v9 = vrot.slane %v1337_v21, 2  ;;  %v5596_v56 = vpop.f32.mrb[127].mxu0  ;;  %v1734_v30 = vrot.slane %v1569_v60, 2  ;;  %v5616_v51 = vpop.f32.mrb[127].mxu1  ;;  %v6354_v49 = vld [vmem:[%s6492_s6 + $0x30] sm:$0xff]  }
 0x1fe   : > { %v7585_v7 = vadd.f32 %v1385_v41, %v1065_v25 }
 0x1ff   : > { %v1384_v43 = vsel %vm1383_vm2, %v1381_v28, %v1382_v9  ;;  %v1425_v33 = vsel %vm1383_vm2, %v1382_v9, %v9220_v53  ;;  %v1815_v47 = vsel %vm1383_vm2, %v9201_v17, %v1734_v30  ;;  %5838 = vmatmul.mubr.bf16.gmra.mrb[232].mxu1 %v6354_v49  ;;  %5934 = vmatmul.mubr.bf16.gmra.mrb[232].mxu0 %v6353_v46  ;;  %v6416_v17 = vmov 0  }
 0x200   : > { %v1466_v27 = vadd.f32 %v1384_v43, %v1070_v3  ;;  %v1467_v38 = vadd.f32 %v1425_v33, %v1073_v11  ;;  %5841 = vmatprep.mubr.msk.bf16.mxu1 %vm6415_vm0, %v9213_v4  ;;  %5937 = vmatprep.mubr.msk.bf16.mxu0 %vm6415_vm0, %v9213_v4 }
 0x201   : > { %6241 = vset.pattern.permute.xlu0 %v6416_v17  ;;  %6242 = vset.pattern.permute.xlu1 %v6416_v17 }
 0x202   : > { %v1857_v25 = vadd.f32 %v1815_v47, %v1466_v27  ;;  %v1574_v28 = vpop.f32.mrb[128].mxu1  ;;  %v7602_v21 = vpop.f32.mrb[128].mxu0 }
 0x203   : > { %v1735_v60 = vrot.slane %v1574_v28, 2  ;;  %v5619_v41 = vpop.f32.mrb[129].mxu1  ;;  %v5715_v9 = vpop.f32.mrb[129].mxu0  ;;  %v9200_v11 = vrot.slane %v7602_v21, 3  ;;  %v6355_v28 = vld [vmem:[%s6492_s6 + $0x38] sm:$0xff]  }
 0x204   : > { %v1577_v56 = vpop.f32.mrb[130].mxu1  ;;  %v1960_v51 = vpop.f32.mrb[130].mxu0 }
 0x205   : > { %v1814_v3 = vsel %vm1383_vm2, %v1734_v30, %v1735_v60  ;;  %v1736_v46 = vrot.slane %v1577_v56, 2  ;;  %v2125_v43 = vrot.slane %v1960_v51, 3  ;;  %v5716_v44 = vpop.f32.mrb[131].mxu0  ;;  %v5620_v53 = vpop.f32.mrb[131].mxu1 }
 0x206   : > { %v1858_v33 = vadd.f32 %v1814_v3, %v1467_v38 }
 0x207   : > { %v1813_v47 = vsel %vm1383_vm2, %v1735_v60, %v1736_v46  ;;  %v2207_v27 = vsel %vm2166_vm3, %v9200_v11, %v2125_v43  ;;  %5842 = vmatmul.mubr.bf16.gmra.mrb[236].mxu1 %v6355_v28  ;;  %5938 = vmatmul.mubr.bf16.gmra.mrb[236].mxu0 %v6354_v49 }
 0x208   : > { %v1817_v30 = vadd.f32 %v1813_v47, %v7210_v31  ;;  %v7616_v41 = vadd.f32 %v2207_v27, %v1857_v25  ;;  %5845 = vmatprep.mubr.msk.bf16.mxu1 %vm6415_vm0, %v9213_v4  ;;  %5941 = vmatprep.mubr.msk.bf16.mxu0 %vm6415_vm0, %v9213_v4 }
 0x20a   : > { %v1582_v38 = vpop.f32.mrb[132].mxu1  ;;  %v1965_v60 = vpop.f32.mrb[132].mxu0 }
 0x20b   : > { %v1737_v9 = vrot.slane %v1582_v38, 2  ;;  %v2126_v56 = vrot.slane %v1965_v60, 3  ;;  %v5623_v51 = vpop.f32.mrb[133].mxu1  ;;  %v5719_v3 = vpop.f32.mrb[133].mxu0  ;;  %v3818_v38 = vld [vmem:[%s9187_s2] sm:$0xff] }
 0x20c   : > { %v1585_v44 = vpop.f32.mrb[134].mxu1  ;;  %v1968_v53 = vpop.f32.mrb[134].mxu0  ;;  %3862 = vperm.xlu0 %6241, %v3818_v38   ;;  %v6356_v3 = vld [vmem:[%s6492_s6 + $0x40] sm:$0xff]  }
 0x20d   : > { %v1812_v31 = vsel %vm1383_vm2, %v1736_v46, %v1737_v9  ;;  %v2206_v49 = vsel %vm2166_vm3, %v2125_v43, %v2126_v56  ;;  %v1738_v25 = vrot.slane %v1585_v44, 2  ;;  %v2127_v47 = vrot.slane %v1968_v53, 3  ;;  %v5720_v27 = vpop.f32.mrb[135].mxu0  ;;  %v5624_v11 = vpop.f32.mrb[135].mxu1 }
 0x20e   : > { %v1818_v60 = vadd.f32 %v1812_v31, %v7216_v63  ;;  %v7630_v51 = vadd.f32 %v2206_v49, %v1858_v33  ;;  %v3819_v63 = vld [vmem:[%s9187_s2 + $0x8] sm:$0xff] }
 0x20f   : > { %v1811_v46 = vsel %vm1383_vm2, %v1737_v9, %v1738_v25  ;;  %v2205_v43 = vsel %vm2166_vm3, %v2126_v56, %v2127_v47  ;;  %5846 = vmatmul.mubr.bf16.gmra.mrb[240].mxu1 %v6356_v3  ;;  %5942 = vmatmul.mubr.bf16.gmra.mrb[240].mxu0 %v6355_v28 }
 0x210   : > { %v1819_v11 = vadd.f32 %v1811_v46, %v7226_v57  ;;  %v7638_v44 = vadd.f32 %v2205_v43, %v1817_v30  ;;  %5849 = vmatprep.mubr.msk.bf16.mxu1 %vm6415_vm0, %v9213_v4  ;;  %5945 = vmatprep.mubr.msk.bf16.mxu0 %vm6415_vm0, %v9213_v4  ;;  %v3820_v57 = vld [vmem:[%s9187_s2 + $0x10] sm:$0xff] }
 0x211   : > { %3867 = vperm.xlu0 %6241, %v3819_v63   ;;  %3872 = vperm.xlu1 %6242, %v3820_v57   ;;  %v3821_v57 = vld [vmem:[%s9187_s2 + $0x18] sm:$0xff] }
 0x212   : > { %v1590_v17 = vpop.f32.mrb[136].mxu1  ;;  %v1973_v33 = vpop.f32.mrb[136].mxu0 }
 0x213   : > { %v1739_v9 = vrot.slane %v1590_v17, 2  ;;  %v2128_v56 = vrot.slane %v1973_v33, 3  ;;  %v5627_v28 = vpop.f32.mrb[137].mxu1  ;;  %v5723_v53 = vpop.f32.mrb[137].mxu0  ;;  %v3822_v17 = vld [vmem:[%s9187_s2 + $0x20] sm:$0xff] }
 0x214   : > { %v1593_v30 = vpop.f32.mrb[138].mxu1  ;;  %v1976_v31 = vpop.f32.mrb[138].mxu0 }
 0x215   : > { %v1810_v49 = vsel %vm1383_vm2, %v1738_v25, %v1739_v9  ;;  %v2204_v27 = vsel %vm2166_vm3, %v2127_v47, %v2128_v56  ;;  %v1740_v38 = vrot.slane %v1593_v30, 2  ;;  %v2129_v46 = vrot.slane %v1976_v31, 3  ;;  %v5724_v43 = vpop.f32.mrb[139].mxu0  ;;  %v5628_v63 = vpop.f32.mrb[139].mxu1  ;;  %3882 = vperm.xlu0 %6241, %v3822_v17   ;;  %v6357_v47 = vld [vmem:[%s6492_s6 + $0x48] sm:$0xff]   ;;  %3877 = vperm.xlu1 %6242, %v3821_v57  }
 0x216   : > { %v1820_v33 = vadd.f32 %v1810_v49, %v7232_v24  ;;  %v7658_v28 = vadd.f32 %v2204_v27, %v1818_v60  ;;  %v3824_v24 = vld [vmem:[%s9187_s2 + $0x30] sm:$0xff] }
 0x217   : > { %v1809_v53 = vsel %vm1383_vm2, %v1739_v9, %v1740_v38  ;;  %v2203_v25 = vsel %vm2166_vm3, %v2128_v56, %v2129_v46  ;;  %5850 = vmatmul.mubr.bf16.gmra.mrb[244].mxu1 %v6357_v47  ;;  %5946 = vmatmul.mubr.bf16.gmra.mrb[244].mxu0 %v6356_v3 }
 0x218   : > { %v1821_v30 = vadd.f32 %v1809_v53, %v7242_v18  ;;  %v7669_v31 = vadd.f32 %v2203_v25, %v1819_v11  ;;  %5853 = vmatprep.mubr.msk.bf16.mxu1 %vm6415_vm0, %v9213_v4  ;;  %5949 = vmatprep.mubr.msk.bf16.mxu0 %vm6415_vm0, %v9213_v4  ;;  %v3823_v11 = vld [vmem:[%s9187_s2 + $0x28] sm:$0xff] }
 0x219   : > { %3892 = vperm.xlu0 %6241, %v3824_v24   ;;  %3887 = vperm.xlu1 %6242, %v3823_v11   ;;  %v3825_v11 = vld [vmem:[%s9187_s2 + $0x38] sm:$0xff] }
 0x21a   : > { %v1598_v60 = vpop.f32.mrb[140].mxu1  ;;  %v1981_v3 = vpop.f32.mrb[140].mxu0 }
 0x21b   : > { %v1741_v9 = vrot.slane %v1598_v60, 2  ;;  %v2130_v56 = vrot.slane %v1981_v3, 3  ;;  %v5631_v49 = vpop.f32.mrb[141].mxu1  ;;  %v5727_v18 = vpop.f32.mrb[141].mxu0  ;;  %v3826_v60 = vld [vmem:[%s9187_s2 + $0x40] sm:$0xff] }
 0x21c   : > { %v1601_v27 = vpop.f32.mrb[142].mxu1  ;;  %v1984_v43 = vpop.f32.mrb[142].mxu0  ;;  %v6358_v18 = vld [vmem:[%s6492_s6 + $0x50] sm:$0xff]  }
 0x21d   : > { %v1808_v63 = vsel %vm1383_vm2, %v1740_v38, %v1741_v9  ;;  %v2202_v17 = vsel %vm2166_vm3, %v2129_v46, %v2130_v56  ;;  %v1742_v53 = vrot.slane %v1601_v27, 2  ;;  %v2131_v25 = vrot.slane %v1984_v43, 3  ;;  %v5728_v57 = vpop.f32.mrb[143].mxu0  ;;  %v5632_v24 = vpop.f32.mrb[143].mxu1  ;;  %3902 = vperm.xlu0 %6241, %v3826_v60   ;;  %3897 = vperm.xlu1 %6242, %v3825_v11  }
 0x21e   : > { %v1822_v3 = vadd.f32 %v1808_v63, %v7248_v39  ;;  %v7689_v49 = vadd.f32 %v2202_v17, %v1820_v33  ;;  %v3828_v39 = vld [vmem:[%s9187_s2 + $0x50] sm:$0xff] }
 0x21f   : > { %v1807_v38 = vsel %vm1383_vm2, %v1741_v9, %v1742_v53  ;;  %v2201_v46 = vsel %vm2166_vm3, %v2130_v56, %v2131_v25  ;;  %5854 = vmatmul.mubr.bf16.gmra.mrb[248].mxu1 %v6358_v18  ;;  %5950 = vmatmul.mubr.bf16.gmra.mrb[248].mxu0 %v6357_v47 }
 0x220   : > { %v1823_v27 = vadd.f32 %v1807_v38, %v7258_v50  ;;  %v7700_v43 = vadd.f32 %v2201_v46, %v1821_v30  ;;  %5857 = vmatprep.mubr.msk.bf16.mxu1 %vm6415_vm0, %v9213_v4  ;;  %5953 = vmatprep.mubr.msk.bf16.mxu0 %vm6415_vm0, %v9213_v4  ;;  %v3827_v30 = vld [vmem:[%s9187_s2 + $0x48] sm:$0xff] }
 0x221   : > { %3912 = vperm.xlu0 %6241, %v3828_v39   ;;  %3907 = vperm.xlu1 %6242, %v3827_v30   ;;  %v3829_v30 = vld [vmem:[%s9187_s2 + $0x58] sm:$0xff] }
 0x222   : > { %v1606_v33 = vpop.f32.mrb[144].mxu1  ;;  %v1989_v47 = vpop.f32.mrb[144].mxu0 }
 0x223   : > { %v1743_v9 = vrot.slane %v1606_v33, 2  ;;  %v2132_v56 = vrot.slane %v1989_v47, 3  ;;  %v5635_v63 = vpop.f32.mrb[145].mxu1  ;;  %v5731_v50 = vpop.f32.mrb[145].mxu0  ;;  %v3830_v33 = vld [vmem:[%s9187_s2 + $0x60] sm:$0xff] }
 0x224   : > { %v1609_v17 = vpop.f32.mrb[146].mxu1  ;;  %v1992_v57 = vpop.f32.mrb[146].mxu0  ;;  %v6359_v50 = vld [vmem:[%s6492_s6 + $0x58] sm:$0xff]  }
 0x225   : > { %v1806_v24 = vsel %vm1383_vm2, %v1742_v53, %v1743_v9  ;;  %v2200_v60 = vsel %vm2166_vm3, %v2131_v25, %v2132_v56  ;;  %v1744_v38 = vrot.slane %v1609_v17, 2  ;;  %v2133_v46 = vrot.slane %v1992_v57, 3  ;;  %v5732_v11 = vpop.f32.mrb[147].mxu0  ;;  %v5636_v39 = vpop.f32.mrb[147].mxu1  ;;  %3922 = vperm.xlu0 %6241, %v3830_v33   ;;  %3917 = vperm.xlu1 %6242, %v3829_v30  }
 0x226   : > { %v1824_v47 = vadd.f32 %v1806_v24, %v7264_v5  ;;  %v7720_v63 = vadd.f32 %v2200_v60, %v1822_v3  ;;  %v3832_v5 = vld [vmem:[%s9187_s2 + $0x70] sm:$0xff] }
 0x227   : > { %v1805_v53 = vsel %vm1383_vm2, %v1743_v9, %v1744_v38  ;;  %v2199_v25 = vsel %vm2166_vm3, %v2132_v56, %v2133_v46  ;;  %5858 = vmatmul.mubr.bf16.gmra.mrb[252].mxu1 %v6359_v50  ;;  %5954 = vmatmul.mubr.bf16.gmra.mrb[252].mxu0 %v6358_v18 }
 0x228   : > { %v1825_v17 = vadd.f32 %v1805_v53, %v7274_v22  ;;  %v7731_v57 = vadd.f32 %v2199_v25, %v1823_v27  ;;  %5861 = vmatprep.mubr.msk.bf16.mxu1 %vm6415_vm0, %v9213_v4  ;;  %5957 = vmatprep.mubr.msk.bf16.mxu0 %vm6415_vm0, %v9213_v4  ;;  %v3831_v27 = vld [vmem:[%s9187_s2 + $0x68] sm:$0xff] }
 0x229   : > { %3932 = vperm.xlu0 %6241, %v3832_v5   ;;  %3927 = vperm.xlu1 %6242, %v3831_v27   ;;  %v3833_v27 = vld [vmem:[%s9187_s2 + $0x78] sm:$0xff] }
 0x22a   : > { %v1614_v3 = vpop.f32.mrb[148].mxu1  ;;  %v1997_v18 = vpop.f32.mrb[148].mxu0 }
 0x22b   : > { %v1745_v9 = vrot.slane %v1614_v3, 2  ;;  %v2134_v56 = vrot.slane %v1997_v18, 3  ;;  %v5639_v24 = vpop.f32.mrb[149].mxu1  ;;  %v5735_v22 = vpop.f32.mrb[149].mxu0  ;;  %v3834_v3 = vld [vmem:[%s9187_s2 + $0x80] sm:$0xff] }
 0x22c   : > { %v1617_v60 = vpop.f32.mrb[150].mxu1  ;;  %v2000_v11 = vpop.f32.mrb[150].mxu0  ;;  %v6360_v22 = vld [vmem:[%s6492_s6 + $0x60] sm:$0xff]  }
 0x22d   : > { %v1804_v39 = vsel %vm1383_vm2, %v1744_v38, %v1745_v9  ;;  %v2198_v33 = vsel %vm2166_vm3, %v2133_v46, %v2134_v56  ;;  %v1746_v53 = vrot.slane %v1617_v60, 2  ;;  %v2135_v25 = vrot.slane %v2000_v11, 3  ;;  %v5736_v30 = vpop.f32.mrb[151].mxu0  ;;  %v5640_v5 = vpop.f32.mrb[151].mxu1  ;;  %3942 = vperm.xlu0 %6241, %v3834_v3   ;;  %3937 = vperm.xlu1 %6242, %v3833_v27  }
 0x22e   : > { %v1826_v18 = vadd.f32 %v1804_v39, %v7280_v40  ;;  %v7751_v24 = vadd.f32 %v2198_v33, %v1824_v47  ;;  %v3836_v40 = vld [vmem:[%s9187_s2 + $0x90] sm:$0xff] }
 0x22f   : > { %v1803_v38 = vsel %vm1383_vm2, %v1745_v9, %v1746_v53  ;;  %v2197_v46 = vsel %vm2166_vm3, %v2134_v56, %v2135_v25  ;;  %5862 = vmatmul.mubr.bf16.gmra.mrb[0].mxu1 %v6360_v22  ;;  %5958 = vmatmul.mubr.bf16.gmra.mrb[0].mxu0 %v6359_v50 }
 0x230   : > { %v1827_v60 = vadd.f32 %v1803_v38, %v7289_v62  ;;  %v7762_v11 = vadd.f32 %v2197_v46, %v1825_v17  ;;  %5865 = vmatprep.mubr.msk.bf16.mxu1 %vm6415_vm0, %v9213_v4  ;;  %5961 = vmatprep.mubr.msk.bf16.mxu0 %vm6415_vm0, %v9213_v4  ;;  %v3835_v17 = vld [vmem:[%s9187_s2 + $0x88] sm:$0xff] }
 0x231   : > { %3952 = vperm.xlu0 %6241, %v3836_v40   ;;  %3947 = vperm.xlu1 %6242, %v3835_v17   ;;  %v3837_v17 = vld [vmem:[%s9187_s2 + $0x98] sm:$0xff] }
 0x232   : > { %v1622_v47 = vpop.f32.mrb[152].mxu1  ;;  %v2005_v50 = vpop.f32.mrb[152].mxu0 }
 0x233   : > { %v1747_v9 = vrot.slane %v1622_v47, 2  ;;  %v2136_v56 = vrot.slane %v2005_v50, 3  ;;  %v5643_v39 = vpop.f32.mrb[153].mxu1  ;;  %v5739_v62 = vpop.f32.mrb[153].mxu0  ;;  %v3838_v47 = vld [vmem:[%s9187_s2 + $0xa0] sm:$0xff] }
 0x234   : > { %v1625_v33 = vpop.f32.mrb[154].mxu1  ;;  %v2008_v30 = vpop.f32.mrb[154].mxu0  ;;  %v6361_v62 = vld [vmem:[%s6492_s6 + $0x68] sm:$0xff]  }
 0x235   : > { %v1802_v5 = vsel %vm1383_vm2, %v1746_v53, %v1747_v9  ;;  %v2196_v3 = vsel %vm2166_vm3, %v2135_v25, %v2136_v56  ;;  %v1748_v38 = vrot.slane %v1625_v33, 2  ;;  %v2137_v46 = vrot.slane %v2008_v30, 3  ;;  %v5740_v27 = vpop.f32.mrb[155].mxu0  ;;  %v5644_v40 = vpop.f32.mrb[155].mxu1  ;;  %3962 = vperm.xlu0 %6241, %v3838_v47   ;;  %3957 = vperm.xlu1 %6242, %v3837_v17  }
 0x236   : > { %v1828_v50 = vadd.f32 %v1802_v5, %v7295_v0  ;;  %v7782_v39 = vadd.f32 %v2196_v3, %v1826_v18  ;;  %v3840_v0 = vld [vmem:[%s9187_s2 + $0xb0] sm:$0xff] }
 0x237   : > { %v1801_v53 = vsel %vm1383_vm2, %v1747_v9, %v1748_v38  ;;  %v2195_v25 = vsel %vm2166_vm3, %v2136_v56, %v2137_v46  ;;  %5866 = vmatmul.mubr.bf16.gmra.mrb[4].mxu1 %v6361_v62  ;;  %5962 = vmatmul.mubr.bf16.gmra.mrb[4].mxu0 %v6360_v22 }
 0x238   : > { %v1829_v33 = vadd.f32 %v1801_v53, %v7304_v48  ;;  %v7793_v30 = vadd.f32 %v2195_v25, %v1827_v60  ;;  %5869 = vmatprep.mubr.msk.bf16.mxu1 %vm6415_vm0, %v9213_v4  ;;  %5965 = vmatprep.mubr.msk.bf16.mxu0 %vm6415_vm0, %v9213_v4  ;;  %v3839_v60 = vld [vmem:[%s9187_s2 + $0xa8] sm:$0xff] }
 0x239   : > { %3972 = vperm.xlu0 %6241, %v3840_v0   ;;  %3967 = vperm.xlu1 %6242, %v3839_v60   ;;  %v3841_v60 = vld [vmem:[%s9187_s2 + $0xb8] sm:$0xff] }
 0x23a   : > { %v1630_v18 = vpop.f32.mrb[156].mxu1  ;;  %v2013_v22 = vpop.f32.mrb[156].mxu0 }
 0x23b   : > { %v1749_v9 = vrot.slane %v1630_v18, 2  ;;  %v2138_v56 = vrot.slane %v2013_v22, 3  ;;  %v5647_v5 = vpop.f32.mrb[157].mxu1  ;;  %v5743_v48 = vpop.f32.mrb[157].mxu0  ;;  %v3842_v18 = vld [vmem:[%s9187_s2 + $0xc0] sm:$0xff] }
 0x23c   : > { %v1633_v3 = vpop.f32.mrb[158].mxu1  ;;  %v2016_v27 = vpop.f32.mrb[158].mxu0  ;;  %v6362_v48 = vld [vmem:[%s6492_s6 + $0x70] sm:$0xff]  }
 0x23d   : > { %v1800_v40 = vsel %vm1383_vm2, %v1748_v38, %v1749_v9  ;;  %v2194_v47 = vsel %vm2166_vm3, %v2137_v46, %v2138_v56  ;;  %v1750_v53 = vrot.slane %v1633_v3, 2  ;;  %v2139_v25 = vrot.slane %v2016_v27, 3  ;;  %v5744_v17 = vpop.f32.mrb[159].mxu0  ;;  %v5648_v0 = vpop.f32.mrb[159].mxu1  ;;  %3982 = vperm.xlu0 %6241, %v3842_v18   ;;  %3977 = vperm.xlu1 %6242, %v3841_v60  }
 0x23e   : > { %v1830_v22 = vadd.f32 %v1800_v40, %v7310_v52  ;;  %v7813_v5 = vadd.f32 %v2194_v47, %v1828_v50  ;;  %v3844_v52 = vld [vmem:[%s9187_s2 + $0xd0] sm:$0xff] }
 0x23f   : > { %v1799_v38 = vsel %vm1383_vm2, %v1749_v9, %v1750_v53  ;;  %v2193_v46 = vsel %vm2166_vm3, %v2138_v56, %v2139_v25  ;;  %5870 = vmatmul.mubr.bf16.gmra.mrb[8].mxu1 %v6362_v48  ;;  %5966 = vmatmul.mubr.bf16.gmra.mrb[8].mxu0 %v6361_v62 }
 0x240   : > { %v1831_v3 = vadd.f32 %v1799_v38, %v7319_v42  ;;  %v7824_v27 = vadd.f32 %v2193_v46, %v1829_v33  ;;  %5873 = vmatprep.mubr.msk.bf16.mxu1 %vm6415_vm0, %v9213_v4  ;;  %5969 = vmatprep.mubr.msk.bf16.mxu0 %vm6415_vm0, %v9213_v4  ;;  %v3843_v33 = vld [vmem:[%s9187_s2 + $0xc8] sm:$0xff] }
 0x241   : > { %3992 = vperm.xlu0 %6241, %v3844_v52   ;;  %3987 = vperm.xlu1 %6242, %v3843_v33   ;;  %v3845_v33 = vld [vmem:[%s9187_s2 + $0xd8] sm:$0xff] }
 0x242   : > { %v1638_v50 = vpop.f32.mrb[160].mxu1  ;;  %v2021_v62 = vpop.f32.mrb[160].mxu0 }
 0x243   : > { %v1751_v9 = vrot.slane %v1638_v50, 2  ;;  %v2140_v56 = vrot.slane %v2021_v62, 3  ;;  %v5651_v40 = vpop.f32.mrb[161].mxu1  ;;  %v5747_v42 = vpop.f32.mrb[161].mxu0  ;;  %v3846_v50 = vld [vmem:[%s9187_s2 + $0xe0] sm:$0xff] }
 0x244   : > { %v1641_v47 = vpop.f32.mrb[162].mxu1  ;;  %v2024_v17 = vpop.f32.mrb[162].mxu0  ;;  %v6363_v42 = vld [vmem:[%s6492_s6 + $0x78] sm:$0xff]  }
 0x245   : > { %v1798_v0 = vsel %vm1383_vm2, %v1750_v53, %v1751_v9  ;;  %v2192_v18 = vsel %vm2166_vm3, %v2139_v25, %v2140_v56  ;;  %v1752_v38 = vrot.slane %v1641_v47, 2  ;;  %v2141_v46 = vrot.slane %v2024_v17, 3  ;;  %v5748_v60 = vpop.f32.mrb[163].mxu0  ;;  %v5652_v52 = vpop.f32.mrb[163].mxu1  ;;  %4002 = vperm.xlu0 %6241, %v3846_v50   ;;  %3997 = vperm.xlu1 %6242, %v3845_v33  }
 0x246   : > { %v1832_v62 = vadd.f32 %v1798_v0, %v7325_v15  ;;  %v7844_v40 = vadd.f32 %v2192_v18, %v1830_v22  ;;  %v3848_v15 = vld [vmem:[%s9187_s2 + $0xf0] sm:$0xff] }
 0x247   : > { %v1797_v53 = vsel %vm1383_vm2, %v1751_v9, %v1752_v38  ;;  %v2191_v25 = vsel %vm2166_vm3, %v2140_v56, %v2141_v46  ;;  %5874 = vmatmul.mubr.bf16.gmra.mrb[12].mxu1 %v6363_v42  ;;  %5970 = vmatmul.mubr.bf16.gmra.mrb[12].mxu0 %v6362_v48 }
 0x248   : > { %v1833_v47 = vadd.f32 %v1797_v53, %v7334_v26  ;;  %v7855_v17 = vadd.f32 %v2191_v25, %v1831_v3  ;;  %5877 = vmatprep.mubr.msk.bf16.mxu1 %vm6415_vm0, %v9213_v4  ;;  %5973 = vmatprep.mubr.msk.bf16.mxu0 %vm6415_vm0, %v9213_v4  ;;  %v3847_v3 = vld [vmem:[%s9187_s2 + $0xe8] sm:$0xff] }
 0x249   : > { %4012 = vperm.xlu0 %6241, %v3848_v15   ;;  %4007 = vperm.xlu1 %6242, %v3847_v3   ;;  %v3849_v3 = vld [vmem:[%s9187_s2 + $0xf8] sm:$0xff] }
 0x24a   : > { %v1646_v22 = vpop.f32.mrb[164].mxu1  ;;  %v2029_v48 = vpop.f32.mrb[164].mxu0 }
 0x24b   : > { %v1753_v9 = vrot.slane %v1646_v22, 2  ;;  %v2142_v56 = vrot.slane %v2029_v48, 3  ;;  %v5655_v0 = vpop.f32.mrb[165].mxu1  ;;  %v5751_v26 = vpop.f32.mrb[165].mxu0  ;;  %v3850_v22 = vld [vmem:[%s9187_s2 + $0x100] sm:$0xff] }
 0x24c   : > { %v1649_v18 = vpop.f32.mrb[166].mxu1  ;;  %v2032_v60 = vpop.f32.mrb[166].mxu0  ;;  %v6364_v26 = vld [vmem:[%s6492_s6 + $0x80] sm:$0xff]  }
 0x24d   : > { %v1796_v52 = vsel %vm1383_vm2, %v1752_v38, %v1753_v9  ;;  %v2190_v50 = vsel %vm2166_vm3, %v2141_v46, %v2142_v56  ;;  %v1754_v53 = vrot.slane %v1649_v18, 2  ;;  %v2143_v25 = vrot.slane %v2032_v60, 3  ;;  %v5752_v33 = vpop.f32.mrb[167].mxu0  ;;  %v5656_v15 = vpop.f32.mrb[167].mxu1  ;;  %4022 = vperm.xlu0 %6241, %v3850_v22   ;;  %4017 = vperm.xlu1 %6242, %v3849_v3  }
 0x24e   : > { %v1834_v48 = vadd.f32 %v1796_v52, %v7340_v37  ;;  %v7875_v0 = vadd.f32 %v2190_v50, %v1832_v62  ;;  %v3852_v37 = vld [vmem:[%s9187_s2 + $0x110] sm:$0xff] }
 0x24f   : > { %v1795_v38 = vsel %vm1383_vm2, %v1753_v9, %v1754_v53  ;;  %v2189_v46 = vsel %vm2166_vm3, %v2142_v56, %v2143_v25  ;;  %5878 = vmatmul.mubr.bf16.gmra.mrb[16].mxu1 %v6364_v26  ;;  %5974 = vmatmul.mubr.bf16.gmra.mrb[16].mxu0 %v6363_v42 }
 0x250   : > { %v1835_v18 = vadd.f32 %v1795_v38, %v7349_v16  ;;  %v7886_v60 = vadd.f32 %v2189_v46, %v1833_v47  ;;  %5881 = vmatprep.mubr.msk.bf16.mxu1 %vm6415_vm0, %v9213_v4  ;;  %5977 = vmatprep.mubr.msk.bf16.mxu0 %vm6415_vm0, %v9213_v4  ;;  %v3851_v47 = vld [vmem:[%s9187_s2 + $0x108] sm:$0xff] }
 0x251   : > { %4032 = vperm.xlu0 %6241, %v3852_v37   ;;  %4027 = vperm.xlu1 %6242, %v3851_v47   ;;  %v3853_v47 = vld [vmem:[%s9187_s2 + $0x118] sm:$0xff] }
 0x252   : > { %v1654_v62 = vpop.f32.mrb[168].mxu1  ;;  %v2037_v42 = vpop.f32.mrb[168].mxu0 }
 0x253   : > { %v1755_v9 = vrot.slane %v1654_v62, 2  ;;  %v2144_v56 = vrot.slane %v2037_v42, 3  ;;  %v5659_v52 = vpop.f32.mrb[169].mxu1  ;;  %v5755_v16 = vpop.f32.mrb[169].mxu0  ;;  %v3854_v62 = vld [vmem:[%s9187_s2 + $0x120] sm:$0xff] }
 0x254   : > { %v1657_v50 = vpop.f32.mrb[170].mxu1  ;;  %v2040_v33 = vpop.f32.mrb[170].mxu0  ;;  %v6365_v16 = vld [vmem:[%s6492_s6 + $0x88] sm:$0xff]  }
 0x255   : > { %v1794_v15 = vsel %vm1383_vm2, %v1754_v53, %v1755_v9  ;;  %v2188_v22 = vsel %vm2166_vm3, %v2143_v25, %v2144_v56  ;;  %v1756_v38 = vrot.slane %v1657_v50, 2  ;;  %v2145_v46 = vrot.slane %v2040_v33, 3  ;;  %v5756_v3 = vpop.f32.mrb[171].mxu0  ;;  %v5660_v37 = vpop.f32.mrb[171].mxu1  ;;  %4042 = vperm.xlu0 %6241, %v3854_v62   ;;  %4037 = vperm.xlu1 %6242, %v3853_v47  }
 0x256   : > { %v1836_v42 = vadd.f32 %v1794_v15, %v7355_v61  ;;  %v7906_v52 = vadd.f32 %v2188_v22, %v1834_v48  ;;  %v3856_v61 = vld [vmem:[%s9187_s2 + $0x130] sm:$0xff] }
 0x257   : > { %v1793_v53 = vsel %vm1383_vm2, %v1755_v9, %v1756_v38  ;;  %v2187_v25 = vsel %vm2166_vm3, %v2144_v56, %v2145_v46  ;;  %5882 = vmatmul.mubr.bf16.gmra.mrb[20].mxu1 %v6365_v16  ;;  %5978 = vmatmul.mubr.bf16.gmra.mrb[20].mxu0 %v6364_v26 }
 0x258   : > { %v1837_v50 = vadd.f32 %v1793_v53, %v7364_v12  ;;  %v7917_v33 = vadd.f32 %v2187_v25, %v1835_v18  ;;  %5885 = vmatprep.mubr.msk.bf16.mxu1 %vm6415_vm0, %v9213_v4  ;;  %5981 = vmatprep.mubr.msk.bf16.mxu0 %vm6415_vm0, %v9213_v4  ;;  %v3855_v18 = vld [vmem:[%s9187_s2 + $0x128] sm:$0xff] }
 0x259   : > { %4052 = vperm.xlu0 %6241, %v3856_v61   ;;  %4047 = vperm.xlu1 %6242, %v3855_v18  }
 0x25a   : > { %9221 = vst [vmem:[#allocation2_spill] sm:$0xff] %v7917_v33  ;;  %v1662_v48 = vpop.f32.mrb[172].mxu1  ;;  %v2045_v26 = vpop.f32.mrb[172].mxu0  ;;  %v7941_v33 = vld [vmem:[%s6492_s6 + $0x90] sm:$0xff]  }
 0x25b   : > { %v1757_v9 = vrot.slane %v1662_v48, 2  ;;  %v2146_v56 = vrot.slane %v2045_v26, 3  ;;  %v5663_v15 = vpop.f32.mrb[173].mxu1  ;;  %v5759_v12 = vpop.f32.mrb[173].mxu0 }
 0x25c   : > { %v1665_v22 = vpop.f32.mrb[174].mxu1  ;;  %v2048_v3 = vpop.f32.mrb[174].mxu0 }
 0x25d   : > { %v1792_v37 = vsel %vm1383_vm2, %v1756_v38, %v1757_v9  ;;  %v2186_v62 = vsel %vm2166_vm3, %v2145_v46, %v2146_v56  ;;  %v1758_v53 = vrot.slane %v1665_v22, 2  ;;  %v2147_v25 = vrot.slane %v2048_v3, 3  ;;  %v5760_v47 = vpop.f32.mrb[175].mxu0  ;;  %v5664_v61 = vpop.f32.mrb[175].mxu1  ;;  %v3857_v38 = vld [vmem:[%s9187_s2 + $0x138] sm:$0xff] }
 0x25e   : > { %v1838_v48 = vadd.f32 %v1792_v37, %v7370_v55  ;;  %v7934_v26 = vadd.f32 %v2186_v62, %v1836_v42  ;;  %v3858_v42 = vld [vmem:[%s9187_s2 + $0x140] sm:$0xff]  ;;  %4057 = vperm.xlu1 %6242, %v3857_v38  }
 0x25f   : > { %v1791_v15 = vsel %vm1383_vm2, %v1757_v9, %v1758_v53  ;;  %v2185_v12 = vsel %vm2166_vm3, %v2146_v56, %v2147_v25  ;;  %5886 = vmatmul.mubr.bf16.gmra.mrb[24].mxu1 %v7941_v33  ;;  %5982 = vmatmul.mubr.bf16.gmra.mrb[24].mxu0 %v6365_v16 }
 0x260   : > { %v1839_v46 = vadd.f32 %v1791_v15, %v7379_v32  ;;  %v7948_v55 = vadd.f32 %v2185_v12, %v1837_v50  ;;  %5889 = vmatprep.mubr.msk.bf16.mxu1 %vm6415_vm0, %v9213_v4  ;;  %5985 = vmatprep.mubr.msk.bf16.mxu0 %vm6415_vm0, %v9213_v4 }
 0x261   : > { %4062 = vperm.xlu0 %6241, %v3858_v42  }
 0x262   : > { %v1670_v16 = vpop.f32.mrb[176].mxu1  ;;  %v2053_v9 = vpop.f32.mrb[176].mxu0 }
 0x263   : > { %v1759_v56 = vrot.slane %v1670_v16, 2  ;;  %v2148_v18 = vrot.slane %v2053_v9, 3  ;;  %v5667_v32 = vpop.f32.mrb[177].mxu1  ;;  %v5763_v50 = vpop.f32.mrb[177].mxu0 }
 0x264   : > { %v1673_v22 = vpop.f32.mrb[178].mxu1  ;;  %v2056_v3 = vpop.f32.mrb[178].mxu0  ;;  %v7969_v32 = vld [vmem:[%s6492_s6 + $0x98] sm:$0xff]  }
 0x265   : > { %v1790_v37 = vsel %vm1383_vm2, %v1758_v53, %v1759_v56  ;;  %v2184_v62 = vsel %vm2166_vm3, %v2147_v25, %v2148_v18  ;;  %v1760_v47 = vrot.slane %v1673_v22, 2  ;;  %v2149_v61 = vrot.slane %v2056_v3, 3  ;;  %v5764_v15 = vpop.f32.mrb[179].mxu0  ;;  %v5668_v12 = vpop.f32.mrb[179].mxu1  ;;  %v3859_v53 = vld [vmem:[%s9187_s2 + $0x148] sm:$0xff] }
 0x266   : > { %v1840_v38 = vadd.f32 %v1790_v37, %v7385_v14  ;;  %v7962_v42 = vadd.f32 %v2184_v62, %v1838_v48  ;;  %4067 = vperm.xlu1 %6242, %v3859_v53  }
 0x267   : > { %v1789_v16 = vsel %vm1383_vm2, %v1759_v56, %v1760_v47  ;;  %v2183_v9 = vsel %vm2166_vm3, %v2148_v18, %v2149_v61  ;;  %5890 = vmatmul.mubr.bf16.gmra.mrb[28].mxu1 %v7969_v32  ;;  %5986 = vmatmul.mubr.bf16.gmra.mrb[28].mxu0 %v7941_v33 }
 0x268   : > { %v1841_v14 = vadd.f32 %v1789_v16, %v7394_v58  ;;  %v7977_v25 = vadd.f32 %v2183_v9, %v1839_v46  ;;  %5893 = vmatprep.mubr.msk.bf16.mxu1 %vm6415_vm0, %v9213_v4  ;;  %5989 = vmatprep.mubr.msk.bf16.mxu0 %vm6415_vm0, %v9213_v4 }
 0x26a   : > { %9222 = vst [vmem:[#allocation3_spill] sm:$0xff] %v7977_v25  ;;  %v1678_v48 = vpop.f32.mrb[180].mxu1  ;;  %v2061_v56 = vpop.f32.mrb[180].mxu0 }
 0x26b   : > { %v1761_v18 = vrot.slane %v1678_v48, 2  ;;  %v2150_v50 = vrot.slane %v2061_v56, 3  ;;  %v5671_v22 = vpop.f32.mrb[181].mxu1  ;;  %v5767_v3 = vpop.f32.mrb[181].mxu0 }
 0x26c   : > { %v1681_v37 = vpop.f32.mrb[182].mxu1  ;;  %v2064_v62 = vpop.f32.mrb[182].mxu0  ;;  %v7995_v22 = vld [vmem:[%s6492_s6 + $0xa0] sm:$0xff]  }
 0x26d   : > { %v1788_v58 = vsel %vm1383_vm2, %v1760_v47, %v1761_v18  ;;  %v2182_v46 = vsel %vm2166_vm3, %v2149_v61, %v2150_v50  ;;  %v1762_v15 = vrot.slane %v1681_v37, 2  ;;  %v2151_v12 = vrot.slane %v2064_v62, 3  ;;  %v5768_v16 = vpop.f32.mrb[183].mxu0  ;;  %v5672_v9 = vpop.f32.mrb[183].mxu1 }
 0x26e   : > { %v1842_v53 = vadd.f32 %v1788_v58, %v7400_v35  ;;  %v7988_v25 = vadd.f32 %v2182_v46, %v1840_v38 }
 0x26f   : > { %v1787_v48 = vsel %vm1383_vm2, %v1761_v18, %v1762_v15  ;;  %v2181_v56 = vsel %vm2166_vm3, %v2150_v50, %v2151_v12  ;;  %5894 = vmatmul.mubr.bf16.gmra.mrb[32].mxu1 %v7995_v22  ;;  %5990 = vmatmul.mubr.bf16.gmra.mrb[32].mxu0 %v7969_v32 }
 0x270   : > { %v1843_v47 = vadd.f32 %v1787_v48, %v7409_v19  ;;  %v8000_v61 = vadd.f32 %v2181_v56, %v1841_v14  ;;  %5993 = vmatprep.mubr.msk.bf16.mxu0 %vm6415_vm0, %v9213_v4  ;;  %6013 = vmatprep.mubr.msk.bf16.mxu1 %vm6415_vm0, %v9213_v4 }
 0x272   : > { %9223 = vst [vmem:[#allocation4_spill] sm:$0xff] %v8000_v61  ;;  %v1686_v35 = vpop.f32.mrb[184].mxu1  ;;  %v2069_v38 = vpop.f32.mrb[184].mxu0 }
 0x273   : > { %v1763_v18 = vrot.slane %v1686_v35, 2  ;;  %v2152_v50 = vrot.slane %v2069_v38, 3  ;;  %v5675_v3 = vpop.f32.mrb[185].mxu1  ;;  %v5771_v37 = vpop.f32.mrb[185].mxu0 }
 0x274   : > { %v1689_v62 = vpop.f32.mrb[186].mxu1  ;;  %v2072_v58 = vpop.f32.mrb[186].mxu0 }
 0x275   : > { %v1786_v19 = vsel %vm1383_vm2, %v1762_v15, %v1763_v18  ;;  %v2180_v14 = vsel %vm2166_vm3, %v2151_v12, %v2152_v50  ;;  %v1764_v46 = vrot.slane %v1689_v62, 2  ;;  %v2153_v16 = vrot.slane %v2072_v58, 3  ;;  %v5772_v9 = vpop.f32.mrb[187].mxu0  ;;  %v5676_v48 = vpop.f32.mrb[187].mxu1  ;;  %v6369_v15 = vld [vmem:[%s6492_s6] sm:$0xff]  }
 0x276   : > { %v1844_v56 = vadd.f32 %v1786_v19, %v7420_v59  ;;  %v8011_v61 = vadd.f32 %v2180_v14, %v1842_v53 }
 0x277   : > { %v1785_v35 = vsel %vm1383_vm2, %v1763_v18, %v1764_v46  ;;  %v2179_v38 = vsel %vm2166_vm3, %v2152_v50, %v2153_v16  ;;  %5994 = vmatmul.mubr.bf16.gmra.mrb[36].mxu0 %v7995_v22  ;;  %6014 = vmatmul.mubr.bf16.vlgmr.msra.gmra.mrb[36].mxu1 %v6369_v15 }
 0x278   : > { %v1845_v12 = vadd.f32 %v1785_v35, %v7429_v13  ;;  %v8020_v3 = vadd.f32 %v2179_v38, %v1843_v47  ;;  %6017 = vmatprep.mubr.msk.bf16.mxu1 %vm6415_vm0, %v9213_v4  ;;  %6113 = vmatprep.mubr.msk.bf16.mxu0 %vm6415_vm0, %v9213_v4 }
 0x27a   : > { %9224 = vst [vmem:[#allocation5_spill] sm:$0xff] %v8020_v3  ;;  %v1694_v59 = vpop.f32.mrb[188].mxu1  ;;  %v2077_v53 = vpop.f32.mrb[188].mxu0 }
 0x27b   : > { %v1765_v18 = vrot.slane %v1694_v59, 2  ;;  %v2154_v37 = vrot.slane %v2077_v53, 3  ;;  %v5679_v50 = vpop.f32.mrb[189].mxu1  ;;  %v5775_v62 = vpop.f32.mrb[189].mxu0 }
 0x27c   : > { %v1697_v58 = vpop.f32.mrb[190].mxu1  ;;  %v2080_v19 = vpop.f32.mrb[190].mxu0  ;;  %v6370_v50 = vld [vmem:[%s6492_s6 + $0x8] sm:$0xff]  }
 0x27d   : > { %v1784_v13 = vsel %vm1383_vm2, %v1764_v46, %v1765_v18  ;;  %v2178_v47 = vsel %vm2166_vm3, %v2153_v16, %v2154_v37  ;;  %v1766_v14 = vrot.slane %v1697_v58, 2  ;;  %v2155_v9 = vrot.slane %v2080_v19, 3  ;;  %v5776_v48 = vpop.f32.mrb[191].mxu0  ;;  %v5680_v35 = vpop.f32.mrb[191].mxu1 }
 0x27e   : > { %v1846_v38 = vadd.f32 %v1784_v13, %v7448_v29  ;;  %v8031_v3 = vadd.f32 %v2178_v47, %v1844_v56 }
 0x27f   : > { %v1783_v59 = vsel %vm1383_vm2, %v1765_v18, %v1766_v14  ;;  %v2177_v53 = vsel %vm2166_vm3, %v2154_v37, %v2155_v9  ;;  %6018 = vmatmul.mubr.bf16.gmra.mrb[40].mxu1 %v6370_v50  ;;  %6114 = vmatmul.mubr.bf16.vlgmr.msra.gmra.mrb[40].mxu0 %v6369_v15 }
 0x280   : > { %v1847_v46 = vadd.f32 %v1783_v59, %v7458_v6  ;;  %v8039_v16 = vadd.f32 %v2177_v53, %v1845_v12  ;;  %6021 = vmatprep.mubr.msk.bf16.mxu1 %vm6415_vm0, %v9213_v4  ;;  %6117 = vmatprep.mubr.msk.bf16.mxu0 %vm6415_vm0, %v9213_v4 }
 0x282   : > { %v1702_v29 = vpop.f32.mrb[192].mxu1  ;;  %v2085_v56 = vpop.f32.mrb[192].mxu0 }
 0x283   : > { %v1767_v62 = vrot.slane %v1702_v29, 2  ;;  %v2156_v18 = vrot.slane %v2085_v56, 3  ;;  %v5683_v58 = vpop.f32.mrb[193].mxu1  ;;  %v5779_v37 = vpop.f32.mrb[193].mxu0 }
 0x284   : > { %v1705_v19 = vpop.f32.mrb[194].mxu1  ;;  %v2088_v13 = vpop.f32.mrb[194].mxu0  ;;  %v6371_v58 = vld [vmem:[%s6492_s6 + $0x10] sm:$0xff]  }
 0x285   : > { %v1782_v6 = vsel %vm1383_vm2, %v1766_v14, %v1767_v62  ;;  %v2176_v15 = vsel %vm2166_vm3, %v2155_v9, %v2156_v18  ;;  %v1768_v12 = vrot.slane %v1705_v19, 2  ;;  %v2157_v47 = vrot.slane %v2088_v13, 3  ;;  %v5780_v48 = vpop.f32.mrb[195].mxu0  ;;  %v5684_v35 = vpop.f32.mrb[195].mxu1 }
 0x286   : > { %v1848_v59 = vadd.f32 %v1782_v6, %v7481_v45  ;;  %v8050_v53 = vadd.f32 %v2176_v15, %v1846_v38 }
 0x287   : > { %v1781_v29 = vsel %vm1383_vm2, %v1767_v62, %v1768_v12  ;;  %v2175_v56 = vsel %vm2166_vm3, %v2156_v18, %v2157_v47  ;;  %6022 = vmatmul.mubr.bf16.gmra.mrb[44].mxu1 %v6371_v58  ;;  %6118 = vmatmul.mubr.bf16.gmra.mrb[44].mxu0 %v6370_v50 }
 0x288   : > { %v1849_v14 = vadd.f32 %v1781_v29, %v7490_v23  ;;  %v8058_v9 = vadd.f32 %v2175_v56, %v1847_v46  ;;  %6025 = vmatprep.mubr.msk.bf16.mxu1 %vm6415_vm0, %v9213_v4  ;;  %6121 = vmatprep.mubr.msk.bf16.mxu0 %vm6415_vm0, %v9213_v4 }
 0x28a   : > { %v1710_v45 = vpop.f32.mrb[196].mxu1  ;;  %v2093_v38 = vpop.f32.mrb[196].mxu0 }
 0x28b   : > { %v1769_v37 = vrot.slane %v1710_v45, 2  ;;  %v2158_v62 = vrot.slane %v2093_v38, 3  ;;  %v5687_v19 = vpop.f32.mrb[197].mxu1  ;;  %v5783_v18 = vpop.f32.mrb[197].mxu0 }
 0x28c   : > { %v1713_v13 = vpop.f32.mrb[198].mxu1  ;;  %v2096_v6 = vpop.f32.mrb[198].mxu0  ;;  %v6372_v19 = vld [vmem:[%s6492_s6 + $0x18] sm:$0xff]  }
 0x28d   : > { %v1780_v23 = vsel %vm1383_vm2, %v1768_v12, %v1769_v37  ;;  %v2174_v50 = vsel %vm2166_vm3, %v2157_v47, %v2158_v62  ;;  %v1770_v46 = vrot.slane %v1713_v13, 2  ;;  %v2159_v15 = vrot.slane %v2096_v6, 3  ;;  %v5784_v48 = vpop.f32.mrb[199].mxu0  ;;  %v5688_v35 = vpop.f32.mrb[199].mxu1 }
 0x28e   : > { %v1850_v29 = vadd.f32 %v1780_v23, %v7515_v10  ;;  %v8069_v56 = vadd.f32 %v2174_v50, %v1848_v59 }
 0x28f   : > { %v1779_v45 = vsel %vm1383_vm2, %v1769_v37, %v1770_v46  ;;  %v2173_v38 = vsel %vm2166_vm3, %v2158_v62, %v2159_v15  ;;  %6026 = vmatmul.mubr.bf16.gmra.mrb[48].mxu1 %v6372_v19  ;;  %6122 = vmatmul.mubr.bf16.gmra.mrb[48].mxu0 %v6371_v58 }
 0x290   : > { %v1851_v12 = vadd.f32 %v1779_v45, %v7524_v36  ;;  %v8077_v47 = vadd.f32 %v2173_v38, %v1849_v14  ;;  %6029 = vmatprep.mubr.msk.bf16.mxu1 %vm6415_vm0, %v9213_v4  ;;  %6125 = vmatprep.mubr.msk.bf16.mxu0 %vm6415_vm0, %v9213_v4 }
 0x292   : > { %v1718_v10 = vpop.f32.mrb[200].mxu1  ;;  %v2101_v59 = vpop.f32.mrb[200].mxu0 }
 0x293   : > { %v1771_v18 = vrot.slane %v1718_v10, 2  ;;  %v2160_v37 = vrot.slane %v2101_v59, 3  ;;  %v5691_v13 = vpop.f32.mrb[201].mxu1  ;;  %v5787_v62 = vpop.f32.mrb[201].mxu0 }
 0x294   : > { %v1721_v6 = vpop.f32.mrb[202].mxu1  ;;  %v2104_v23 = vpop.f32.mrb[202].mxu0  ;;  %v6373_v13 = vld [vmem:[%s6492_s6 + $0x20] sm:$0xff]  }
 0x295   : > { %v1778_v36 = vsel %vm1383_vm2, %v1770_v46, %v1771_v18  ;;  %v2172_v58 = vsel %vm2166_vm3, %v2159_v15, %v2160_v37  ;;  %v1772_v14 = vrot.slane %v1721_v6, 2  ;;  %v2161_v50 = vrot.slane %v2104_v23, 3  ;;  %v5788_v48 = vpop.f32.mrb[203].mxu0  ;;  %v5692_v35 = vpop.f32.mrb[203].mxu1 }
 0x296   : > { %v1852_v45 = vadd.f32 %v1778_v36, %v7544_v8  ;;  %v8088_v38 = vadd.f32 %v2172_v58, %v1850_v29 }
 0x297   : > { %v1777_v10 = vsel %vm1383_vm2, %v1771_v18, %v1772_v14  ;;  %v2171_v59 = vsel %vm2166_vm3, %v2160_v37, %v2161_v50  ;;  %6030 = vmatmul.mubr.bf16.gmra.mrb[52].mxu1 %v6373_v13  ;;  %6126 = vmatmul.mubr.bf16.gmra.mrb[52].mxu0 %v6372_v19 }
 0x298   : > { %v1853_v46 = vadd.f32 %v1777_v10, %v7553_v34  ;;  %v8096_v15 = vadd.f32 %v2171_v59, %v1851_v12  ;;  %6033 = vmatprep.mubr.msk.bf16.mxu1 %vm6415_vm0, %v9213_v4  ;;  %6129 = vmatprep.mubr.msk.bf16.mxu0 %vm6415_vm0, %v9213_v4 }
 0x29a   : > { %v1726_v8 = vpop.f32.mrb[204].mxu1  ;;  %v2109_v29 = vpop.f32.mrb[204].mxu0 }
 0x29b   : > { %v1773_v62 = vrot.slane %v1726_v8, 2  ;;  %v2162_v18 = vrot.slane %v2109_v29, 3  ;;  %v5695_v6 = vpop.f32.mrb[205].mxu1  ;;  %v5791_v37 = vpop.f32.mrb[205].mxu0  ;;  %v9225_v29 = vrot.slane %v7580_v54, 2 }
 0x29c   : > { %v1729_v23 = vpop.f32.mrb[206].mxu1  ;;  %v2112_v36 = vpop.f32.mrb[206].mxu0 }
 0x29d   : > { %v1776_v34 = vsel %vm1383_vm2, %v1772_v14, %v1773_v62  ;;  %v2170_v19 = vsel %vm2166_vm3, %v2161_v50, %v2162_v18  ;;  %v1774_v12 = vrot.slane %v1729_v23, 2  ;;  %v2163_v58 = vrot.slane %v2112_v36, 3  ;;  %v5792_v48 = vpop.f32.mrb[207].mxu0  ;;  %v5696_v35 = vpop.f32.mrb[207].mxu1  ;;  %v6374_v50 = vld [vmem:[%s6492_s6 + $0x28] sm:$0xff]  }
 0x29e   : > { %v1854_v10 = vadd.f32 %v1776_v34, %v7569_v20  ;;  %v8107_v59 = vadd.f32 %v2170_v19, %v1852_v45 }
 0x29f   : > { %v1775_v8 = vsel %vm1383_vm2, %v1773_v62, %v1774_v12  ;;  %v1816_v6 = vsel %vm1383_vm2, %v1774_v12, %v9225_v29  ;;  %v2169_v14 = vsel %vm2166_vm3, %v2162_v18, %v2163_v58  ;;  %6034 = vmatmul.mubr.bf16.gmra.mrb[56].mxu1 %v6374_v50  ;;  %6130 = vmatmul.mubr.bf16.gmra.mrb[56].mxu0 %v6373_v13  ;;  %v9226_v29 = vrot.slane %v7602_v21, 3 }
 0x2a0   : > { %v1855_v37 = vadd.f32 %v1775_v8, %v7578_v1  ;;  %v1856_v20 = vadd.f32 %v1816_v6, %v7585_v7  ;;  %v8120_v45 = vadd.f32 %v2169_v14, %v1853_v46  ;;  %6037 = vmatprep.mubr.msk.bf16.mxu1 %vm6415_vm0, %v9213_v4  ;;  %6133 = vmatprep.mubr.msk.bf16.mxu0 %vm6415_vm0, %v9213_v4 }
 0x2a2   : > { %v2117_v54 = vpop.f32.mrb[208].mxu0  ;;  %v8126_v62 = vpop.f32.mrb[208].mxu1 }
 0x2a3   : > { %v2164_v23 = vrot.slane %v2117_v54, 3  ;;  %v9203_v18 = vrot.slane %v8126_v62, 4  ;;  %v5795_v13 = vpop.f32.mrb[209].mxu0  ;;  %v5815_v36 = vpop.f32.mrb[209].mxu1 }
 0x2a4   : > { %v2120_v1 = vpop.f32.mrb[210].mxu0  ;;  %v2352_v34 = vpop.f32.mrb[210].mxu1 }
 0x2a5   : > { %v2168_v7 = vsel %vm2166_vm3, %v2163_v58, %v2164_v23  ;;  %v2165_v46 = vrot.slane %v2120_v1, 3  ;;  %v2517_v19 = vrot.slane %v2352_v34, 4  ;;  %v5796_v12 = vpop.f32.mrb[211].mxu0  ;;  %v5816_v48 = vpop.f32.mrb[211].mxu1  ;;  %v6375_v58 = vld [vmem:[%s6492_s6 + $0x30] sm:$0xff]  }
 0x2a6   : > { %v8132_v35 = vadd.f32 %v2168_v7, %v1854_v10 }
 0x2a7   : > { %v2167_v8 = vsel %vm2166_vm3, %v2164_v23, %v2165_v46  ;;  %v2208_v6 = vsel %vm2166_vm3, %v2165_v46, %v9226_v29  ;;  %v2599_v14 = vsel %vm2558_vm4, %v9203_v18, %v2517_v19  ;;  %6038 = vmatmul.mubr.bf16.gmra.mrb[60].mxu1 %v6375_v58  ;;  %6134 = vmatmul.mubr.bf16.gmra.mrb[60].mxu0 %v6374_v50 }
 0x2a8   : > { %v8145_v54 = vadd.f32 %v2167_v8, %v1855_v37  ;;  %v8147_v10 = vadd.f32 %v2208_v6, %v1856_v20  ;;  %v2641_v13 = vadd.f32 %v2599_v14, %v7616_v41  ;;  %6041 = vmatprep.mubr.msk.bf16.mxu1 %vm6415_vm0, %v9213_v4  ;;  %6137 = vmatprep.mubr.msk.bf16.mxu0 %vm6415_vm0, %v9213_v4  ;;  %v6376_v14 = vld [vmem:[%s6492_s6 + $0x38] sm:$0xff]  }
 0x2aa   : > { %v2357_v21 = vpop.f32.mrb[212].mxu1  ;;  %v8154_v23 = vpop.f32.mrb[212].mxu0 }
 0x2ab   : > { %9227 = vst [vmem:[#allocation6_spill] sm:$0xff] %v8154_v23  ;;  %v2518_v36 = vrot.slane %v2357_v21, 4  ;;  %v5819_v1 = vpop.f32.mrb[213].mxu1  ;;  %v5915_v34 = vpop.f32.mrb[213].mxu0  ;;  %v9202_v41 = vrot.slane %v8154_v23, 4 }
 0x2ac   : > { %v2360_v50 = vpop.f32.mrb[214].mxu1  ;;  %v2744_v37 = vpop.f32.mrb[214].mxu0 }
 0x2ad   : > { %v2598_v20 = vsel %vm2558_vm4, %v2517_v19, %v2518_v36  ;;  %v2519_v7 = vrot.slane %v2360_v50, 4  ;;  %v2909_v46 = vrot.slane %v2744_v37, 4  ;;  %v5916_v12 = vpop.f32.mrb[215].mxu0  ;;  %v5820_v48 = vpop.f32.mrb[215].mxu1 }
 0x2ae   : > { %v2642_v8 = vadd.f32 %v2598_v20, %v7630_v51 }
 0x2af   : > { %v2597_v29 = vsel %vm2558_vm4, %v2518_v36, %v2519_v7  ;;  %v8166_v6 = vsel %vm2558_vm4, %v9202_v41, %v2909_v46  ;;  %6042 = vmatmul.mubr.bf16.gmra.mrb[64].mxu1 %v6376_v14  ;;  %6138 = vmatmul.mubr.bf16.gmra.mrb[64].mxu0 %v6375_v58 }
 0x2b0   : > { %v2601_v19 = vadd.f32 %v2597_v29, %v7638_v44  ;;  %6045 = vmatprep.mubr.msk.bf16.mxu1 %vm6415_vm0, %v9213_v4  ;;  %6141 = vmatprep.mubr.msk.bf16.mxu0 %vm6415_vm0, %v9213_v4 }
 0x2b2   : > { %v2365_v51 = vpop.f32.mrb[216].mxu1  ;;  %v2749_v21 = vpop.f32.mrb[216].mxu0 }
 0x2b3   : > { %v2520_v36 = vrot.slane %v2365_v51, 4  ;;  %v2910_v1 = vrot.slane %v2749_v21, 4  ;;  %v5823_v34 = vpop.f32.mrb[217].mxu1  ;;  %v5919_v50 = vpop.f32.mrb[217].mxu0 }
 0x2b4   : > { %v2368_v37 = vpop.f32.mrb[218].mxu1  ;;  %v2752_v20 = vpop.f32.mrb[218].mxu0  ;;  %v6377_v34 = vld [vmem:[%s6492_s6 + $0x40] sm:$0xff]  }
 0x2b5   : > { %v2596_v58 = vsel %vm2558_vm4, %v2519_v7, %v2520_v36  ;;  %v8178_v44 = vsel %vm2558_vm4, %v2909_v46, %v2910_v1  ;;  %v2521_v12 = vrot.slane %v2368_v37, 4  ;;  %v2911_v48 = vrot.slane %v2752_v20, 4  ;;  %v5920_v29 = vpop.f32.mrb[219].mxu0  ;;  %v5824_v41 = vpop.f32.mrb[219].mxu1 }
 0x2b6   : > { %v2602_v18 = vadd.f32 %v2596_v58, %v7658_v28 }
 0x2b7   : > { %v2595_v51 = vsel %vm2558_vm4, %v2520_v36, %v2521_v12  ;;  %v2988_v21 = vsel %vm2558_vm4, %v2910_v1, %v2911_v48  ;;  %6046 = vmatmul.mubr.bf16.gmra.mrb[68].mxu1 %v6377_v34  ;;  %6142 = vmatmul.mubr.bf16.gmra.mrb[68].mxu0 %v6376_v14 }
 0x2b8   : > { %v2603_v7 = vadd.f32 %v2595_v51, %v7669_v31  ;;  %v8187_v50 = vadd.f32 %v2988_v21, %v2641_v13  ;;  %6049 = vmatprep.mubr.msk.bf16.mxu1 %vm6415_vm0, %v9213_v4  ;;  %6145 = vmatprep.mubr.msk.bf16.mxu0 %vm6415_vm0, %v9213_v4 }
 0x2ba   : > { %9228 = vst [vmem:[#allocation7_spill] sm:$0xff] %v8187_v50  ;;  %v2373_v28 = vpop.f32.mrb[220].mxu1  ;;  %v2757_v41 = vpop.f32.mrb[220].mxu0 }
 0x2bb   : > { %v2522_v46 = vrot.slane %v2373_v28, 4  ;;  %v2912_v36 = vrot.slane %v2757_v41, 4  ;;  %v5827_v37 = vpop.f32.mrb[221].mxu1  ;;  %v5923_v1 = vpop.f32.mrb[221].mxu0 }
 0x2bc   : > { %v2376_v20 = vpop.f32.mrb[222].mxu1  ;;  %v2760_v58 = vpop.f32.mrb[222].mxu0  ;;  %v6378_v37 = vld [vmem:[%s6492_s6 + $0x48] sm:$0xff]  }
 0x2bd   : > { %v2594_v31 = vsel %vm2558_vm4, %v2521_v12, %v2522_v46  ;;  %v2987_v13 = vsel %vm2558_vm4, %v2911_v48, %v2912_v36  ;;  %v2523_v14 = vrot.slane %v2376_v20, 4  ;;  %v2913_v29 = vrot.slane %v2760_v58, 4  ;;  %v5924_v51 = vpop.f32.mrb[223].mxu0  ;;  %v5828_v21 = vpop.f32.mrb[223].mxu1 }
 0x2be   : > { %v2604_v50 = vadd.f32 %v2594_v31, %v7689_v49  ;;  %v8198_v23 = vadd.f32 %v2987_v13, %v2642_v8 }
 0x2bf   : > { %v2593_v28 = vsel %vm2558_vm4, %v2522_v46, %v2523_v14  ;;  %v2986_v41 = vsel %vm2558_vm4, %v2912_v36, %v2913_v29  ;;  %6050 = vmatmul.mubr.bf16.gmra.mrb[72].mxu1 %v6378_v37  ;;  %6146 = vmatmul.mubr.bf16.gmra.mrb[72].mxu0 %v6377_v34 }
 0x2c0   : > { %v2605_v12 = vadd.f32 %v2593_v28, %v7700_v43  ;;  %v8206_v48 = vadd.f32 %v2986_v41, %v2601_v19  ;;  %6053 = vmatprep.mubr.msk.bf16.mxu1 %vm6415_vm0, %v9213_v4  ;;  %6149 = vmatprep.mubr.msk.bf16.mxu0 %vm6415_vm0, %v9213_v4 }
 0x2c2   : > { %v2381_v49 = vpop.f32.mrb[224].mxu1  ;;  %v2765_v8 = vpop.f32.mrb[224].mxu0 }
 0x2c3   : > { %v2524_v1 = vrot.slane %v2381_v49, 4  ;;  %v2914_v46 = vrot.slane %v2765_v8, 4  ;;  %v5831_v20 = vpop.f32.mrb[225].mxu1  ;;  %v5927_v36 = vpop.f32.mrb[225].mxu0 }
 0x2c4   : > { %v2384_v58 = vpop.f32.mrb[226].mxu1  ;;  %v2768_v31 = vpop.f32.mrb[226].mxu0  ;;  %v6379_v20 = vld [vmem:[%s6492_s6 + $0x50] sm:$0xff]  }
 0x2c5   : > { %v2592_v43 = vsel %vm2558_vm4, %v2523_v14, %v2524_v1  ;;  %v2985_v19 = vsel %vm2558_vm4, %v2913_v29, %v2914_v46  ;;  %v2525_v34 = vrot.slane %v2384_v58, 4  ;;  %v2915_v13 = vrot.slane %v2768_v31, 4  ;;  %v5928_v51 = vpop.f32.mrb[227].mxu0  ;;  %v5832_v21 = vpop.f32.mrb[227].mxu1 }
 0x2c6   : > { %v2606_v28 = vadd.f32 %v2592_v43, %v7720_v63  ;;  %v8217_v41 = vadd.f32 %v2985_v19, %v2602_v18 }
 0x2c7   : > { %v2591_v49 = vsel %vm2558_vm4, %v2524_v1, %v2525_v34  ;;  %v2984_v8 = vsel %vm2558_vm4, %v2914_v46, %v2915_v13  ;;  %6054 = vmatmul.mubr.bf16.gmra.mrb[76].mxu1 %v6379_v20  ;;  %6150 = vmatmul.mubr.bf16.gmra.mrb[76].mxu0 %v6378_v37 }
 0x2c8   : > { %v2607_v14 = vadd.f32 %v2591_v49, %v7731_v57  ;;  %v8225_v29 = vadd.f32 %v2984_v8, %v2603_v7  ;;  %6057 = vmatprep.mubr.msk.bf16.mxu1 %vm6415_vm0, %v9213_v4  ;;  %6153 = vmatprep.mubr.msk.bf16.mxu0 %vm6415_vm0, %v9213_v4 }
 0x2ca   : > { %v2389_v63 = vpop.f32.mrb[228].mxu1  ;;  %v2773_v18 = vpop.f32.mrb[228].mxu0 }
 0x2cb   : > { %v2526_v36 = vrot.slane %v2389_v63, 4  ;;  %v2916_v1 = vrot.slane %v2773_v18, 4  ;;  %v5835_v58 = vpop.f32.mrb[229].mxu1  ;;  %v5931_v46 = vpop.f32.mrb[229].mxu0 }
 0x2cc   : > { %v2392_v31 = vpop.f32.mrb[230].mxu1  ;;  %v2776_v43 = vpop.f32.mrb[230].mxu0  ;;  %v6380_v58 = vld [vmem:[%s6492_s6 + $0x58] sm:$0xff]  }
 0x2cd   : > { %v2590_v57 = vsel %vm2558_vm4, %v2525_v34, %v2526_v36  ;;  %v2983_v7 = vsel %vm2558_vm4, %v2915_v13, %v2916_v1  ;;  %v2527_v37 = vrot.slane %v2392_v31, 4  ;;  %v2917_v19 = vrot.slane %v2776_v43, 4  ;;  %v5932_v51 = vpop.f32.mrb[231].mxu0  ;;  %v5836_v21 = vpop.f32.mrb[231].mxu1 }
 0x2ce   : > { %v2608_v49 = vadd.f32 %v2590_v57, %v7751_v24  ;;  %v8236_v8 = vadd.f32 %v2983_v7, %v2604_v50 }
 0x2cf   : > { %v2589_v63 = vsel %vm2558_vm4, %v2526_v36, %v2527_v37  ;;  %v2982_v18 = vsel %vm2558_vm4, %v2916_v1, %v2917_v19  ;;  %6058 = vmatmul.mubr.bf16.gmra.mrb[80].mxu1 %v6380_v58  ;;  %6154 = vmatmul.mubr.bf16.gmra.mrb[80].mxu0 %v6379_v20 }
 0x2d0   : > { %v2609_v34 = vadd.f32 %v2589_v63, %v7762_v11  ;;  %v8244_v13 = vadd.f32 %v2982_v18, %v2605_v12  ;;  %6061 = vmatprep.mubr.msk.bf16.mxu1 %vm6415_vm0, %v9213_v4  ;;  %6157 = vmatprep.mubr.msk.bf16.mxu0 %vm6415_vm0, %v9213_v4 }
 0x2d2   : > { %v2397_v24 = vpop.f32.mrb[232].mxu1  ;;  %v2781_v50 = vpop.f32.mrb[232].mxu0 }
 0x2d3   : > { %v2528_v46 = vrot.slane %v2397_v24, 4  ;;  %v2918_v36 = vrot.slane %v2781_v50, 4  ;;  %v5839_v31 = vpop.f32.mrb[233].mxu1  ;;  %v5935_v1 = vpop.f32.mrb[233].mxu0 }
 0x2d4   : > { %v2400_v43 = vpop.f32.mrb[234].mxu1  ;;  %v2784_v57 = vpop.f32.mrb[234].mxu0  ;;  %v6381_v31 = vld [vmem:[%s6492_s6 + $0x60] sm:$0xff]  }
 0x2d5   : > { %v2588_v11 = vsel %vm2558_vm4, %v2527_v37, %v2528_v46  ;;  %v2981_v12 = vsel %vm2558_vm4, %v2917_v19, %v2918_v36  ;;  %v2529_v20 = vrot.slane %v2400_v43, 4  ;;  %v2919_v7 = vrot.slane %v2784_v57, 4  ;;  %v5936_v51 = vpop.f32.mrb[235].mxu0  ;;  %v5840_v21 = vpop.f32.mrb[235].mxu1 }
 0x2d6   : > { %v2610_v63 = vadd.f32 %v2588_v11, %v7782_v39  ;;  %v8255_v18 = vadd.f32 %v2981_v12, %v2606_v28 }
 0x2d7   : > { %v2587_v24 = vsel %vm2558_vm4, %v2528_v46, %v2529_v20  ;;  %v2980_v50 = vsel %vm2558_vm4, %v2918_v36, %v2919_v7  ;;  %6062 = vmatmul.mubr.bf16.gmra.mrb[84].mxu1 %v6381_v31  ;;  %6158 = vmatmul.mubr.bf16.gmra.mrb[84].mxu0 %v6380_v58 }
 0x2d8   : > { %v2611_v37 = vadd.f32 %v2587_v24, %v7793_v30  ;;  %v8263_v19 = vadd.f32 %v2980_v50, %v2607_v14  ;;  %6065 = vmatprep.mubr.msk.bf16.mxu1 %vm6415_vm0, %v9213_v4  ;;  %6161 = vmatprep.mubr.msk.bf16.mxu0 %vm6415_vm0, %v9213_v4 }
 0x2da   : > { %v2405_v39 = vpop.f32.mrb[236].mxu1  ;;  %v2789_v28 = vpop.f32.mrb[236].mxu0 }
 0x2db   : > { %v2530_v1 = vrot.slane %v2405_v39, 4  ;;  %v2920_v46 = vrot.slane %v2789_v28, 4  ;;  %v5843_v43 = vpop.f32.mrb[237].mxu1  ;;  %v5939_v36 = vpop.f32.mrb[237].mxu0 }
 0x2dc   : > { %v2408_v57 = vpop.f32.mrb[238].mxu1  ;;  %v2792_v11 = vpop.f32.mrb[238].mxu0  ;;  %v6382_v43 = vld [vmem:[%s6492_s6 + $0x68] sm:$0xff]  }
 0x2dd   : > { %v2586_v30 = vsel %vm2558_vm4, %v2529_v20, %v2530_v1  ;;  %v2979_v14 = vsel %vm2558_vm4, %v2919_v7, %v2920_v46  ;;  %v2531_v58 = vrot.slane %v2408_v57, 4  ;;  %v2921_v12 = vrot.slane %v2792_v11, 4  ;;  %v5940_v51 = vpop.f32.mrb[239].mxu0  ;;  %v5844_v21 = vpop.f32.mrb[239].mxu1 }
 0x2de   : > { %v2612_v24 = vadd.f32 %v2586_v30, %v7813_v5  ;;  %v8274_v50 = vadd.f32 %v2979_v14, %v2608_v49 }
 0x2df   : > { %v2585_v39 = vsel %vm2558_vm4, %v2530_v1, %v2531_v58  ;;  %v2978_v28 = vsel %vm2558_vm4, %v2920_v46, %v2921_v12  ;;  %6066 = vmatmul.mubr.bf16.gmra.mrb[88].mxu1 %v6382_v43  ;;  %6162 = vmatmul.mubr.bf16.gmra.mrb[88].mxu0 %v6381_v31 }
 0x2e0   : > { %v2613_v20 = vadd.f32 %v2585_v39, %v7824_v27  ;;  %v8282_v7 = vadd.f32 %v2978_v28, %v2609_v34  ;;  %6069 = vmatprep.mubr.msk.bf16.mxu1 %vm6415_vm0, %v9213_v4  ;;  %6165 = vmatprep.mubr.msk.bf16.mxu0 %vm6415_vm0, %v9213_v4 }
 0x2e2   : > { %v2413_v5 = vpop.f32.mrb[240].mxu1  ;;  %v2797_v49 = vpop.f32.mrb[240].mxu0 }
 0x2e3   : > { %v2532_v36 = vrot.slane %v2413_v5, 4  ;;  %v2922_v1 = vrot.slane %v2797_v49, 4  ;;  %v5847_v57 = vpop.f32.mrb[241].mxu1  ;;  %v5943_v46 = vpop.f32.mrb[241].mxu0 }
 0x2e4   : > { %v2416_v11 = vpop.f32.mrb[242].mxu1  ;;  %v2800_v30 = vpop.f32.mrb[242].mxu0  ;;  %v6383_v57 = vld [vmem:[%s6492_s6 + $0x70] sm:$0xff]  }
 0x2e5   : > { %v2584_v27 = vsel %vm2558_vm4, %v2531_v58, %v2532_v36  ;;  %v2977_v34 = vsel %vm2558_vm4, %v2921_v12, %v2922_v1  ;;  %v2533_v31 = vrot.slane %v2416_v11, 4  ;;  %v2923_v14 = vrot.slane %v2800_v30, 4  ;;  %v5944_v51 = vpop.f32.mrb[243].mxu0  ;;  %v5848_v21 = vpop.f32.mrb[243].mxu1 }
 0x2e6   : > { %v2614_v39 = vadd.f32 %v2584_v27, %v7844_v40  ;;  %v8293_v28 = vadd.f32 %v2977_v34, %v2610_v63 }
 0x2e7   : > { %v2583_v5 = vsel %vm2558_vm4, %v2532_v36, %v2533_v31  ;;  %v2976_v49 = vsel %vm2558_vm4, %v2922_v1, %v2923_v14  ;;  %6070 = vmatmul.mubr.bf16.gmra.mrb[92].mxu1 %v6383_v57  ;;  %6166 = vmatmul.mubr.bf16.gmra.mrb[92].mxu0 %v6382_v43 }
 0x2e8   : > { %v2615_v58 = vadd.f32 %v2583_v5, %v7855_v17  ;;  %v8301_v12 = vadd.f32 %v2976_v49, %v2611_v37  ;;  %6073 = vmatprep.mubr.msk.bf16.mxu1 %vm6415_vm0, %v9213_v4  ;;  %6169 = vmatprep.mubr.msk.bf16.mxu0 %vm6415_vm0, %v9213_v4 }
 0x2ea   : > { %v2421_v40 = vpop.f32.mrb[244].mxu1  ;;  %v2805_v63 = vpop.f32.mrb[244].mxu0 }
 0x2eb   : > { %v2534_v46 = vrot.slane %v2421_v40, 4  ;;  %v2924_v36 = vrot.slane %v2805_v63, 4  ;;  %v5851_v11 = vpop.f32.mrb[245].mxu1  ;;  %v5947_v1 = vpop.f32.mrb[245].mxu0 }
 0x2ec   : > { %v2424_v30 = vpop.f32.mrb[246].mxu1  ;;  %v2808_v27 = vpop.f32.mrb[246].mxu0  ;;  %v6384_v11 = vld [vmem:[%s6492_s6 + $0x78] sm:$0xff]  }
 0x2ed   : > { %v2582_v17 = vsel %vm2558_vm4, %v2533_v31, %v2534_v46  ;;  %v2975_v37 = vsel %vm2558_vm4, %v2923_v14, %v2924_v36  ;;  %v2535_v43 = vrot.slane %v2424_v30, 4  ;;  %v2925_v34 = vrot.slane %v2808_v27, 4  ;;  %v5948_v51 = vpop.f32.mrb[247].mxu0  ;;  %v5852_v21 = vpop.f32.mrb[247].mxu1 }
 0x2ee   : > { %v2616_v5 = vadd.f32 %v2582_v17, %v7875_v0  ;;  %v8312_v49 = vadd.f32 %v2975_v37, %v2612_v24 }
 0x2ef   : > { %v2581_v40 = vsel %vm2558_vm4, %v2534_v46, %v2535_v43  ;;  %v2974_v63 = vsel %vm2558_vm4, %v2924_v36, %v2925_v34  ;;  %6074 = vmatmul.mubr.bf16.gmra.mrb[96].mxu1 %v6384_v11  ;;  %6170 = vmatmul.mubr.bf16.gmra.mrb[96].mxu0 %v6383_v57 }
 0x2f0   : > { %v2617_v31 = vadd.f32 %v2581_v40, %v7886_v60  ;;  %v8320_v14 = vadd.f32 %v2974_v63, %v2613_v20  ;;  %6077 = vmatprep.mubr.msk.bf16.mxu1 %vm6415_vm0, %v9213_v4  ;;  %6173 = vmatprep.mubr.msk.bf16.mxu0 %vm6415_vm0, %v9213_v4 }
 0x2f2   : > { %v2429_v0 = vpop.f32.mrb[248].mxu1  ;;  %v2813_v24 = vpop.f32.mrb[248].mxu0 }
 0x2f3   : > { %v2536_v1 = vrot.slane %v2429_v0, 4  ;;  %v2926_v46 = vrot.slane %v2813_v24, 4  ;;  %v5855_v30 = vpop.f32.mrb[249].mxu1  ;;  %v5951_v36 = vpop.f32.mrb[249].mxu0 }
 0x2f4   : > { %v2432_v27 = vpop.f32.mrb[250].mxu1  ;;  %v2816_v17 = vpop.f32.mrb[250].mxu0  ;;  %v6385_v30 = vld [vmem:[%s6492_s6 + $0x80] sm:$0xff]  }
 0x2f5   : > { %v2580_v60 = vsel %vm2558_vm4, %v2535_v43, %v2536_v1  ;;  %v2973_v20 = vsel %vm2558_vm4, %v2925_v34, %v2926_v46  ;;  %v2537_v57 = vrot.slane %v2432_v27, 4  ;;  %v2927_v37 = vrot.slane %v2816_v17, 4  ;;  %v5952_v51 = vpop.f32.mrb[251].mxu0  ;;  %v5856_v21 = vpop.f32.mrb[251].mxu1  ;;  %v9229_v43 = vld [vmem:[#allocation2_spill] sm:$0xff] }
 0x2f6   : > { %v2618_v40 = vadd.f32 %v2580_v60, %v7906_v52  ;;  %v8331_v63 = vadd.f32 %v2973_v20, %v2614_v39 }
 0x2f7   : > { %v2579_v0 = vsel %vm2558_vm4, %v2536_v1, %v2537_v57  ;;  %v2972_v24 = vsel %vm2558_vm4, %v2926_v46, %v2927_v37  ;;  %6078 = vmatmul.mubr.bf16.gmra.mrb[100].mxu1 %v6385_v30  ;;  %6174 = vmatmul.mubr.bf16.gmra.mrb[100].mxu0 %v6384_v11 }
 0x2f8   : > { %v2619_v36 = vadd.f32 %v2579_v0, %v9229_v43  ;;  %v8339_v34 = vadd.f32 %v2972_v24, %v2615_v58  ;;  %6081 = vmatprep.mubr.msk.bf16.mxu1 %vm6415_vm0, %v9213_v4  ;;  %6177 = vmatprep.mubr.msk.bf16.mxu0 %vm6415_vm0, %v9213_v4 }
 0x2fa   : > { %9230 = vst [vmem:[#allocation2_spill] sm:$0xff] %v8339_v34  ;;  %v2437_v52 = vpop.f32.mrb[252].mxu1  ;;  %v2821_v39 = vpop.f32.mrb[252].mxu0 }
 0x2fb   : > { %v2538_v27 = vrot.slane %v2437_v52, 4  ;;  %v2928_v1 = vrot.slane %v2821_v39, 4  ;;  %v5859_v17 = vpop.f32.mrb[253].mxu1  ;;  %v5955_v46 = vpop.f32.mrb[253].mxu0 }
 0x2fc   : > { %v2440_v60 = vpop.f32.mrb[254].mxu1  ;;  %v2824_v20 = vpop.f32.mrb[254].mxu0  ;;  %v6386_v17 = vld [vmem:[%s6492_s6 + $0x88] sm:$0xff]  }
 0x2fd   : > { %v2578_v11 = vsel %vm2558_vm4, %v2537_v57, %v2538_v27  ;;  %v2971_v58 = vsel %vm2558_vm4, %v2927_v37, %v2928_v1  ;;  %v2539_v51 = vrot.slane %v2440_v60, 4  ;;  %v2929_v21 = vrot.slane %v2824_v20, 4  ;;  %v5956_v0 = vpop.f32.mrb[255].mxu0  ;;  %v5860_v24 = vpop.f32.mrb[255].mxu1 }
 0x2fe   : > { %v2620_v43 = vadd.f32 %v2578_v11, %v7934_v26  ;;  %v8350_v34 = vadd.f32 %v2971_v58, %v2616_v5 }
 0x2ff   : > { %v2577_v52 = vsel %vm2558_vm4, %v2538_v27, %v2539_v51  ;;  %v2970_v39 = vsel %vm2558_vm4, %v2928_v1, %v2929_v21  ;;  %6082 = vmatmul.mubr.bf16.gmra.mrb[104].mxu1 %v6386_v17  ;;  %6178 = vmatmul.mubr.bf16.gmra.mrb[104].mxu0 %v6385_v30 }
 0x300   : > { %v2621_v57 = vadd.f32 %v2577_v52, %v7948_v55  ;;  %v8358_v37 = vadd.f32 %v2970_v39, %v2617_v31  ;;  %6085 = vmatprep.mubr.msk.bf16.mxu1 %vm6415_vm0, %v9213_v4  ;;  %6181 = vmatprep.mubr.msk.bf16.mxu0 %vm6415_vm0, %v9213_v4 }
 0x302   : > { %v2445_v26 = vpop.f32.mrb[0].mxu1  ;;  %v2829_v5 = vpop.f32.mrb[0].mxu0 }
 0x303   : > { %v2540_v46 = vrot.slane %v2445_v26, 4  ;;  %v2930_v27 = vrot.slane %v2829_v5, 4  ;;  %v5863_v60 = vpop.f32.mrb[1].mxu1  ;;  %v5959_v20 = vpop.f32.mrb[1].mxu0 }
 0x304   : > { %v2448_v1 = vpop.f32.mrb[2].mxu1  ;;  %v2832_v11 = vpop.f32.mrb[2].mxu0 }
 0x305   : > { %v2576_v30 = vsel %vm2558_vm4, %v2539_v51, %v2540_v46  ;;  %v2969_v55 = vsel %vm2558_vm4, %v2929_v21, %v2930_v27  ;;  %v2541_v31 = vrot.slane %v2448_v1, 4  ;;  %v2931_v58 = vrot.slane %v2832_v11, 4  ;;  %v5960_v0 = vpop.f32.mrb[3].mxu0  ;;  %v5864_v24 = vpop.f32.mrb[3].mxu1  ;;  %v9231_v51 = vld [vmem:[#allocation3_spill] sm:$0xff] }
 0x306   : > { %v2622_v52 = vadd.f32 %v2576_v30, %v7962_v42  ;;  %v8369_v39 = vadd.f32 %v2969_v55, %v2618_v40 }
 0x307   : > { %v2575_v26 = vsel %vm2558_vm4, %v2540_v46, %v2541_v31  ;;  %v2968_v5 = vsel %vm2558_vm4, %v2930_v27, %v2931_v58  ;;  %6086 = vmatmul.mubr.bf16.gmra.mrb[108].mxu1 %v7941_v33  ;;  %6182 = vmatmul.mubr.bf16.gmra.mrb[108].mxu0 %v6386_v17 }
 0x308   : > { %v2623_v60 = vadd.f32 %v2575_v26, %v9231_v51  ;;  %v8377_v21 = vadd.f32 %v2968_v5, %v2619_v36  ;;  %6089 = vmatprep.mubr.msk.bf16.mxu1 %vm6415_vm0, %v9213_v4  ;;  %6185 = vmatprep.mubr.msk.bf16.mxu0 %vm6415_vm0, %v9213_v4 }
 0x30a   : > { %v2453_v42 = vpop.f32.mrb[4].mxu1  ;;  %v2837_v40 = vpop.f32.mrb[4].mxu0 }
 0x30b   : > { %v2542_v20 = vrot.slane %v2453_v42, 4  ;;  %v2932_v46 = vrot.slane %v2837_v40, 4  ;;  %v5867_v1 = vpop.f32.mrb[5].mxu1  ;;  %v5963_v27 = vpop.f32.mrb[5].mxu0  ;;  %v9232_v40 = vld [vmem:[#allocation4_spill] sm:$0xff] }
 0x30c   : > { %v2456_v11 = vpop.f32.mrb[6].mxu1  ;;  %v2840_v33 = vpop.f32.mrb[6].mxu0 }
 0x30d   : > { %v2574_v17 = vsel %vm2558_vm4, %v2541_v31, %v2542_v20  ;;  %v2967_v36 = vsel %vm2558_vm4, %v2931_v58, %v2932_v46  ;;  %v2543_v30 = vrot.slane %v2456_v11, 4  ;;  %v2933_v55 = vrot.slane %v2840_v33, 4  ;;  %v5964_v0 = vpop.f32.mrb[7].mxu0  ;;  %v5868_v24 = vpop.f32.mrb[7].mxu1  ;;  %v6387_v31 = vld [vmem:[%s6492_s6 + $0x90] sm:$0xff]  }
 0x30e   : > { %v2624_v26 = vadd.f32 %v2574_v17, %v7988_v25  ;;  %v8388_v5 = vadd.f32 %v2967_v36, %v2620_v43 }
 0x30f   : > { %v2573_v51 = vsel %vm2558_vm4, %v2542_v20, %v2543_v30  ;;  %v2966_v42 = vsel %vm2558_vm4, %v2932_v46, %v2933_v55  ;;  %6090 = vmatmul.mubr.bf16.gmra.mrb[112].mxu1 %v7969_v32  ;;  %6186 = vmatmul.mubr.bf16.gmra.mrb[112].mxu0 %v6387_v31 }
 0x310   : > { %v2625_v58 = vadd.f32 %v2573_v51, %v9232_v40  ;;  %v8397_v1 = vadd.f32 %v2966_v42, %v2621_v57  ;;  %6093 = vmatprep.mubr.msk.bf16.mxu1 %vm6415_vm0, %v9213_v4  ;;  %6189 = vmatprep.mubr.msk.bf16.mxu0 %vm6415_vm0, %v9213_v4 }
 0x312   : > { %v2461_v25 = vpop.f32.mrb[8].mxu1  ;;  %v2845_v43 = vpop.f32.mrb[8].mxu0 }
 0x313   : > { %v2544_v20 = vrot.slane %v2461_v25, 4  ;;  %v2934_v27 = vrot.slane %v2845_v43, 4  ;;  %v5871_v46 = vpop.f32.mrb[9].mxu1  ;;  %v5967_v11 = vpop.f32.mrb[9].mxu0  ;;  %v9233_v43 = vld [vmem:[#allocation5_spill] sm:$0xff] }
 0x314   : > { %v2464_v32 = vpop.f32.mrb[10].mxu1  ;;  %v2848_v33 = vpop.f32.mrb[10].mxu0 }
 0x315   : > { %v2572_v17 = vsel %vm2558_vm4, %v2543_v30, %v2544_v20  ;;  %v2965_v57 = vsel %vm2558_vm4, %v2933_v55, %v2934_v27  ;;  %v2545_v36 = vrot.slane %v2464_v32, 4  ;;  %v2935_v0 = vrot.slane %v2848_v33, 4  ;;  %v5968_v24 = vpop.f32.mrb[11].mxu0  ;;  %v5872_v51 = vpop.f32.mrb[11].mxu1  ;;  %v6388_v30 = vld [vmem:[%s6492_s6 + $0x98] sm:$0xff]  }
 0x316   : > { %v2626_v42 = vadd.f32 %v2572_v17, %v8011_v61  ;;  %v8408_v31 = vadd.f32 %v2965_v57, %v2622_v52 }
 0x317   : > { %v2571_v40 = vsel %vm2558_vm4, %v2544_v20, %v2545_v36  ;;  %v2964_v25 = vsel %vm2558_vm4, %v2934_v27, %v2935_v0  ;;  %6094 = vmatmul.mubr.bf16.gmra.mrb[116].mxu1 %v7995_v22  ;;  %6190 = vmatmul.mubr.bf16.gmra.mrb[116].mxu0 %v6388_v30 }
 0x318   : > { %v2627_v55 = vadd.f32 %v2571_v40, %v9233_v43  ;;  %v8417_v46 = vadd.f32 %v2964_v25, %v2623_v60  ;;  %6193 = vmatprep.mubr.msk.bf16.mxu0 %vm6415_vm0, %v9213_v4 }
 0x31a   : > { %v2469_v61 = vpop.f32.mrb[12].mxu1  ;;  %v2853_v52 = vpop.f32.mrb[12].mxu0 }
 0x31b   : > { %v2546_v11 = vrot.slane %v2469_v61, 4  ;;  %v2936_v32 = vrot.slane %v2853_v52, 4  ;;  %v5875_v20 = vpop.f32.mrb[13].mxu1  ;;  %v5971_v33 = vpop.f32.mrb[13].mxu0  ;;  %v6389_v61 = vld [vmem:[%s6492_s6 + $0xa0] sm:$0xff]  }
 0x31c   : > { %v2472_v17 = vpop.f32.mrb[14].mxu1  ;;  %v2856_v27 = vpop.f32.mrb[14].mxu0 }
 0x31d   : > { %v2570_v22 = vsel %vm2558_vm4, %v2545_v36, %v2546_v11  ;;  %v2963_v57 = vsel %vm2558_vm4, %v2935_v0, %v2936_v32  ;;  %v2547_v60 = vrot.slane %v2472_v17, 4  ;;  %v2937_v24 = vrot.slane %v2856_v27, 4  ;;  %v5972_v51 = vpop.f32.mrb[15].mxu0  ;;  %v5876_v40 = vpop.f32.mrb[15].mxu1 }
 0x31e   : > { %v2628_v4 = vadd.f32 %v2570_v22, %v8031_v3  ;;  %v8426_v25 = vadd.f32 %v2963_v57, %v2624_v26 }
 0x31f   : > { %v2569_v30 = vsel %vm2558_vm4, %v2546_v11, %v2547_v60  ;;  %v2962_v43 = vsel %vm2558_vm4, %v2936_v32, %v2937_v24  ;;  %6194 = vmatmul.mubr.bf16.gmra.mrb[120].mxu0 %v6389_v61 }
 0x320   : > { %v2629_v36 = vadd.f32 %v2569_v30, %v8039_v16  ;;  %v8434_v52 = vadd.f32 %v2962_v43, %v2625_v58 }
 0x322   : > { %v2477_v0 = vpop.f32.mrb[16].mxu1  ;;  %v2861_v20 = vpop.f32.mrb[16].mxu0 }
 0x323   : > { %v2548_v33 = vrot.slane %v2477_v0, 4  ;;  %v2938_v17 = vrot.slane %v2861_v20, 4  ;;  %v5879_v27 = vpop.f32.mrb[17].mxu1  ;;  %v5975_v3 = vpop.f32.mrb[17].mxu0 }
 0x324   : > { %v2480_v26 = vpop.f32.mrb[18].mxu1  ;;  %v2864_v22 = vpop.f32.mrb[18].mxu0 }
 0x325   : > { %v2568_v11 = vsel %vm2558_vm4, %v2547_v60, %v2548_v33  ;;  %v2961_v32 = vsel %vm2558_vm4, %v2937_v24, %v2938_v17  ;;  %v2549_v57 = vrot.slane %v2480_v26, 4  ;;  %v2939_v51 = vrot.slane %v2864_v22, 4  ;;  %v5976_v40 = vpop.f32.mrb[19].mxu0  ;;  %v5880_v16 = vpop.f32.mrb[19].mxu1 }
 0x326   : > { %v2630_v58 = vadd.f32 %v2568_v11, %v8050_v53  ;;  %v8441_v30 = vadd.f32 %v2961_v32, %v2626_v42 }
 0x327   : > { %v2567_v43 = vsel %vm2558_vm4, %v2548_v33, %v2549_v57  ;;  %v2960_v61 = vsel %vm2558_vm4, %v2938_v17, %v2939_v51 }
 0x328   : > { %v2631_v0 = vadd.f32 %v2567_v43, %v8058_v9  ;;  %v8448_v60 = vadd.f32 %v2960_v61, %v2627_v55 }
 0x32a   : > { %v2485_v20 = vpop.f32.mrb[20].mxu1  ;;  %v2869_v24 = vpop.f32.mrb[20].mxu0 }
 0x32b   : > { %v2550_v27 = vrot.slane %v2485_v20, 4  ;;  %v2940_v3 = vrot.slane %v2869_v24, 4  ;;  %v5883_v26 = vpop.f32.mrb[21].mxu1  ;;  %v5979_v22 = vpop.f32.mrb[21].mxu0 }
 0x32c   : > { %v2488_v40 = vpop.f32.mrb[22].mxu1  ;;  %v2872_v53 = vpop.f32.mrb[22].mxu0 }
 0x32d   : > { %v2566_v42 = vsel %vm2558_vm4, %v2549_v57, %v2550_v27  ;;  %v2959_v33 = vsel %vm2558_vm4, %v2939_v51, %v2940_v3  ;;  %v2551_v11 = vrot.slane %v2488_v40, 4  ;;  %v2941_v17 = vrot.slane %v2872_v53, 4  ;;  %v5980_v32 = vpop.f32.mrb[23].mxu0  ;;  %v5884_v9 = vpop.f32.mrb[23].mxu1 }
 0x32e   : > { %v2632_v55 = vadd.f32 %v2566_v42, %v8069_v56  ;;  %v8455_v16 = vadd.f32 %v2959_v33, %v2628_v4 }
 0x32f   : > { %v2565_v43 = vsel %vm2558_vm4, %v2550_v27, %v2551_v11  ;;  %v2958_v61 = vsel %vm2558_vm4, %v2940_v3, %v2941_v17 }
 0x330   : > { %v2633_v20 = vadd.f32 %v2565_v43, %v8077_v47  ;;  %v8462_v57 = vadd.f32 %v2958_v61, %v2629_v36 }
 0x332   : > { %v2493_v24 = vpop.f32.mrb[24].mxu1  ;;  %v2877_v51 = vpop.f32.mrb[24].mxu0 }
 0x333   : > { %v2552_v26 = vrot.slane %v2493_v24, 4  ;;  %v2942_v22 = vrot.slane %v2877_v51, 4  ;;  %v5887_v40 = vpop.f32.mrb[25].mxu1  ;;  %v5983_v53 = vpop.f32.mrb[25].mxu0 }
 0x334   : > { %v2496_v32 = vpop.f32.mrb[26].mxu1  ;;  %v2880_v56 = vpop.f32.mrb[26].mxu0 }
 0x335   : > { %v2564_v4 = vsel %vm2558_vm4, %v2551_v11, %v2552_v26  ;;  %v2957_v27 = vsel %vm2558_vm4, %v2941_v17, %v2942_v22  ;;  %v2553_v42 = vrot.slane %v2496_v32, 4  ;;  %v2943_v3 = vrot.slane %v2880_v56, 4  ;;  %v5984_v33 = vpop.f32.mrb[27].mxu0  ;;  %v5888_v47 = vpop.f32.mrb[27].mxu1 }
 0x336   : > { %v2634_v36 = vadd.f32 %v2564_v4, %v8088_v38  ;;  %v8469_v9 = vadd.f32 %v2957_v27, %v2630_v58 }
 0x337   : > { %v2563_v43 = vsel %vm2558_vm4, %v2552_v26, %v2553_v42  ;;  %v2956_v61 = vsel %vm2558_vm4, %v2942_v22, %v2943_v3 }
 0x338   : > { %v2635_v24 = vadd.f32 %v2563_v43, %v8096_v15  ;;  %v8476_v11 = vadd.f32 %v2956_v61, %v2631_v0 }
 0x33a   : > { %v2501_v51 = vpop.f32.mrb[28].mxu1  ;;  %v2885_v17 = vpop.f32.mrb[28].mxu0 }
 0x33b   : > { %v2554_v40 = vrot.slane %v2501_v51, 4  ;;  %v2944_v53 = vrot.slane %v2885_v17, 4  ;;  %v5891_v32 = vpop.f32.mrb[29].mxu1  ;;  %v5987_v56 = vpop.f32.mrb[29].mxu0 }
 0x33c   : > { %v2504_v33 = vpop.f32.mrb[30].mxu1  ;;  %v2888_v38 = vpop.f32.mrb[30].mxu0 }
 0x33d   : > { %v2562_v58 = vsel %vm2558_vm4, %v2553_v42, %v2554_v40  ;;  %v2955_v26 = vsel %vm2558_vm4, %v2943_v3, %v2944_v53  ;;  %v2555_v4 = vrot.slane %v2504_v33, 4  ;;  %v2945_v22 = vrot.slane %v2888_v38, 4  ;;  %v5988_v27 = vpop.f32.mrb[31].mxu0  ;;  %v5892_v15 = vpop.f32.mrb[31].mxu1 }
 0x33e   : > { %v2636_v0 = vadd.f32 %v2562_v58, %v8107_v59  ;;  %v8483_v47 = vadd.f32 %v2955_v26, %v2632_v55 }
 0x33f   : > { %v2561_v43 = vsel %vm2558_vm4, %v2554_v40, %v2555_v4  ;;  %v2954_v61 = vsel %vm2558_vm4, %v2944_v53, %v2945_v22 }
 0x340   : > { %v2637_v51 = vadd.f32 %v2561_v43, %v8120_v45  ;;  %v8490_v42 = vadd.f32 %v2954_v61, %v2633_v20  ;;  %v9234_v61 = vrot.slane %v8126_v62, 4 }
 0x342   : > { %v2509_v17 = vpop.f32.mrb[32].mxu1  ;;  %v2893_v3 = vpop.f32.mrb[32].mxu0 }
 0x343   : > { %v2556_v32 = vrot.slane %v2509_v17, 4  ;;  %v2946_v56 = vrot.slane %v2893_v3, 4  ;;  %v5895_v33 = vpop.f32.mrb[33].mxu1  ;;  %v5991_v38 = vpop.f32.mrb[33].mxu0 }
 0x344   : > { %v2512_v27 = vpop.f32.mrb[34].mxu1  ;;  %v2896_v59 = vpop.f32.mrb[34].mxu0 }
 0x345   : > { %v2560_v55 = vsel %vm2558_vm4, %v2555_v4, %v2556_v32  ;;  %v2953_v40 = vsel %vm2558_vm4, %v2945_v22, %v2946_v56  ;;  %v2557_v58 = vrot.slane %v2512_v27, 4  ;;  %v2947_v53 = vrot.slane %v2896_v59, 4  ;;  %v5992_v26 = vpop.f32.mrb[35].mxu0  ;;  %v5896_v45 = vpop.f32.mrb[35].mxu1 }
 0x346   : > { %v2638_v20 = vadd.f32 %v2560_v55, %v8132_v35  ;;  %v8497_v15 = vadd.f32 %v2953_v40, %v2634_v36 }
 0x347   : > { %v2559_v43 = vsel %vm2558_vm4, %v2556_v32, %v2557_v58  ;;  %v2600_v17 = vsel %vm2558_vm4, %v2557_v58, %v9234_v61  ;;  %v2952_v4 = vsel %vm2558_vm4, %v2946_v56, %v2947_v53 }
 0x348   : > { %v2639_v22 = vadd.f32 %v2559_v43, %v8145_v54  ;;  %v2640_v3 = vadd.f32 %v2600_v17, %v8147_v10  ;;  %v8509_v33 = vadd.f32 %v2952_v4, %v2635_v24 }
 0x34a   : > { %v2901_v35 = vpop.f32.mrb[36].mxu0  ;;  %v8511_v36 = vpop.f32.mrb[36].mxu1  ;;  %v3030_v38 = vadd.f32 %v8166_v6, %v2639_v22  ;;  %v3031_v32 = vadd.f32 %v8178_v44, %v2640_v3  ;;  %v9235_v44 = vld [vmem:[#allocation6_spill] sm:$0xff] }
 0x34b   : > { %v2948_v62 = vrot.slane %v2901_v35, 4  ;;  %v9206_v27 = vrot.slane %v8511_v36, 5  ;;  %v5995_v59 = vpop.f32.mrb[37].mxu0  ;;  %v6015_v55 = vpop.f32.mrb[37].mxu1  ;;  %v9236_v43 = vrot.slane %v9235_v44, 4 }
 0x34c   : > { %v2904_v40 = vpop.f32.mrb[38].mxu0  ;;  %v3135_v56 = vpop.f32.mrb[38].mxu1 }
 0x34d   : > { %v2951_v54 = vsel %vm2558_vm4, %v2947_v53, %v2948_v62  ;;  %v2949_v10 = vrot.slane %v2904_v40, 4  ;;  %v3300_v24 = vrot.slane %v3135_v56, 5  ;;  %v5996_v58 = vpop.f32.mrb[39].mxu0  ;;  %v6016_v26 = vpop.f32.mrb[39].mxu1 }
 0x34e   : > { %v8519_v45 = vadd.f32 %v2951_v54, %v2636_v0 }
 0x34f   : > { %v2950_v6 = vsel %vm2558_vm4, %v2948_v62, %v2949_v10  ;;  %v2991_v61 = vsel %vm2558_vm4, %v2949_v10, %v9236_v43  ;;  %v3382_v17 = vsel %vm3341_vm5, %v9206_v27, %v3300_v24  ;;  %v9237_v43 = vld [vmem:[#allocation7_spill] sm:$0xff] }
 0x350   : > { %v8531_v53 = vadd.f32 %v2950_v6, %v2637_v51  ;;  %v8533_v4 = vadd.f32 %v2991_v61, %v2638_v20  ;;  %v3422_v22 = vadd.f32 %v3382_v17, %v3030_v38 }
 0x352   : > { %v3140_v0 = vpop.f32.mrb[40].mxu1  ;;  %v8535_v3 = vpop.f32.mrb[40].mxu0 }
 0x353   : > { %v3301_v35 = vrot.slane %v3140_v0, 5  ;;  %v6019_v62 = vpop.f32.mrb[41].mxu1  ;;  %v6115_v59 = vpop.f32.mrb[41].mxu0  ;;  %v9205_v54 = vrot.slane %v8535_v3, 6 }
 0x354   : > { %v3143_v55 = vpop.f32.mrb[42].mxu1  ;;  %v3527_v40 = vpop.f32.mrb[42].mxu0 }
 0x355   : > { %v3381_v56 = vsel %vm3341_vm5, %v3300_v24, %v3301_v35  ;;  %v3302_v51 = vrot.slane %v3143_v55, 5  ;;  %v3692_v10 = vrot.slane %v3527_v40, 6  ;;  %v6116_v20 = vpop.f32.mrb[43].mxu0  ;;  %v6020_v58 = vpop.f32.mrb[43].mxu1 }
 0x356   : > { %v3423_v38 = vadd.f32 %v3381_v56, %v3031_v32 }
 0x357   : > { %v3380_v26 = vsel %vm3341_vm5, %v3301_v35, %v3302_v51  ;;  %v3774_v6 = vsel %vm3733_vm6, %v9205_v54, %v3692_v10 }
 0x358   : > { %v8547_v44 = vadd.f32 %v3774_v6, %v3422_v22  ;;  %v3424_v61 = vadd.f32 %v3380_v26, %v9237_v43 }
 0x35a   : > { %v3148_v24 = vpop.f32.mrb[44].mxu1  ;;  %v3532_v17 = vpop.f32.mrb[44].mxu0 }
 0x35b   : > { %v3303_v0 = vrot.slane %v3148_v24, 5  ;;  %v3693_v62 = vrot.slane %v3532_v17, 6  ;;  %v6023_v59 = vpop.f32.mrb[45].mxu1  ;;  %v6119_v55 = vpop.f32.mrb[45].mxu0 }
 0x35c   : > { %v3151_v40 = vpop.f32.mrb[46].mxu1  ;;  %v3535_v32 = vpop.f32.mrb[46].mxu0 }
 0x35d   : > { %v3379_v35 = vsel %vm3341_vm5, %v3302_v51, %v3303_v0  ;;  %v3304_v56 = vrot.slane %v3151_v40, 5  ;;  %v3694_v20 = vrot.slane %v3535_v32, 6  ;;  %v6120_v58 = vpop.f32.mrb[47].mxu0  ;;  %v3773_v22 = vsel %vm3733_vm6, %v3692_v10, %v3693_v62  ;;  %v6024_v6 = vpop.f32.mrb[47].mxu1 }
 0x35e   : > { %v8554_v54 = vadd.f32 %v3773_v22, %v3423_v38  ;;  %v3425_v26 = vadd.f32 %v3379_v35, %v8198_v23  ;;  %v3863_v59 = vpop.permute.xlu0 %3862 }
 0x35f   : > { %v3378_v43 = vsel %vm3341_vm5, %v3303_v0, %v3304_v56  ;;  %v3772_v24 = vsel %vm3733_vm6, %v3693_v62, %v3694_v20 }
 0x360   : > { %9238 = vst [vmem:[#allocation3_spill] sm:$0xff] %v8554_v54  ;;  %v3384_v17 = vadd.f32 %v3378_v43, %v8206_v48  ;;  %v8562_v51 = vadd.f32 %v3772_v24, %v3424_v61 }
 0x362   : > { %9239 = vst [vmem:[#allocation4_spill] sm:$0xff] %v8562_v51  ;;  %v3156_v55 = vpop.f32.mrb[48].mxu1  ;;  %v3540_v40 = vpop.f32.mrb[48].mxu0 }
 0x363   : > { %v3305_v32 = vrot.slane %v3156_v55, 5  ;;  %v3695_v10 = vrot.slane %v3540_v40, 6  ;;  %v6027_v58 = vpop.f32.mrb[49].mxu1  ;;  %v6123_v38 = vpop.f32.mrb[49].mxu0 }
 0x364   : > { %v3159_v22 = vpop.f32.mrb[50].mxu1  ;;  %v3543_v6 = vpop.f32.mrb[50].mxu0 }
 0x365   : > { %v3377_v23 = vsel %vm3341_vm5, %v3304_v56, %v3305_v32  ;;  %v3306_v0 = vrot.slane %v3159_v22, 5  ;;  %v3696_v35 = vrot.slane %v3543_v6, 6  ;;  %v6124_v27 = vpop.f32.mrb[51].mxu0  ;;  %v3771_v48 = vsel %vm3733_vm6, %v3694_v20, %v3695_v10  ;;  %v6028_v61 = vpop.f32.mrb[51].mxu1 }
 0x366   : > { %v3385_v62 = vadd.f32 %v3377_v23, %v8217_v41  ;;  %v8569_v43 = vadd.f32 %v3771_v48, %v3425_v26  ;;  %v3868_v58 = vpop.permute.xlu0 %3867  ;;  %v3873_v38 = vpop.permute.xlu1 %3872 }
 0x367   : > { %v3376_v24 = vsel %vm3341_vm5, %v3305_v32, %v3306_v0  ;;  %v3770_v55 = vsel %vm3733_vm6, %v3695_v10, %v3696_v35 }
 0x368   : > { %9240 = vst [vmem:[#allocation5_spill] sm:$0xff] %v8569_v43  ;;  %v3386_v40 = vadd.f32 %v3376_v24, %v8225_v29  ;;  %v3776_v56 = vadd.f32 %v3770_v55, %v3384_v17 }
 0x36a   : > { %v3164_v27 = vpop.f32.mrb[52].mxu1  ;;  %v3548_v22 = vpop.f32.mrb[52].mxu0 }
 0x36b   : > { %v3307_v6 = vrot.slane %v3164_v27, 5  ;;  %v3697_v20 = vrot.slane %v3548_v22, 6  ;;  %v6031_v61 = vpop.f32.mrb[53].mxu1  ;;  %v6127_v51 = vpop.f32.mrb[53].mxu0  ;;  %v8585_v22 = vmul.f32 %v3863_v59, %v3776_v56 }
 0x36c   : > { %v3167_v41 = vpop.f32.mrb[54].mxu1  ;;  %v3551_v26 = vpop.f32.mrb[54].mxu0 }
 0x36d   : > { %v3375_v23 = vsel %vm3341_vm5, %v3306_v0, %v3307_v6  ;;  %v3769_v32 = vsel %vm3733_vm6, %v3696_v35, %v3697_v20  ;;  %v3308_v10 = vrot.slane %v3167_v41, 5  ;;  %v3698_v48 = vrot.slane %v3551_v26, 6  ;;  %v6128_v29 = vpop.f32.mrb[55].mxu0  ;;  %v6032_v17 = vpop.f32.mrb[55].mxu1  ;;  %9241 = vst [vmem:[#allocation6_spill] sm:$0xff] %v8585_v22 }
 0x36e   : > { %v3387_v24 = vadd.f32 %v3375_v23, %v8236_v8  ;;  %v3777_v55 = vadd.f32 %v3769_v32, %v3385_v62  ;;  %v3883_v41 = vpop.permute.xlu0 %3882  ;;  %v3878_v26 = vpop.permute.xlu1 %3877  ;;  %v4159_v59 = vmul.f32 %v8585_v22, %v8585_v22 }
 0x36f   : > { %v3374_v27 = vsel %vm3341_vm5, %v3307_v6, %v3308_v10  ;;  %v3768_v51 = vsel %vm3733_vm6, %v3697_v20, %v3698_v48 }
 0x370   : > { %v8587_v61 = vmul.f32 %v3868_v58, %v3777_v55  ;;  %v3388_v0 = vadd.f32 %v3374_v27, %v8244_v13  ;;  %v3778_v35 = vadd.f32 %v3768_v51, %v3386_v40 }
 0x372   : > { %9242 = vst [vmem:[#allocation7_spill] sm:$0xff] %v8587_v61  ;;  %v3172_v29 = vpop.f32.mrb[56].mxu1  ;;  %v3556_v17 = vpop.f32.mrb[56].mxu0  ;;  %v4160_v8 = vmul.f32 %v8587_v61, %v8587_v61  ;;  %v8594_v56 = vmul.f32 %v3873_v38, %v3778_v35 }
 0x373   : > { %v3309_v62 = vrot.slane %v3172_v29, 5  ;;  %v3699_v23 = vrot.slane %v3556_v17, 6  ;;  %v6035_v6 = vpop.f32.mrb[57].mxu1  ;;  %v6131_v32 = vpop.f32.mrb[57].mxu0 }
 0x374   : > { %v3175_v58 = vpop.f32.mrb[58].mxu1  ;;  %v3559_v20 = vpop.f32.mrb[58].mxu0  ;;  %v4112_v32 = vadd.f32 %v8587_v61, %v8585_v22  ;;  %v4201_v38 = vadd.f32 %v4160_v8, %v4159_v59 }
 0x375   : > { %v3373_v13 = vsel %vm3341_vm5, %v3308_v10, %v3309_v62  ;;  %v3767_v40 = vsel %vm3733_vm6, %v3698_v48, %v3699_v23  ;;  %v3310_v55 = vrot.slane %v3175_v58, 5  ;;  %v3700_v27 = vrot.slane %v3559_v20, 6  ;;  %v6132_v51 = vpop.f32.mrb[59].mxu0  ;;  %v6036_v29 = vpop.f32.mrb[59].mxu1 }
 0x376   : > { %v3389_v17 = vadd.f32 %v3373_v13, %v8255_v18  ;;  %v3779_v6 = vadd.f32 %v3767_v40, %v3387_v24  ;;  %v4161_v48 = vmul.f32 %v8594_v56, %v8594_v56  ;;  %v3893_v18 = vpop.permute.xlu0 %3892  ;;  %v3888_v24 = vpop.permute.xlu1 %3887 }
 0x377   : > { %v3372_v35 = vsel %vm3341_vm5, %v3309_v62, %v3310_v55  ;;  %v3766_v10 = vsel %vm3733_vm6, %v3699_v23, %v3700_v27  ;;  %v4113_v23 = vadd.f32 %v4112_v32, %v8594_v56 }
 0x378   : > { %v8609_v58 = vmul.f32 %v3878_v26, %v3779_v6  ;;  %v3390_v20 = vadd.f32 %v3372_v35, %v8263_v19  ;;  %v3780_v51 = vadd.f32 %v3766_v10, %v3388_v0  ;;  %v4202_v22 = vadd.f32 %v4201_v38, %v4161_v48 }
 0x37a   : > { %v3180_v13 = vpop.f32.mrb[60].mxu1  ;;  %v3564_v40 = vpop.f32.mrb[60].mxu0  ;;  %v4162_v8 = vmul.f32 %v8609_v58, %v8609_v58  ;;  %v8615_v43 = vmul.f32 %v3883_v41, %v3780_v51  ;;  %v4114_v32 = vadd.f32 %v4113_v23, %v8609_v58 }
 0x37b   : > { %v3311_v59 = vrot.slane %v3180_v13, 5  ;;  %v3701_v62 = vrot.slane %v3564_v40, 6  ;;  %v6039_v29 = vpop.f32.mrb[61].mxu1  ;;  %v6135_v61 = vpop.f32.mrb[61].mxu0 }
 0x37c   : > { %v3183_v26 = vpop.f32.mrb[62].mxu1  ;;  %v3567_v6 = vpop.f32.mrb[62].mxu0  ;;  %v4203_v38 = vadd.f32 %v4202_v22, %v4162_v8 }
 0x37d   : > { %v3371_v19 = vsel %vm3341_vm5, %v3310_v55, %v3311_v59  ;;  %v3765_v0 = vsel %vm3733_vm6, %v3700_v27, %v3701_v62  ;;  %v3312_v35 = vrot.slane %v3183_v26, 5  ;;  %v3702_v10 = vrot.slane %v3567_v6, 6  ;;  %v6136_v54 = vpop.f32.mrb[63].mxu0  ;;  %v6040_v13 = vpop.f32.mrb[63].mxu1 }
 0x37e   : > { %v3391_v40 = vadd.f32 %v3371_v19, %v8274_v50  ;;  %v3781_v61 = vadd.f32 %v3765_v0, %v3389_v17  ;;  %v4163_v55 = vmul.f32 %v8615_v43, %v8615_v43  ;;  %v3903_v29 = vpop.permute.xlu0 %3902  ;;  %v3898_v50 = vpop.permute.xlu1 %3897 }
 0x37f   : > { %v3370_v41 = vsel %vm3341_vm5, %v3311_v59, %v3312_v35  ;;  %v3764_v48 = vsel %vm3733_vm6, %v3701_v62, %v3702_v10  ;;  %v4115_v62 = vadd.f32 %v4114_v32, %v8615_v43 }
 0x380   : > { %v8629_v27 = vmul.f32 %v3888_v24, %v3781_v61  ;;  %v3392_v54 = vadd.f32 %v3370_v41, %v8282_v7  ;;  %v3782_v51 = vadd.f32 %v3764_v48, %v3390_v20  ;;  %v4204_v19 = vadd.f32 %v4203_v38, %v4163_v55 }
 0x382   : > { %v3188_v17 = vpop.f32.mrb[64].mxu1  ;;  %v3572_v26 = vpop.f32.mrb[64].mxu0  ;;  %v4164_v22 = vmul.f32 %v8629_v27, %v8629_v27  ;;  %v8635_v0 = vmul.f32 %v3893_v18, %v3782_v51  ;;  %v4116_v32 = vadd.f32 %v4115_v62, %v8629_v27 }
 0x383   : > { %v3313_v8 = vrot.slane %v3188_v17, 5  ;;  %v3703_v59 = vrot.slane %v3572_v26, 6  ;;  %v6043_v23 = vpop.f32.mrb[65].mxu1  ;;  %v6139_v6 = vpop.f32.mrb[65].mxu0 }
 0x384   : > { %v3191_v24 = vpop.f32.mrb[66].mxu1  ;;  %v3575_v13 = vpop.f32.mrb[66].mxu0  ;;  %v4205_v38 = vadd.f32 %v4204_v19, %v4164_v22 }
 0x385   : > { %v3369_v7 = vsel %vm3341_vm5, %v3312_v35, %v3313_v8  ;;  %v3763_v20 = vsel %vm3733_vm6, %v3702_v10, %v3703_v59  ;;  %v3314_v61 = vrot.slane %v3191_v24, 5  ;;  %v3704_v41 = vrot.slane %v3575_v13, 6  ;;  %v6140_v48 = vpop.f32.mrb[67].mxu0  ;;  %v6044_v17 = vpop.f32.mrb[67].mxu1 }
 0x386   : > { %v3393_v26 = vadd.f32 %v3369_v7, %v8293_v28  ;;  %v3783_v23 = vadd.f32 %v3763_v20, %v3391_v40  ;;  %v4165_v35 = vmul.f32 %v8635_v0, %v8635_v0  ;;  %v3913_v24 = vpop.permute.xlu0 %3912  ;;  %v3908_v28 = vpop.permute.xlu1 %3907 }
 0x387   : > { %v3368_v18 = vsel %vm3341_vm5, %v3313_v8, %v3314_v61  ;;  %v3762_v55 = vsel %vm3733_vm6, %v3703_v59, %v3704_v41  ;;  %v4117_v59 = vadd.f32 %v4116_v32, %v8635_v0 }
 0x388   : > { %v8649_v10 = vmul.f32 %v3898_v50, %v3783_v23  ;;  %v3394_v51 = vadd.f32 %v3368_v18, %v8301_v12  ;;  %v3784_v6 = vadd.f32 %v3762_v55, %v3392_v54  ;;  %v4206_v20 = vadd.f32 %v4205_v38, %v4165_v35 }
 0x38a   : > { %v3196_v40 = vpop.f32.mrb[68].mxu1  ;;  %v3580_v13 = vpop.f32.mrb[68].mxu0  ;;  %v4166_v22 = vmul.f32 %v8649_v10, %v8649_v10  ;;  %v8655_v48 = vmul.f32 %v3903_v29, %v3784_v6  ;;  %v4118_v32 = vadd.f32 %v4117_v59, %v8649_v10 }
 0x38b   : > { %v3315_v62 = vrot.slane %v3196_v40, 5  ;;  %v3705_v8 = vrot.slane %v3580_v13, 6  ;;  %v6047_v19 = vpop.f32.mrb[69].mxu1  ;;  %v6143_v7 = vpop.f32.mrb[69].mxu0 }
 0x38c   : > { %v3199_v50 = vpop.f32.mrb[70].mxu1  ;;  %v3583_v17 = vpop.f32.mrb[70].mxu0  ;;  %v4207_v38 = vadd.f32 %v4206_v20, %v4166_v22 }
 0x38d   : > { %v3367_v12 = vsel %vm3341_vm5, %v3314_v61, %v3315_v62  ;;  %v3761_v54 = vsel %vm3733_vm6, %v3704_v41, %v3705_v8  ;;  %v3316_v23 = vrot.slane %v3199_v50, 5  ;;  %v3706_v18 = vrot.slane %v3583_v17, 6  ;;  %v6144_v55 = vpop.f32.mrb[71].mxu0  ;;  %v6048_v40 = vpop.f32.mrb[71].mxu1 }
 0x38e   : > { %v3395_v13 = vadd.f32 %v3367_v12, %v8312_v49  ;;  %v3785_v19 = vadd.f32 %v3761_v54, %v3393_v26  ;;  %v4167_v61 = vmul.f32 %v8655_v48, %v8655_v48  ;;  %v3923_v50 = vpop.permute.xlu0 %3922  ;;  %v3918_v49 = vpop.permute.xlu1 %3917 }
 0x38f   : > { %v3366_v29 = vsel %vm3341_vm5, %v3315_v62, %v3316_v23  ;;  %v3760_v35 = vsel %vm3733_vm6, %v3705_v8, %v3706_v18  ;;  %v4119_v8 = vadd.f32 %v4118_v32, %v8655_v48 }
 0x390   : > { %v8669_v41 = vmul.f32 %v3908_v28, %v3785_v19  ;;  %v3396_v6 = vadd.f32 %v3366_v29, %v8320_v14  ;;  %v3786_v7 = vadd.f32 %v3760_v35, %v3394_v51  ;;  %v4208_v54 = vadd.f32 %v4207_v38, %v4167_v61 }
 0x392   : > { %9243 = vst [vmem:[#allocation8_spill] sm:$0xff] %v8669_v41  ;;  %v3204_v26 = vpop.f32.mrb[72].mxu1  ;;  %v3588_v17 = vpop.f32.mrb[72].mxu0  ;;  %v4168_v22 = vmul.f32 %v8669_v41, %v8669_v41  ;;  %v8675_v55 = vmul.f32 %v3913_v24, %v3786_v7  ;;  %v4120_v32 = vadd.f32 %v4119_v8, %v8669_v41  ;;  %v9244_v7 = vld [vmem:[#allocation2_spill] sm:$0xff] }
 0x393   : > { %v3317_v59 = vrot.slane %v3204_v26, 5  ;;  %v3707_v62 = vrot.slane %v3588_v17, 6  ;;  %v6051_v20 = vpop.f32.mrb[73].mxu1  ;;  %v6147_v12 = vpop.f32.mrb[73].mxu0 }
 0x394   : > { %v3207_v28 = vpop.f32.mrb[74].mxu1  ;;  %v3591_v40 = vpop.f32.mrb[74].mxu0  ;;  %v4209_v38 = vadd.f32 %v4208_v54, %v4168_v22 }
 0x395   : > { %v3365_v14 = vsel %vm3341_vm5, %v3316_v23, %v3317_v59  ;;  %v3759_v51 = vsel %vm3733_vm6, %v3706_v18, %v3707_v62  ;;  %v3318_v19 = vrot.slane %v3207_v28, 5  ;;  %v3708_v29 = vrot.slane %v3591_v40, 6  ;;  %v6148_v35 = vpop.f32.mrb[75].mxu0  ;;  %v6052_v26 = vpop.f32.mrb[75].mxu1 }
 0x396   : > { %v3397_v17 = vadd.f32 %v3365_v14, %v8331_v63  ;;  %v3787_v20 = vadd.f32 %v3759_v51, %v3395_v13  ;;  %v4169_v23 = vmul.f32 %v8675_v55, %v8675_v55  ;;  %v3933_v40 = vpop.permute.xlu0 %3932  ;;  %v3928_v63 = vpop.permute.xlu1 %3927 }
 0x397   : > { %v3364_v24 = vsel %vm3341_vm5, %v3317_v59, %v3318_v19  ;;  %v3758_v61 = vsel %vm3733_vm6, %v3707_v62, %v3708_v29  ;;  %v4121_v62 = vadd.f32 %v4120_v32, %v8675_v55 }
 0x398   : > { %v8689_v18 = vmul.f32 %v3918_v49, %v3787_v20  ;;  %v3398_v12 = vadd.f32 %v3364_v24, %v9244_v7  ;;  %v3788_v28 = vadd.f32 %v3758_v61, %v3396_v6  ;;  %v4210_v35 = vadd.f32 %v4209_v38, %v4169_v23 }
 0x39a   : > { %v3212_v13 = vpop.f32.mrb[76].mxu1  ;;  %v3596_v14 = vpop.f32.mrb[76].mxu0  ;;  %v4170_v22 = vmul.f32 %v8689_v18, %v8689_v18  ;;  %v8695_v26 = vmul.f32 %v3923_v50, %v3788_v28  ;;  %v4122_v32 = vadd.f32 %v4121_v62, %v8689_v18 }
 0x39b   : > { %v3319_v8 = vrot.slane %v3212_v13, 5  ;;  %v3709_v59 = vrot.slane %v3596_v14, 6  ;;  %v6055_v54 = vpop.f32.mrb[77].mxu1  ;;  %v6151_v51 = vpop.f32.mrb[77].mxu0 }
 0x39c   : > { %v3215_v49 = vpop.f32.mrb[78].mxu1  ;;  %v3599_v20 = vpop.f32.mrb[78].mxu0  ;;  %v4211_v38 = vadd.f32 %v4210_v35, %v4170_v22 }
 0x39d   : > { %v3363_v6 = vsel %vm3341_vm5, %v3318_v19, %v3319_v8  ;;  %v3757_v24 = vsel %vm3733_vm6, %v3708_v29, %v3709_v59  ;;  %v3320_v61 = vrot.slane %v3215_v49, 5  ;;  %v3710_v7 = vrot.slane %v3599_v20, 6  ;;  %v6152_v41 = vpop.f32.mrb[79].mxu0  ;;  %v6056_v13 = vpop.f32.mrb[79].mxu1 }
 0x39e   : > { %v3399_v14 = vadd.f32 %v3363_v6, %v8350_v34  ;;  %v3789_v54 = vadd.f32 %v3757_v24, %v3397_v17  ;;  %v4171_v19 = vmul.f32 %v8695_v26, %v8695_v26  ;;  %v3943_v51 = vpop.permute.xlu0 %3942  ;;  %v3938_v34 = vpop.permute.xlu1 %3937 }
 0x39f   : > { %v3362_v50 = vsel %vm3341_vm5, %v3319_v8, %v3320_v61  ;;  %v3756_v23 = vsel %vm3733_vm6, %v3709_v59, %v3710_v7  ;;  %v4123_v59 = vadd.f32 %v4122_v32, %v8695_v26 }
 0x3a0   : > { %v8709_v29 = vmul.f32 %v3928_v63, %v3789_v54  ;;  %v3400_v41 = vadd.f32 %v3362_v50, %v8358_v37  ;;  %v3790_v28 = vadd.f32 %v3756_v23, %v3398_v12  ;;  %v4212_v6 = vadd.f32 %v4211_v38, %v4171_v19 }
 0x3a2   : > { %v3220_v17 = vpop.f32.mrb[80].mxu1  ;;  %v3604_v49 = vpop.f32.mrb[80].mxu0  ;;  %v4172_v22 = vmul.f32 %v8709_v29, %v8709_v29  ;;  %v8715_v24 = vmul.f32 %v3933_v40, %v3790_v28  ;;  %v4124_v32 = vadd.f32 %v4123_v59, %v8709_v29 }
 0x3a3   : > { %v3321_v62 = vrot.slane %v3220_v17, 5  ;;  %v3711_v8 = vrot.slane %v3604_v49, 6  ;;  %v6059_v35 = vpop.f32.mrb[81].mxu1  ;;  %v6155_v20 = vpop.f32.mrb[81].mxu0 }
 0x3a4   : > { %v3223_v63 = vpop.f32.mrb[82].mxu1  ;;  %v3607_v13 = vpop.f32.mrb[82].mxu0  ;;  %v4213_v38 = vadd.f32 %v4212_v6, %v4172_v22 }
 0x3a5   : > { %v3361_v37 = vsel %vm3341_vm5, %v3320_v61, %v3321_v62  ;;  %v3755_v12 = vsel %vm3733_vm6, %v3710_v7, %v3711_v8  ;;  %v3322_v54 = vrot.slane %v3223_v63, 5  ;;  %v3712_v50 = vrot.slane %v3607_v13, 6  ;;  %v6156_v23 = vpop.f32.mrb[83].mxu0  ;;  %v6060_v17 = vpop.f32.mrb[83].mxu1 }
 0x3a6   : > { %v3401_v49 = vadd.f32 %v3361_v37, %v8369_v39  ;;  %v3791_v35 = vadd.f32 %v3755_v12, %v3399_v14  ;;  %v4173_v61 = vmul.f32 %v8715_v24, %v8715_v24  ;;  %v3953_v63 = vpop.permute.xlu0 %3952  ;;  %v3948_v39 = vpop.permute.xlu1 %3947 }
 0x3a7   : > { %v3360_v40 = vsel %vm3341_vm5, %v3321_v62, %v3322_v54  ;;  %v3754_v19 = vsel %vm3733_vm6, %v3711_v8, %v3712_v50  ;;  %v4125_v8 = vadd.f32 %v4124_v32, %v8715_v24 }
 0x3a8   : > { %v8729_v7 = vmul.f32 %v3938_v34, %v3791_v35  ;;  %v3402_v28 = vadd.f32 %v3360_v40, %v8377_v21  ;;  %v3792_v20 = vadd.f32 %v3754_v19, %v3400_v41  ;;  %v4214_v12 = vadd.f32 %v4213_v38, %v4173_v61 }
 0x3aa   : > { %v3228_v14 = vpop.f32.mrb[84].mxu1  ;;  %v3612_v13 = vpop.f32.mrb[84].mxu0  ;;  %v4174_v22 = vmul.f32 %v8729_v7, %v8729_v7  ;;  %v8735_v23 = vmul.f32 %v3943_v51, %v3792_v20  ;;  %v4126_v32 = vadd.f32 %v4125_v8, %v8729_v7 }
 0x3ab   : > { %v3323_v59 = vrot.slane %v3228_v14, 5  ;;  %v3713_v62 = vrot.slane %v3612_v13, 6  ;;  %v6063_v6 = vpop.f32.mrb[85].mxu1  ;;  %v6159_v37 = vpop.f32.mrb[85].mxu0 }
 0x3ac   : > { %v3231_v34 = vpop.f32.mrb[86].mxu1  ;;  %v3615_v17 = vpop.f32.mrb[86].mxu0  ;;  %v4215_v38 = vadd.f32 %v4214_v12, %v4174_v22 }
 0x3ad   : > { %v3359_v21 = vsel %vm3341_vm5, %v3322_v54, %v3323_v59  ;;  %v3753_v41 = vsel %vm3733_vm6, %v3712_v50, %v3713_v62  ;;  %v3324_v35 = vrot.slane %v3231_v34, 5  ;;  %v3714_v40 = vrot.slane %v3615_v17, 6  ;;  %v6160_v19 = vpop.f32.mrb[87].mxu0  ;;  %v6064_v14 = vpop.f32.mrb[87].mxu1 }
 0x3ae   : > { %v3403_v13 = vadd.f32 %v3359_v21, %v8388_v5  ;;  %v3793_v6 = vadd.f32 %v3753_v41, %v3401_v49  ;;  %v4175_v54 = vmul.f32 %v8735_v23, %v8735_v23  ;;  %v3963_v34 = vpop.permute.xlu0 %3962  ;;  %v3958_v5 = vpop.permute.xlu1 %3957 }
 0x3af   : > { %v3358_v51 = vsel %vm3341_vm5, %v3323_v59, %v3324_v35  ;;  %v3752_v61 = vsel %vm3733_vm6, %v3713_v62, %v3714_v40  ;;  %v4127_v62 = vadd.f32 %v4126_v32, %v8735_v23 }
 0x3b0   : > { %v8749_v50 = vmul.f32 %v3948_v39, %v3793_v6  ;;  %v3404_v20 = vadd.f32 %v3358_v51, %v8397_v1  ;;  %v3794_v37 = vadd.f32 %v3752_v61, %v3402_v28  ;;  %v4216_v41 = vadd.f32 %v4215_v38, %v4175_v54 }
 0x3b2   : > { %v3236_v49 = vpop.f32.mrb[88].mxu1  ;;  %v3620_v17 = vpop.f32.mrb[88].mxu0  ;;  %v4176_v22 = vmul.f32 %v8749_v50, %v8749_v50  ;;  %v8755_v19 = vmul.f32 %v3953_v63, %v3794_v37  ;;  %v4128_v32 = vadd.f32 %v4127_v62, %v8749_v50 }
 0x3b3   : > { %v3325_v8 = vrot.slane %v3236_v49, 5  ;;  %v3715_v59 = vrot.slane %v3620_v17, 6  ;;  %v6067_v12 = vpop.f32.mrb[89].mxu1  ;;  %v6163_v21 = vpop.f32.mrb[89].mxu0 }
 0x3b4   : > { %v3239_v39 = vpop.f32.mrb[90].mxu1  ;;  %v3623_v14 = vpop.f32.mrb[90].mxu0  ;;  %v4217_v38 = vadd.f32 %v4216_v41, %v4176_v22 }
 0x3b5   : > { %v3357_v1 = vsel %vm3341_vm5, %v3324_v35, %v3325_v8  ;;  %v3751_v28 = vsel %vm3733_vm6, %v3714_v40, %v3715_v59  ;;  %v3326_v6 = vrot.slane %v3239_v39, 5  ;;  %v3716_v51 = vrot.slane %v3623_v14, 6  ;;  %v6164_v61 = vpop.f32.mrb[91].mxu0  ;;  %v6068_v49 = vpop.f32.mrb[91].mxu1 }
 0x3b6   : > { %v3405_v17 = vadd.f32 %v3357_v1, %v8408_v31  ;;  %v3795_v12 = vadd.f32 %v3751_v28, %v3403_v13  ;;  %v4177_v35 = vmul.f32 %v8755_v19, %v8755_v19  ;;  %v3973_v39 = vpop.permute.xlu0 %3972  ;;  %v3968_v31 = vpop.permute.xlu1 %3967 }
 0x3b7   : > { %v3356_v63 = vsel %vm3341_vm5, %v3325_v8, %v3326_v6  ;;  %v3750_v54 = vsel %vm3733_vm6, %v3715_v59, %v3716_v51  ;;  %v4129_v59 = vadd.f32 %v4128_v32, %v8755_v19 }
 0x3b8   : > { %v8769_v40 = vmul.f32 %v3958_v5, %v3795_v12  ;;  %v3406_v37 = vadd.f32 %v3356_v63, %v8417_v46  ;;  %v3796_v21 = vadd.f32 %v3750_v54, %v3404_v20  ;;  %v4218_v28 = vadd.f32 %v4217_v38, %v4177_v35 }
 0x3ba   : > { %v3244_v13 = vpop.f32.mrb[92].mxu1  ;;  %v3628_v14 = vpop.f32.mrb[92].mxu0  ;;  %v4178_v22 = vmul.f32 %v8769_v40, %v8769_v40  ;;  %v8775_v61 = vmul.f32 %v3963_v34, %v3796_v21  ;;  %v4130_v32 = vadd.f32 %v4129_v59, %v8769_v40 }
 0x3bb   : > { %v3327_v62 = vrot.slane %v3244_v13, 5  ;;  %v3717_v8 = vrot.slane %v3628_v14, 6  ;;  %v6071_v41 = vpop.f32.mrb[93].mxu1  ;;  %v6167_v1 = vpop.f32.mrb[93].mxu0 }
 0x3bc   : > { %v3247_v5 = vpop.f32.mrb[94].mxu1  ;;  %v3631_v49 = vpop.f32.mrb[94].mxu0  ;;  %v4219_v38 = vadd.f32 %v4218_v28, %v4178_v22 }
 0x3bd   : > { %v3355_v46 = vsel %vm3341_vm5, %v3326_v6, %v3327_v62  ;;  %v3749_v20 = vsel %vm3733_vm6, %v3716_v51, %v3717_v8  ;;  %v3328_v12 = vrot.slane %v3247_v5, 5  ;;  %v3718_v63 = vrot.slane %v3631_v49, 6  ;;  %v6168_v54 = vpop.f32.mrb[95].mxu0  ;;  %v6072_v13 = vpop.f32.mrb[95].mxu1 }
 0x3be   : > { %v3407_v14 = vadd.f32 %v3355_v46, %v8426_v25  ;;  %v3797_v41 = vadd.f32 %v3749_v20, %v3405_v17  ;;  %v4179_v6 = vmul.f32 %v8775_v61, %v8775_v61  ;;  %v3983_v5 = vpop.permute.xlu0 %3982  ;;  %v3978_v25 = vpop.permute.xlu1 %3977 }
 0x3bf   : > { %v3354_v34 = vsel %vm3341_vm5, %v3327_v62, %v3328_v12  ;;  %v3748_v35 = vsel %vm3733_vm6, %v3717_v8, %v3718_v63  ;;  %v4131_v8 = vadd.f32 %v4130_v32, %v8775_v61 }
 0x3c0   : > { %v8789_v51 = vmul.f32 %v3968_v31, %v3797_v41  ;;  %v3408_v21 = vadd.f32 %v3354_v34, %v8434_v52  ;;  %v3798_v1 = vadd.f32 %v3748_v35, %v3406_v37  ;;  %v4220_v20 = vadd.f32 %v4219_v38, %v4179_v6 }
 0x3c2   : > { %v3252_v17 = vpop.f32.mrb[96].mxu1  ;;  %v3636_v49 = vpop.f32.mrb[96].mxu0  ;;  %v4180_v22 = vmul.f32 %v8789_v51, %v8789_v51  ;;  %v8795_v54 = vmul.f32 %v3973_v39, %v3798_v1  ;;  %v4132_v32 = vadd.f32 %v4131_v8, %v8789_v51 }
 0x3c3   : > { %v3329_v59 = vrot.slane %v3252_v17, 5  ;;  %v3719_v62 = vrot.slane %v3636_v49, 6  ;;  %v6075_v28 = vpop.f32.mrb[97].mxu1  ;;  %v6171_v46 = vpop.f32.mrb[97].mxu0 }
 0x3c4   : > { %v3255_v31 = vpop.f32.mrb[98].mxu1  ;;  %v3639_v13 = vpop.f32.mrb[98].mxu0  ;;  %v4221_v38 = vadd.f32 %v4220_v20, %v4180_v22 }
 0x3c5   : > { %v3353_v52 = vsel %vm3341_vm5, %v3328_v12, %v3329_v59  ;;  %v3747_v37 = vsel %vm3733_vm6, %v3718_v63, %v3719_v62  ;;  %v3330_v41 = vrot.slane %v3255_v31, 5  ;;  %v3720_v34 = vrot.slane %v3639_v13, 6  ;;  %v6172_v35 = vpop.f32.mrb[99].mxu0  ;;  %v6076_v17 = vpop.f32.mrb[99].mxu1 }
 0x3c6   : > { %v3409_v49 = vadd.f32 %v3353_v52, %v8441_v30  ;;  %v3799_v28 = vadd.f32 %v3747_v37, %v3407_v14  ;;  %v4181_v12 = vmul.f32 %v8795_v54, %v8795_v54  ;;  %v3993_v31 = vpop.permute.xlu0 %3992  ;;  %v3988_v30 = vpop.permute.xlu1 %3987 }
 0x3c7   : > { %v3352_v39 = vsel %vm3341_vm5, %v3329_v59, %v3330_v41  ;;  %v3746_v6 = vsel %vm3733_vm6, %v3719_v62, %v3720_v34  ;;  %v4133_v62 = vadd.f32 %v4132_v32, %v8795_v54 }
 0x3c8   : > { %v8809_v63 = vmul.f32 %v3978_v25, %v3799_v28  ;;  %v3410_v1 = vadd.f32 %v3352_v39, %v8448_v60  ;;  %v3800_v46 = vadd.f32 %v3746_v6, %v3408_v21  ;;  %v4222_v37 = vadd.f32 %v4221_v38, %v4181_v12 }
 0x3ca   : > { %v3260_v14 = vpop.f32.mrb[100].mxu1  ;;  %v3644_v13 = vpop.f32.mrb[100].mxu0  ;;  %v4182_v22 = vmul.f32 %v8809_v63, %v8809_v63  ;;  %v8815_v35 = vmul.f32 %v3983_v5, %v3800_v46  ;;  %v4134_v32 = vadd.f32 %v4133_v62, %v8809_v63 }
 0x3cb   : > { %v3331_v8 = vrot.slane %v3260_v14, 5  ;;  %v3721_v59 = vrot.slane %v3644_v13, 6  ;;  %v6079_v20 = vpop.f32.mrb[101].mxu1  ;;  %v6175_v52 = vpop.f32.mrb[101].mxu0 }
 0x3cc   : > { %v3263_v25 = vpop.f32.mrb[102].mxu1  ;;  %v3647_v17 = vpop.f32.mrb[102].mxu0  ;;  %v4223_v38 = vadd.f32 %v4222_v37, %v4182_v22 }
 0x3cd   : > { %v3351_v60 = vsel %vm3341_vm5, %v3330_v41, %v3331_v8  ;;  %v3745_v21 = vsel %vm3733_vm6, %v3720_v34, %v3721_v59  ;;  %v3332_v28 = vrot.slane %v3263_v25, 5  ;;  %v3722_v39 = vrot.slane %v3647_v17, 6  ;;  %v6176_v6 = vpop.f32.mrb[103].mxu0  ;;  %v6080_v14 = vpop.f32.mrb[103].mxu1 }
 0x3ce   : > { %v3411_v13 = vadd.f32 %v3351_v60, %v8455_v16  ;;  %v3801_v20 = vadd.f32 %v3745_v21, %v3409_v49  ;;  %v4183_v41 = vmul.f32 %v8815_v35, %v8815_v35  ;;  %v4003_v25 = vpop.permute.xlu0 %4002  ;;  %v3998_v16 = vpop.permute.xlu1 %3997 }
 0x3cf   : > { %v3350_v5 = vsel %vm3341_vm5, %v3331_v8, %v3332_v28  ;;  %v3744_v12 = vsel %vm3733_vm6, %v3721_v59, %v3722_v39  ;;  %v4135_v59 = vadd.f32 %v4134_v32, %v8815_v35 }
 0x3d0   : > { %v8829_v34 = vmul.f32 %v3988_v30, %v3801_v20  ;;  %v3412_v46 = vadd.f32 %v3350_v5, %v8462_v57  ;;  %v3802_v52 = vadd.f32 %v3744_v12, %v3410_v1  ;;  %v4224_v21 = vadd.f32 %v4223_v38, %v4183_v41 }
 0x3d2   : > { %v3268_v49 = vpop.f32.mrb[104].mxu1  ;;  %v3652_v17 = vpop.f32.mrb[104].mxu0  ;;  %v4184_v22 = vmul.f32 %v8829_v34, %v8829_v34  ;;  %v8835_v6 = vmul.f32 %v3993_v31, %v3802_v52  ;;  %v4136_v32 = vadd.f32 %v4135_v59, %v8829_v34 }
 0x3d3   : > { %v3333_v62 = vrot.slane %v3268_v49, 5  ;;  %v3723_v8 = vrot.slane %v3652_v17, 6  ;;  %v6083_v37 = vpop.f32.mrb[105].mxu1  ;;  %v6179_v60 = vpop.f32.mrb[105].mxu0 }
 0x3d4   : > { %v3271_v30 = vpop.f32.mrb[106].mxu1  ;;  %v3655_v14 = vpop.f32.mrb[106].mxu0  ;;  %v4225_v38 = vadd.f32 %v4224_v21, %v4184_v22 }
 0x3d5   : > { %v3349_v57 = vsel %vm3341_vm5, %v3332_v28, %v3333_v62  ;;  %v3743_v1 = vsel %vm3733_vm6, %v3722_v39, %v3723_v8  ;;  %v3334_v20 = vrot.slane %v3271_v30, 5  ;;  %v3724_v5 = vrot.slane %v3655_v14, 6  ;;  %v6180_v12 = vpop.f32.mrb[107].mxu0  ;;  %v6084_v49 = vpop.f32.mrb[107].mxu1 }
 0x3d6   : > { %v3413_v17 = vadd.f32 %v3349_v57, %v8469_v9  ;;  %v3803_v37 = vadd.f32 %v3743_v1, %v3411_v13  ;;  %v4185_v28 = vmul.f32 %v8835_v6, %v8835_v6  ;;  %v4013_v30 = vpop.permute.xlu0 %4012  ;;  %v4008_v9 = vpop.permute.xlu1 %4007 }
 0x3d7   : > { %v3348_v31 = vsel %vm3341_vm5, %v3333_v62, %v3334_v20  ;;  %v3742_v41 = vsel %vm3733_vm6, %v3723_v8, %v3724_v5  ;;  %v4137_v8 = vadd.f32 %v4136_v32, %v8835_v6 }
 0x3d8   : > { %v8849_v39 = vmul.f32 %v3998_v16, %v3803_v37  ;;  %v3414_v52 = vadd.f32 %v3348_v31, %v8476_v11  ;;  %v3804_v60 = vadd.f32 %v3742_v41, %v3412_v46  ;;  %v4226_v1 = vadd.f32 %v4225_v38, %v4185_v28 }
 0x3da   : > { %v3276_v13 = vpop.f32.mrb[108].mxu1  ;;  %v3660_v14 = vpop.f32.mrb[108].mxu0  ;;  %v4186_v22 = vmul.f32 %v8849_v39, %v8849_v39  ;;  %v8855_v12 = vmul.f32 %v4003_v25, %v3804_v60 }
 0x3db   : > { %v3335_v59 = vrot.slane %v3276_v13, 5  ;;  %v3725_v62 = vrot.slane %v3660_v14, 6  ;;  %v6087_v21 = vpop.f32.mrb[109].mxu1  ;;  %v6183_v57 = vpop.f32.mrb[109].mxu0  ;;  %v4138_v14 = vadd.f32 %v4137_v8, %v8849_v39 }
 0x3dc   : > { %v3279_v16 = vpop.f32.mrb[110].mxu1  ;;  %v3663_v49 = vpop.f32.mrb[110].mxu0  ;;  %v4227_v38 = vadd.f32 %v4226_v1, %v4186_v22 }
 0x3dd   : > { %v3347_v11 = vsel %vm3341_vm5, %v3334_v20, %v3335_v59  ;;  %v3741_v46 = vsel %vm3733_vm6, %v3724_v5, %v3725_v62  ;;  %v3336_v37 = vrot.slane %v3279_v16, 5  ;;  %v3726_v31 = vrot.slane %v3663_v49, 6  ;;  %v6184_v41 = vpop.f32.mrb[111].mxu0  ;;  %v6088_v13 = vpop.f32.mrb[111].mxu1 }
 0x3de   : > { %v3415_v21 = vadd.f32 %v3347_v11, %v8483_v47  ;;  %v3805_v32 = vadd.f32 %v3741_v46, %v3413_v17  ;;  %v4187_v20 = vmul.f32 %v8855_v12, %v8855_v12  ;;  %v4023_v16 = vpop.permute.xlu0 %4022  ;;  %v4018_v8 = vpop.permute.xlu1 %4017  ;;  %v4139_v47 = vadd.f32 %v4138_v14, %v8855_v12 }
 0x3df   : > { %v3346_v25 = vsel %vm3341_vm5, %v3335_v59, %v3336_v37  ;;  %v3740_v28 = vsel %vm3733_vm6, %v3725_v62, %v3726_v31 }
 0x3e0   : > { %v8869_v5 = vmul.f32 %v4008_v9, %v3805_v32  ;;  %v3416_v60 = vadd.f32 %v3346_v25, %v8490_v42  ;;  %v3806_v57 = vadd.f32 %v3740_v28, %v3414_v52  ;;  %v4228_v9 = vadd.f32 %v4227_v38, %v4187_v20 }
 0x3e2   : > { %v4188_v17 = vmul.f32 %v8869_v5, %v8869_v5  ;;  %v8875_v22 = vmul.f32 %v4013_v30, %v3806_v57  ;;  %v3284_v59 = vpop.f32.mrb[112].mxu1  ;;  %v3668_v1 = vpop.f32.mrb[112].mxu0  ;;  %v4140_v41 = vadd.f32 %v4139_v47, %v8869_v5 }
 0x3e3   : > { %v3337_v62 = vrot.slane %v3284_v59, 5  ;;  %v3727_v49 = vrot.slane %v3668_v1, 6  ;;  %v6091_v11 = vpop.f32.mrb[113].mxu1  ;;  %v6187_v46 = vpop.f32.mrb[113].mxu0 }
 0x3e4   : > { %v3287_v42 = vpop.f32.mrb[114].mxu1  ;;  %v3671_v52 = vpop.f32.mrb[114].mxu0  ;;  %v4229_v57 = vadd.f32 %v4228_v9, %v4188_v17  ;;  %v4189_v59 = vmul.f32 %v8875_v22, %v8875_v22  ;;  %v4141_v1 = vadd.f32 %v4140_v41, %v8875_v22 }
 0x3e5   : > { %v3345_v13 = vsel %vm3341_vm5, %v3336_v37, %v3337_v62  ;;  %v3739_v14 = vsel %vm3733_vm6, %v3726_v31, %v3727_v49  ;;  %v3338_v32 = vrot.slane %v3287_v42, 5  ;;  %v3728_v30 = vrot.slane %v3671_v52, 6  ;;  %v6188_v25 = vpop.f32.mrb[115].mxu0  ;;  %v6092_v28 = vpop.f32.mrb[115].mxu1 }
 0x3e6   : > { %v3417_v38 = vadd.f32 %v3345_v13, %v8497_v15  ;;  %v3807_v20 = vadd.f32 %v3739_v14, %v3415_v21  ;;  %v4033_v17 = vpop.permute.xlu0 %4032  ;;  %v4028_v9 = vpop.permute.xlu1 %4027  ;;  %v4230_v42 = vadd.f32 %v4229_v57, %v4189_v59 }
 0x3e7   : > { %v3344_v47 = vsel %vm3341_vm5, %v3337_v62, %v3338_v32  ;;  %v3738_v37 = vsel %vm3733_vm6, %v3727_v49, %v3728_v30 }
 0x3e8   : > { %v8890_v31 = vmul.f32 %v4018_v8, %v3807_v20  ;;  %v3418_v11 = vadd.f32 %v3344_v47, %v8509_v33  ;;  %v3808_v46 = vadd.f32 %v3738_v37, %v3416_v60 }
 0x3ea   : > { %v4142_v52 = vadd.f32 %v4141_v1, %v8890_v31  ;;  %v4190_v15 = vmul.f32 %v8890_v31, %v8890_v31  ;;  %v8896_v21 = vmul.f32 %v4023_v16, %v3808_v46  ;;  %v3292_v62 = vpop.f32.mrb[116].mxu1  ;;  %v3676_v13 = vpop.f32.mrb[116].mxu0 }
 0x3eb   : > { %v3339_v49 = vrot.slane %v3292_v62, 5  ;;  %v3729_v14 = vrot.slane %v3676_v13, 6  ;;  %v6095_v41 = vpop.f32.mrb[117].mxu1  ;;  %v6191_v8 = vpop.f32.mrb[117].mxu0  ;;  %v9245_v13 = vrot.slane %v8511_v36, 5 }
 0x3ec   : > { %v4231_v25 = vadd.f32 %v4230_v42, %v4190_v15  ;;  %v4143_v33 = vadd.f32 %v4142_v52, %v8896_v21  ;;  %v4191_v60 = vmul.f32 %v8896_v21, %v8896_v21  ;;  %v3295_v28 = vpop.f32.mrb[118].mxu1  ;;  %v3679_v57 = vpop.f32.mrb[118].mxu0 }
 0x3ed   : > { %v3343_v59 = vsel %vm3341_vm5, %v3338_v32, %v3339_v49  ;;  %v3737_v16 = vsel %vm3733_vm6, %v3728_v30, %v3729_v14  ;;  %v3340_v20 = vrot.slane %v3295_v28, 5  ;;  %v3730_v47 = vrot.slane %v3679_v57, 6  ;;  %v6192_v37 = vpop.f32.mrb[119].mxu0  ;;  %v6096_v1 = vpop.f32.mrb[119].mxu1 }
 0x3ee   : > { %v4232_v46 = vadd.f32 %v4231_v25, %v4191_v60  ;;  %v3419_v42 = vadd.f32 %v3343_v59, %v8519_v45  ;;  %v3809_v15 = vadd.f32 %v3737_v16, %v3417_v38  ;;  %v4038_v52 = vpop.permute.xlu1 %4037  ;;  %v4043_v28 = vpop.permute.xlu0 %4042 }
 0x3ef   : > { %v3342_v62 = vsel %vm3341_vm5, %v3339_v49, %v3340_v20  ;;  %v3383_v32 = vsel %vm3341_vm5, %v3340_v20, %v9245_v13  ;;  %v3736_v30 = vsel %vm3733_vm6, %v3729_v14, %v3730_v47 }
 0x3f0   : > { %v8914_v41 = vmul.f32 %v4028_v9, %v3809_v15  ;;  %v3420_v8 = vadd.f32 %v3342_v62, %v8531_v53  ;;  %v3421_v25 = vadd.f32 %v3383_v32, %v8533_v4  ;;  %v3810_v45 = vadd.f32 %v3736_v30, %v3418_v11 }
 0x3f1   : > { %v9246_v15 = vrot.slane %v8535_v3, 6 }
 0x3f2   : > { %v4144_v38 = vadd.f32 %v4143_v33, %v8914_v41  ;;  %v4192_v49 = vmul.f32 %v8914_v41, %v8914_v41  ;;  %v8921_v60 = vmul.f32 %v4033_v17, %v3810_v45  ;;  %v3684_v36 = vpop.f32.mrb[120].mxu0  ;;  %v4048_v4 = vpop.permute.xlu1 %4047 }
 0x3f3   : > { %v3731_v57 = vrot.slane %v3684_v36, 6  ;;  %v6195_v59 = vpop.f32.mrb[121].mxu0  ;;  %v4053_v30 = vpop.permute.xlu0 %4052 }
 0x3f4   : > { %v4233_v16 = vadd.f32 %v4232_v46, %v4192_v49  ;;  %v4145_v9 = vadd.f32 %v4144_v38, %v8921_v60  ;;  %v4193_v53 = vmul.f32 %v8921_v60, %v8921_v60  ;;  %v3687_v14 = vpop.f32.mrb[122].mxu0  ;;  %v8944_v3 = vmul.f32 %v4053_v30, %v8547_v44 }
 0x3f5   : > { %v3735_v11 = vsel %vm3733_vm6, %v3730_v47, %v3731_v57  ;;  %v3732_v33 = vrot.slane %v3687_v14, 6  ;;  %v6196_v20 = vpop.f32.mrb[123].mxu0  ;;  %v9248_v14 = vld [vmem:[#allocation4_spill] sm:$0xff] }
 0x3f6   : > { %v4234_v37 = vadd.f32 %v4233_v16, %v4193_v53  ;;  %v3811_v17 = vadd.f32 %v3735_v11, %v3419_v42  ;;  %v4058_v49 = vpop.permute.xlu1 %4057  ;;  %v4197_v44 = vmul.f32 %v8944_v3, %v8944_v3 }
 0x3f7   : > { %v3734_v1 = vsel %vm3733_vm6, %v3731_v57, %v3732_v33  ;;  %v3775_v46 = vsel %vm3733_vm6, %v3732_v33, %v9246_v15  ;;  %v9247_v57 = vld [vmem:[#allocation3_spill] sm:$0xff] }
 0x3f8   : > { %v8934_v62 = vmul.f32 %v4038_v52, %v3811_v17  ;;  %v3812_v13 = vadd.f32 %v3734_v1, %v3420_v8  ;;  %v3813_v32 = vadd.f32 %v3775_v46, %v3421_v25  ;;  %v4063_v25 = vpop.permute.xlu0 %4062  ;;  %v8950_v59 = vmul.f32 %v4058_v49, %v9247_v57 }
 0x3fa   : > { %v4146_v45 = vadd.f32 %v4145_v9, %v8934_v62  ;;  %v4194_v47 = vmul.f32 %v8934_v62, %v8934_v62  ;;  %v8939_v38 = vmul.f32 %v4043_v28, %v3812_v13  ;;  %v8941_v42 = vmul.f32 %v4048_v4, %v3813_v32  ;;  %v4068_v53 = vpop.permute.xlu1 %4067 }
 0x3fb   : > { %v8958_v4 = vmul.f32 %v4063_v25, %v9248_v14  ;;  %v4198_v20 = vmul.f32 %v8950_v59, %v8950_v59 }
 0x3fc   : > { %v4235_v36 = vadd.f32 %v4234_v37, %v4194_v47  ;;  %v4147_v52 = vadd.f32 %v4146_v45, %v8939_v38  ;;  %v4195_v8 = vmul.f32 %v8939_v38, %v8939_v38  ;;  %v4196_v28 = vmul.f32 %v8941_v42, %v8941_v42  ;;  %v9249_v37 = vld [vmem:[#allocation5_spill] sm:$0xff] }
 0x3fd   : > { %v8964_v17 = vmul.f32 %v4068_v53, %v9249_v37  ;;  %v4199_v46 = vmul.f32 %v8958_v4, %v8958_v4 }
 0x3fe   : > { %v4148_v16 = vadd.f32 %v4147_v52, %v8941_v42  ;;  %v4236_v9 = vadd.f32 %v4235_v36, %v4195_v8 }
 0x3ff   : > { %v4200_v30 = vmul.f32 %v8964_v17, %v8964_v17 }
 0x400   : > { %v4149_v11 = vadd.f32 %v4148_v16, %v8944_v3  ;;  %v4237_v33 = vadd.f32 %v4236_v9, %v4196_v28 }
 0x402   : > { %v4150_v1 = vadd.f32 %v4149_v11, %v8950_v59  ;;  %v4238_v15 = vadd.f32 %v4237_v33, %v4197_v44 }
 0x404   : > { %v4151_v13 = vadd.f32 %v4150_v1, %v8958_v4  ;;  %v4239_v32 = vadd.f32 %v4238_v15, %v4198_v20 }
 0x406   : > { %v4152_v45 = vadd.f32 %v4151_v13, %v8964_v17  ;;  %v4240_v47 = vadd.f32 %v4239_v32, %v4199_v46  ;;  %v4254_v46 = vld [vmem:[%s9188_s3] sm:$0x1]  ;;  %v4261_v13 = vsub.s32 0, %v6878_v2 }
 0x408   : > { %v4153_v49 = vrot.slane %v4152_v45, 4  ;;  %v4241_v36 = vadd.f32 %v4240_v47, %v4200_v30 }
 0x40a   : > { %v4154_v52 = vadd.f32 %v4153_v49, %v4152_v45  ;;  %v4242_v8 = vrot.slane %v4241_v36, 4  ;;  %v4256_v45 = vld [vmem:[%s9189_s4] sm:$0x1] }
 0x40c   : > { %v4155_v25 = vrot.slane %v4154_v52, 2  ;;  %v4243_v57 = vadd.f32 %v4242_v8, %v4241_v36 }
 0x40e   : > { %v4156_v16 = vadd.f32 %v4155_v25, %v4154_v52  ;;  %v4244_v28 = vrot.slane %v4243_v57, 2  ;;  %v9250_v52 = vld [vmem:[#allocation6_spill] sm:$0xff]  ;;  %v9251_v25 = vld [vmem:[#allocation7_spill] sm:$0xff] }
 0x410   : > { %v4157_v9 = vrot.slane %v4156_v16, 1  ;;  %v4245_v53 = vadd.f32 %v4244_v28, %v4243_v57 }
 0x412   : > { %v4158_v44 = vadd.f32 %v4157_v9, %v4156_v16  ;;  %v4246_v14 = vrot.slane %v4245_v53, 1 }
 0x414   : > { %v4247_v11 = vadd.f32 %v4246_v14, %v4245_v53  ;;  %v4248_v33 = vmul.f32 0.00390625, %v4158_v44 }
 0x416   : > { %v4249_v20 = vmul.f32 0.00390625, %v4247_v11  ;;  %v4250_v37 = vmul.f32 %v4248_v33, %v4248_v33  ;;  %v9252_v11 = vld [vmem:[#allocation8_spill] sm:$0xff] }
 0x418   : > { %v4251_v1 = vsub.f32 %v4249_v20, %v4250_v37 }
 0x41a   : > { %v4252_v15 = vadd.f32 1e-05, %v4251_v1 }
 0x41c   : > { %6336 = vrsqrt.f32 %v4252_v15 }
 0x426   : > { %v6337_v32 = vpop.eup %6336 }
 0x427   : > { %v4255_v30 = vmul.f32 %v6337_v32, %v4254_v46 }
 0x429   : > { %v4257_v47 = vmul.f32 %v4255_v30, %v4248_v33  ;;  %v4262_v49 = vrot.slane %v4255_v30, %v4261_v13 }
 0x42b   : > { %v4258_v36 = vsub.f32 %v4256_v45, %v4257_v47  ;;  %v4263_v8 = vmul.f32 %v4262_v49, %v9250_v52  ;;  %v4264_v57 = vmul.f32 %v4262_v49, %v9251_v25  ;;  %v4265_v16 = vmul.f32 %v4262_v49, %v8594_v56 }
 0x42c   : > { %v4266_v28 = vmul.f32 %v4262_v49, %v8609_v58  ;;  %v4267_v9 = vmul.f32 %v4262_v49, %v8615_v43  ;;  %v4268_v2 = vmul.f32 %v4262_v49, %v8629_v27  ;;  %v4269_v53 = vmul.f32 %v4262_v49, %v8635_v0 }
 0x42d   : > { %v4270_v44 = vmul.f32 %v4262_v49, %v8649_v10  ;;  %v4271_v14 = vmul.f32 %v4262_v49, %v8655_v48  ;;  %v4272_v33 = vmul.f32 %v4262_v49, %v9252_v11  ;;  %v4273_v20 = vmul.f32 %v4262_v49, %v8675_v55 }
 0x42e   : > { %v4274_v37 = vmul.f32 %v4262_v49, %v8689_v18  ;;  %v4275_v56 = vmul.f32 %v4262_v49, %v8695_v26  ;;  %v4276_v58 = vmul.f32 %v4262_v49, %v8709_v29  ;;  %v4277_v43 = vmul.f32 %v4262_v49, %v8715_v24 }
 0x42f   : > { %v4278_v27 = vmul.f32 %v4262_v49, %v8729_v7  ;;  %v4279_v0 = vmul.f32 %v4262_v49, %v8735_v23  ;;  %v4280_v10 = vmul.f32 %v4262_v49, %v8749_v50  ;;  %v4281_v48 = vmul.f32 %v4262_v49, %v8755_v19 }
 0x430   : > { %v4282_v1 = vmul.f32 %v4262_v49, %v8769_v40  ;;  %v4283_v55 = vmul.f32 %v4262_v49, %v8775_v61  ;;  %v4284_v18 = vmul.f32 %v4262_v49, %v8789_v51  ;;  %v4285_v26 = vmul.f32 %v4262_v49, %v8795_v54 }
 0x431   : > { %v4286_v29 = vmul.f32 %v4262_v49, %v8809_v63  ;;  %v4287_v24 = vmul.f32 %v4262_v49, %v8815_v35  ;;  %v4288_v7 = vmul.f32 %v4262_v49, %v8829_v34  ;;  %v4293_v23 = vmul.f32 %v4262_v49, %v8875_v22 }
 0x432   : > { %v4294_v50 = vmul.f32 %v4262_v49, %v8890_v31  ;;  %v4295_v19 = vmul.f32 %v4262_v49, %v8896_v21  ;;  %v4296_v40 = vmul.f32 %v4262_v49, %v8914_v41  ;;  %v4297_v61 = vmul.f32 %v4262_v49, %v8921_v60 }
 0x433   : > { %v4298_v51 = vmul.f32 %v4262_v49, %v8934_v62  ;;  %v4299_v54 = vmul.f32 %v4262_v49, %v8939_v38  ;;  %v4300_v63 = vmul.f32 %v4262_v49, %v8941_v42  ;;  %v4301_v35 = vmul.f32 %v4262_v49, %v8944_v3 }
 0x434   : > { %v4302_v34 = vmul.f32 %v4262_v49, %v8950_v59  ;;  %v4303_v22 = vmul.f32 %v4262_v49, %v8958_v4  ;;  %v4304_v31 = vmul.f32 %v4262_v49, %v8964_v17  ;;  %v4309_v15 = vrot.slane %v4258_v36, %v4261_v13 }
 0x435   : > { %v4289_v21 = vmul.f32 %v4262_v49, %v8835_v6  ;;  %v4290_v41 = vmul.f32 %v4262_v49, %v8849_v39  ;;  %v4291_v60 = vmul.f32 %v4262_v49, %v8855_v12  ;;  %v4292_v62 = vmul.f32 %v4262_v49, %v8869_v5 }
 0x436   : > { %v9022_v38 = vadd.f32 %v4309_v15, %v4263_v8  ;;  %v9024_v42 = vadd.f32 %v4309_v15, %v4264_v57  ;;  %v9026_v3 = vadd.f32 %v4309_v15, %v4265_v16  ;;  %v9028_v59 = vadd.f32 %v4309_v15, %v4266_v28 }
 0x437   : > { %v9030_v4 = vadd.f32 %v4309_v15, %v4267_v9  ;;  %v9032_v17 = vadd.f32 %v4309_v15, %v4268_v2  ;;  %v9034_v46 = vadd.f32 %v4309_v15, %v4269_v53  ;;  %v9036_v6 = vadd.f32 %v4309_v15, %v4270_v44 }
 0x438   : > { %v9038_v39 = vadd.f32 %v4309_v15, %v4271_v14  ;;  %v9040_v12 = vadd.f32 %v4309_v15, %v4272_v33  ;;  %v9042_v5 = vadd.f32 %v4309_v15, %v4273_v20  ;;  %v9044_v13 = vadd.f32 %v4309_v15, %v4274_v37 }
 0x439   : > { %v9046_v32 = vadd.f32 %v4309_v15, %v4275_v56  ;;  %v9048_v30 = vadd.f32 %v4309_v15, %v4276_v58  ;;  %v9050_v45 = vadd.f32 %v4309_v15, %v4277_v43  ;;  %v9052_v47 = vadd.f32 %v4309_v15, %v4278_v27 }
 0x43a   : > { %v9054_v49 = vadd.f32 %v4309_v15, %v4279_v0  ;;  %v9056_v36 = vadd.f32 %v4309_v15, %v4280_v10  ;;  %v9058_v52 = vadd.f32 %v4309_v15, %v4281_v48  ;;  %v9060_v8 = vadd.f32 %v4309_v15, %v4282_v1 }
 0x43b   : > { %v9062_v25 = vadd.f32 %v4309_v15, %v4283_v55  ;;  %v9064_v57 = vadd.f32 %v4309_v15, %v4284_v18  ;;  %v9066_v16 = vadd.f32 %v4309_v15, %v4285_v26  ;;  %v9068_v28 = vadd.f32 %v4309_v15, %v4286_v29 }
 0x43c   : > { %v9070_v9 = vadd.f32 %v4309_v15, %v4287_v24  ;;  %v9072_v2 = vadd.f32 %v4309_v15, %v4288_v7  ;;  %v9074_v53 = vadd.f32 %v4309_v15, %v4289_v21  ;;  %v9076_v44 = vadd.f32 %v4309_v15, %v4290_v41 }
 0x43d   : > { %v9078_v14 = vadd.f32 %v4309_v15, %v4291_v60  ;;  %v9080_v11 = vadd.f32 %v4309_v15, %v4292_v62  ;;  %v9082_v33 = vadd.f32 %v4309_v15, %v4293_v23  ;;  %v9084_v20 = vadd.f32 %v4309_v15, %v4294_v50 }
 0x43e   : > { %v9086_v37 = vadd.f32 %v4309_v15, %v4295_v19  ;;  %v9088_v56 = vadd.f32 %v4309_v15, %v4296_v40  ;;  %v9090_v58 = vadd.f32 %v4309_v15, %v4297_v61  ;;  %v9092_v43 = vadd.f32 %v4309_v15, %v4298_v51 }
 0x43f   : > { %v9094_v27 = vadd.f32 %v4309_v15, %v4299_v54  ;;  %v9096_v0 = vadd.f32 %v4309_v15, %v4300_v63  ;;  %v9098_v10 = vadd.f32 %v4309_v15, %v4301_v35  ;;  %v9100_v48 = vadd.f32 %v4309_v15, %v4302_v34 }
 0x440   : > { %v9102_v1 = vadd.f32 %v4309_v15, %v4303_v22  ;;  %v9104_v55 = vadd.f32 %v4309_v15, %v4304_v31  ;;  %v4353_v18 = vmax.f32 %v9022_v38, 0.0  ;;  %v4354_v26 = vmax.f32 %v9024_v42, 0.0 }
 0x441   : > { %v4355_v29 = vmax.f32 %v9026_v3, 0.0  ;;  %v4356_v24 = vmax.f32 %v9028_v59, 0.0  ;;  %v4357_v7 = vmax.f32 %v9030_v4, 0.0  ;;  %v4358_v23 = vmax.f32 %v9032_v17, 0.0 }
 0x442   : > { %v4359_v50 = vmax.f32 %v9034_v46, 0.0  ;;  %v4360_v19 = vmax.f32 %v9036_v6, 0.0  ;;  %v4361_v40 = vmax.f32 %v9038_v39, 0.0  ;;  %v4362_v61 = vmax.f32 %v9040_v12, 0.0 }
 0x443   : > { %v4363_v51 = vmax.f32 %v9042_v5, 0.0  ;;  %v4364_v54 = vmax.f32 %v9044_v13, 0.0  ;;  %v4365_v63 = vmax.f32 %v9046_v32, 0.0  ;;  %v4366_v35 = vmax.f32 %v9048_v30, 0.0 }
 0x444   : > { %v4367_v34 = vmax.f32 %v9050_v45, 0.0  ;;  %v4368_v22 = vmax.f32 %v9052_v47, 0.0  ;;  %v4369_v31 = vmax.f32 %v9054_v49, 0.0  ;;  %v4370_v15 = vmax.f32 %v9056_v36, 0.0 }
 0x445   : > { %v4371_v21 = vmax.f32 %v9058_v52, 0.0  ;;  %v4372_v41 = vmax.f32 %v9060_v8, 0.0  ;;  %v4373_v60 = vmax.f32 %v9062_v25, 0.0  ;;  %v4374_v62 = vmax.f32 %v9064_v57, 0.0 }
 0x446   : > { %v4375_v38 = vmax.f32 %v9066_v16, 0.0  ;;  %v4376_v42 = vmax.f32 %v9068_v28, 0.0  ;;  %v4377_v3 = vmax.f32 %v9070_v9, 0.0  ;;  %v4378_v59 = vmax.f32 %v9072_v2, 0.0 }
 0x447   : > { %v4379_v4 = vmax.f32 %v9074_v53, 0.0  ;;  %v4380_v17 = vmax.f32 %v9076_v44, 0.0  ;;  %v4381_v46 = vmax.f32 %v9078_v14, 0.0  ;;  %v4382_v6 = vmax.f32 %v9080_v11, 0.0 }
 0x448   : > { %v4383_v39 = vmax.f32 %v9082_v33, 0.0  ;;  %v4384_v12 = vmax.f32 %v9084_v20, 0.0  ;;  %v4385_v5 = vmax.f32 %v9086_v37, 0.0  ;;  %v4386_v13 = vmax.f32 %v9088_v56, 0.0 }
 0x449   : > { %v4387_v32 = vmax.f32 %v9090_v58, 0.0  ;;  %v4388_v30 = vmax.f32 %v9092_v43, 0.0  ;;  %v4389_v45 = vmax.f32 %v9094_v27, 0.0  ;;  %v4390_v47 = vmax.f32 %v9096_v0, 0.0 }
 0x44a   : > { %v4391_v49 = vmax.f32 %v9098_v10, 0.0  ;;  %v4392_v36 = vmax.f32 %v9100_v48, 0.0  ;;  %v4393_v52 = vmax.f32 %v9102_v1, 0.0  ;;  %v4394_v8 = vmax.f32 %v9104_v55, 0.0 }
 0x44b   : > { %v4914_v25 = vpack.c.bf16 %v4354_v26, %v4353_v18  ;;  %v4919_v57 = vpack.c.bf16 %v4356_v24, %v4355_v29  ;;  %v4924_v16 = vpack.c.bf16 %v4358_v23, %v4357_v7  ;;  %v4929_v28 = vpack.c.bf16 %v4360_v19, %v4359_v50 }
 0x44c   : > { %v4934_v9 = vpack.c.bf16 %v4362_v61, %v4361_v40  ;;  %v4939_v2 = vpack.c.bf16 %v4364_v54, %v4363_v51  ;;  %v4944_v53 = vpack.c.bf16 %v4366_v35, %v4365_v63  ;;  %v4949_v44 = vpack.c.bf16 %v4368_v22, %v4367_v34 }
 0x44d   : > { %4915 = vst [vmem:[%s9149_s30] sm:$0xff] %v4914_v25   ;;  %5016 = vst [vmem:[%s9149_s30 + $0x8] sm:$0xff] %v4919_v57   ;;  %v4954_v14 = vpack.c.bf16 %v4370_v15, %v4369_v31  ;;  %v4959_v11 = vpack.c.bf16 %v4372_v41, %v4371_v21  ;;  %v4964_v33 = vpack.c.bf16 %v4374_v62, %v4373_v60 }
 0x44e   : > { %5017 = vst [vmem:[%s9149_s30 + $0x10] sm:$0xff] %v4924_v16   ;;  %5018 = vst [vmem:[%s9149_s30 + $0x18] sm:$0xff] %v4929_v28   ;;  %v4969_v20 = vpack.c.bf16 %v4376_v42, %v4375_v38  ;;  %v4974_v37 = vpack.c.bf16 %v4378_v59, %v4377_v3  ;;  %v4979_v56 = vpack.c.bf16 %v4380_v17, %v4379_v4 }
 0x44f   : > { %5019 = vst [vmem:[%s9149_s30 + $0x20] sm:$0xff] %v4934_v9   ;;  %5020 = vst [vmem:[%s9149_s30 + $0x28] sm:$0xff] %v4939_v2   ;;  %v4984_v58 = vpack.c.bf16 %v4382_v6, %v4381_v46  ;;  %v4989_v43 = vpack.c.bf16 %v4384_v12, %v4383_v39  ;;  %v4994_v27 = vpack.c.bf16 %v4386_v13, %v4385_v5 }
 0x450   : > { %5021 = vst [vmem:[%s9149_s30 + $0x30] sm:$0xff] %v4944_v53   ;;  %5022 = vst [vmem:[%s9149_s30 + $0x38] sm:$0xff] %v4949_v44   ;;  %v4999_v0 = vpack.c.bf16 %v4388_v30, %v4387_v32  ;;  %v5004_v10 = vpack.c.bf16 %v4390_v47, %v4389_v45  ;;  %v5009_v48 = vpack.c.bf16 %v4392_v36, %v4391_v49 }
 0x451   : > { %5023 = vst [vmem:[%s9149_s30 + $0x40] sm:$0xff] %v4954_v14   ;;  %5024 = vst [vmem:[%s9149_s30 + $0x48] sm:$0xff] %v4959_v11   ;;  %v5014_v1 = vpack.c.bf16 %v4394_v8, %v4393_v52 }
 0x452   : > { %5025 = vst [vmem:[%s9149_s30 + $0x50] sm:$0xff] %v4964_v33   ;;  %5026 = vst [vmem:[%s9149_s30 + $0x58] sm:$0xff] %v4969_v20  }
 0x453   : > { %5027 = vst [vmem:[%s9149_s30 + $0x60] sm:$0xff] %v4974_v37   ;;  %5028 = vst [vmem:[%s9149_s30 + $0x68] sm:$0xff] %v4979_v56  }
 0x454   : > { %5029 = vst [vmem:[%s9149_s30 + $0x70] sm:$0xff] %v4984_v58   ;;  %5030 = vst [vmem:[%s9149_s30 + $0x78] sm:$0xff] %v4989_v43  }
 0x455   : > { %5031 = vst [vmem:[%s9149_s30 + $0x80] sm:$0xff] %v4994_v27   ;;  %5032 = vst [vmem:[%s9149_s30 + $0x88] sm:$0xff] %v4999_v0  }
 0x456   : > { %5033 = vst [vmem:[%s9149_s30 + $0x90] sm:$0xff] %v5004_v10   ;;  %5034 = vst [vmem:[%s9149_s30 + $0x98] sm:$0xff] %v5009_v48  }
 0x457   : > { %5035 = vst [vmem:[%s9149_s30 + $0xa0] sm:$0xff] %v5014_v1  }
 0x458 PF: > { %s15_s20 = sadd.s32 1, %s6412_s20   ;;  %s9253_s18 = smov %s6408_s19 }
 0x459   : > { %p12_p5 = scmp.ge.s32.totalorder %s15_s20, 4   ;;  %s9254_s19 = smov %s9256_s21 }
 0x45b   :  { %14 = sbr.rel (!%p12_p5) target bundleno = 2 (0x2), region = 79 }

</bundles_post_ra>
